<compile_context>
chip_gen: v5e
topology: v5e:2x2
jax: 0.10.0
libtpu: 0.0.40
codegen_flags: <defaults>
</compile_context>

<pallas_src>
import numpy as np
import jax
import jax.numpy as jnp
from jax.experimental import pallas as pl
from jax.experimental.pallas import tpu as pltpu


NC, NDF, LATENT = 4, 8, 32
IMG = 16
ENC_PAD = 128           # f_enc projection padded to a full lane tile


def _round_up(x, m):
    return (x + m - 1) // m * m


# ----------------------------------------------------------------------------
# One-time host-side prep: lower each conv / conv-transpose to a dense GEMM
# over flattened feature maps (pure numpy, runs once per parameter set).
# ----------------------------------------------------------------------------
def _flatten_gemm(Wb, b, in_order, out_order):
    Hin, Win, Cin, Hout, Wout, Cout = Wb.shape
    if in_order == "CHW":                       # input flattened as (c, h, w)
        Wb = Wb.transpose(2, 0, 1, 3, 4, 5)
    if out_order == "CHW":                      # output flattened as (c, h, w)
        Wb = Wb.transpose(0, 1, 2, 5, 3, 4)
        bb = np.repeat(b, Hout * Wout)
    else:                                       # output flattened as (h, w, c)
        bb = np.tile(b, Hout * Wout)
    return Wb.reshape(Hin * Win * Cin, Hout * Wout * Cout), bb


def _conv_as_gemm(w, b, Hin, Win, stride, pad, in_order, out_order):
    # w: [Cout, Cin, kh, kw]  (PyTorch Conv2d layout)
    Cout, Cin, kh, kw = w.shape
    Hout = (Hin + 2 * pad - kh) // stride + 1
    Wout = (Win + 2 * pad - kw) // stride + 1
    Wb = np.zeros((Hin, Win, Cin, Hout, Wout, Cout), np.float32)
    for ho in range(Hout):
        for wo in range(Wout):
            for i in range(kh):
                for j in range(kw):
                    h = ho * stride + i - pad
                    ww = wo * stride + j - pad
                    if 0 <= h < Hin and 0 <= ww < Win:
                        Wb[h, ww, :, ho, wo, :] += w[:, :, i, j].T   # [Cin, Cout]
    return _flatten_gemm(Wb, b, in_order, out_order)


def _convT_as_gemm(w, b, Hin, Win, stride, pad, in_order, out_order):
    # w: [Cin, Cout, kh, kw]  (PyTorch ConvTranspose2d layout)
    Cin, Cout, kh, kw = w.shape
    Hout = (Hin - 1) * stride - 2 * pad + kh
    Wout = (Win - 1) * stride - 2 * pad + kw
    Wb = np.zeros((Hin, Win, Cin, Hout, Wout, Cout), np.float32)
    for hi in range(Hin):
        for wi in range(Win):
            for i in range(kh):
                for j in range(kw):
                    ho = hi * stride + i - pad
                    wo = wi * stride + j - pad
                    if 0 <= ho < Hout and 0 <= wo < Wout:
                        Wb[hi, wi, :, ho, wo, :] += w[:, :, i, j]     # [Cin, Cout]
    return _flatten_gemm(Wb, b, in_order, out_order)


_LAYER_SPECS = (
    # (w key, b key, kind, Hin, Win, stride, pad, in_order, out_order)
    ("e1_w", "e1_b", "conv",  IMG, IMG, 2, 1, "CHW", "HWC"),   # x arrives NCHW-flattened
    ("e2_w", "e2_b", "conv",    8,   8, 2, 1, "HWC", "HWC"),
    ("e3_w", "e3_b", "conv",    4,   4, 1, 0, "HWC", "HWC"),   # f_enc: [N, 32]
    ("d1_w", "d1_b", "convT",   1,   1, 1, 0, "HWC", "HWC"),
    ("d2_w", "d2_b", "convT",   4,   4, 2, 1, "HWC", "HWC"),
    ("d3_w", "d3_b", "convT",   8,   8, 2, 1, "HWC", "CHW"),   # f_dec in NCHW flatten order
)


def prepare_gemm_params(params):
    raw = []
    for wk, bk, kind, Hin, Win, s, p, io, oo in _LAYER_SPECS:
        w = np.asarray(params[wk], np.float32)
        b = np.asarray(params[bk], np.float32)
        fn = _conv_as_gemm if kind == "conv" else _convT_as_gemm
        raw.append(fn(w, b, Hin, Win, s, p, io, oo))

    (W1, b1), (W2, b2), (W3, b3), (W4, b4), (W5, b5), (W6, b6) = raw

    # Fold e3 (latent projection) with d1 (first ConvT) — no nonlinearity in
    # between — IN F32, before any bf16 cast:  d1(x) = x @ (W3 @ W4) + (b3 @ W4 + b4)
    W34 = W3 @ W4                                   # [256, 256]
    b34 = b3 @ W4 + b4                              # [256]

    # Zero-pad the f_enc projection to 128 lanes -> unmasked, lane-dense stores.
    W3p = np.zeros((W3.shape[0], ENC_PAD), np.float32)
    W3p[:, :W3.shape[1]] = W3
    b3p = np.zeros((ENC_PAD,), np.float32)
    b3p[:b3.shape[0]] = b3

    layers = [(W1, b1), (W2, b2), (W3p, b3p), (W34, b34), (W5, b5), (W6, b6)]
    return tuple((jnp.asarray(W, jnp.bfloat16),      # MXU-native dtype
                  jnp.asarray(b[None, :], jnp.float32))
                 for W, b in layers)


# ----------------------------------------------------------------------------
# Single fused Pallas kernel: whole encoder + decoder on one batch block.
# ----------------------------------------------------------------------------
def _netd_kernel(x_ref, w1, b1, w2, b2, w3, b3, w34, b34, w5, b5, w6, b6,
                 enc_ref, dec_ref):
    def gemm(h_bf16, w_ref, b_ref):
        return jnp.dot(h_bf16, w_ref[...],
                       preferred_element_type=jnp.float32) + b_ref[...]

    lrelu = lambda t: jnp.where(t > 0, t, 0.2 * t)

    # encoder (BN = eval-mode identity)
    h1 = lrelu(gemm(x_ref[...], w1, b1))
    h2 = lrelu(gemm(h1.astype(jnp.bfloat16), w2, b2))
    h2b = h2.astype(jnp.bfloat16)

    # f_enc: W3 padded to 128 output lanes on the host -> full, unmasked store.
    enc_ref[...] = gemm(h2b, w3, b3).astype(enc_ref.dtype)

    # decoder; first layer folded with e3 on the host (W34 = W3 @ W4, b34 = b3@W4+b4)
    g1 = jnp.maximum(gemm(h2b, w34, b34), 0.0)
    g2 = jnp.maximum(gemm(g1.astype(jnp.bfloat16), w5, b5), 0.0)
    dec_ref[...] = jnp.tanh(gemm(g2.astype(jnp.bfloat16), w6, b6)).astype(dec_ref.dtype)


def _pick_batch_tile(n):
    """Chip-aware batch tile: fill the MXU M dim, keep >=2 grid steps on v7x."""
    bp = _round_up(max(n, 8), 8)
    kind = jax.devices()[0].device_kind.lower()
    is_v7 = ("v7" in kind) or ("7x" in kind)
    cap = 256 if (("v6" in kind) or is_v7) else 128       # v5e MXU is 128-row
    tb = min(cap, bp)
    if is_v7 and bp >= 16:
        # ensure >=2 grid steps so the ("parallel",) axis shards across both TCs
        tb = min(tb, _round_up(-(-bp // 2), 8))
    return tb


def netd_forward(gemm_layers, x):
    N = x.shape[0]
    x_flat = x.reshape(N, -1).astype(jnp.bfloat16)   # NCHW flatten; e1 GEMM expects CHW order
    K0 = x_flat.shape[1]

    TB = _pick_batch_tile(N)
    B = _round_up(N, TB)
    x_p = x_flat if B == N else jnp.pad(x_flat, ((0, B - N), (0, 0)))

    dec_w = gemm_layers[5][0].shape[1]               # 1024

    in_specs = [pl.BlockSpec((TB, K0), lambda i: (i, 0))]
    args = [x_p]
    for W, b in gemm_layers:
        in_specs.append(pl.BlockSpec(W.shape, lambda i: (0, 0)))
        in_specs.append(pl.BlockSpec(b.shape, lambda i: (0, 0)))
        args += [W, b]

    flops_per_row = 2 * sum(int(W.shape[0]) * int(W.shape[1]) for W, _ in gemm_layers)
    weight_bytes = sum(int(W.size) * 2 + int(b.size) * 4 for W, b in gemm_layers)
    cost = pl.CostEstimate(
        flops=flops_per_row * B,
        transcendentals=B * dec_w,                                    # tanh on f_dec
        bytes_accessed=B * K0 * 2 + B * ENC_PAD * 4 + B * dec_w * 2 + weight_bytes)

    f_enc, f_dec = pl.pallas_call(
        _netd_kernel,
        out_shape=(jax.ShapeDtypeStruct((B, ENC_PAD), jnp.float32),
                   jax.ShapeDtypeStruct((B, dec_w), jnp.bfloat16)),   # bf16 writeback
        grid=(B // TB,),
        in_specs=in_specs,
        out_specs=(pl.BlockSpec((TB, ENC_PAD), lambda i: (i, 0)),
                   pl.BlockSpec((TB, dec_w), lambda i: (i, 0))),
        compiler_params=pltpu.CompilerParams(dimension_semantics=("parallel",)),
        cost_estimate=cost,
    )(*args)
    return f_enc[:N, :LATENT], f_dec[:N]


# ----------------------------------------------------------------------------
# Synthetic params + pure-JAX f32 reference (PyTorch semantics) for a self-check.
# ----------------------------------------------------------------------------
def init_params(key):
    ks = jax.random.split(key, 12)
    w = lambda k, s: 0.1 * jax.random.normal(k, s, jnp.float32)
    b = lambda k, n: 0.05 * jax.random.normal(k, (n,), jnp.float32)
    return {
        "e1_w": w(ks[0], (NDF, NC, 4, 4)),        "e1_b": b(ks[6], NDF),
        "e2_w": w(ks[1], (2 * NDF, NDF, 4, 4)),   "e2_b": b(ks[7], 2 * NDF),
        "e3_w": w(ks[2], (LATENT, 2 * NDF, 4, 4)),"e3_b": b(ks[8], LATENT),
        "d1_w": w(ks[3], (LATENT, 2 * NDF, 4, 4)),"d1_b": b(ks[9], 2 * NDF),
        "d2_w": w(ks[4], (2 * NDF, NDF, 4, 4)),   "d2_b": b(ks[10], NDF),
        "d3_w": w(ks[5], (NDF, NC, 4, 4)),        "d3_b": b(ks[11], NC),
    }


def _ref_conv(x, w, b, stride, pad):
    out = jax.lax.conv_general_dilated(
        x, w, window_strides=(stride, stride), padding=[(pad, pad), (pad, pad)],
        dimension_numbers=("NCHW", "OIHW", "NCHW"),
        precision=jax.lax.Precision.HIGHEST)
    return out + b[None, :, None, None]


def _ref_convT(x, w, b, stride, pad):
    kh, kw = w.shape[2], w.shape[3]
    w_conv = jnp.flip(w, (2, 3)).transpose(1, 0, 2, 3)   # [Cout, Cin, kh, kw]
    out = jax.lax.conv_general_dilated(
        x, w_conv, window_strides=(1, 1),
        padding=[(kh - 1 - pad, kh - 1 - pad), (kw - 1 - pad, kw - 1 - pad)],
        lhs_dilation=(stride, stride),
        dimension_numbers=("NCHW", "OIHW", "NCHW"),
        precision=jax.lax.Precision.HIGHEST)
    return out + b[None, :, None, None]


def ref_netd_forward(p, x):
    lrelu = lambda t: jnp.where(t > 0, t, 0.2 * t)
    h = lrelu(_ref_conv(x, p["e1_w"], p["e1_b"], 2, 1))
    h = lrelu(_ref_conv(h, p["e2_w"], p["e2_b"], 2, 1))
    f_enc = _ref_conv(h, p["e3_w"], p["e3_b"], 1, 0)
    g = jax.nn.relu(_ref_convT(f_enc, p["d1_w"], p["d1_b"], 1, 0))
    g = jax.nn.relu(_ref_convT(g, p["d2_w"], p["d2_b"], 2, 1))
    f_dec = jnp.tanh(_ref_convT(g, p["d3_w"], p["d3_b"], 2, 1))
    N = x.shape[0]
    return f_enc.reshape(N, -1), f_dec.reshape(N, -1)


if __name__ == "__main__":
    x = jax.random.normal(jax.random.PRNGKey(0), (2, NC, IMG, IMG), jnp.float32)
    params = init_params(jax.random.PRNGKey(1))
    gemm_layers = prepare_gemm_params(params)

    fwd = jax.jit(lambda inp: netd_forward(gemm_layers, inp))
    f_enc_X, f_dec_X = fwd(x)
    jax.block_until_ready((f_enc_X, f_dec_X))

    assert f_enc_X.shape == (2, LATENT), f_enc_X.shape
    assert f_dec_X.shape == (2, NC * IMG * IMG), f_dec_X.shape
    assert jnp.all(jnp.isfinite(f_enc_X)) and jnp.all(jnp.isfinite(f_dec_X))

    # numerical self-check against a pure-JAX f32 reference (bf16 MXU / bf16 f_dec tolerance)
    ref_enc, ref_dec = ref_netd_forward(params, x)
    np.testing.assert_allclose(np.asarray(f_enc_X, dtype=np.float32),
                               np.asarray(ref_enc), rtol=0.15, atol=0.02)
    np.testing.assert_allclose(np.asarray(f_dec_X.astype(jnp.float32)),
                               np.asarray(ref_dec), rtol=0.15, atol=0.02)

    print("KERNEL_OK")
</pallas_src>

<mosaic_0001>
module attributes {stable_mosaic.version = 11 : i64} {
  func.func @_netd_kernel(%arg0: i32, %arg1: memref<8x1024xbf16, #tpu.memory_space<vmem>>, %arg2: memref<1024x512xbf16, #tpu.memory_space<vmem>>, %arg3: memref<1x512xf32, #tpu.memory_space<vmem>>, %arg4: memref<512x256xbf16, #tpu.memory_space<vmem>>, %arg5: memref<1x256xf32, #tpu.memory_space<vmem>>, %arg6: memref<256x128xbf16, #tpu.memory_space<vmem>>, %arg7: memref<1x128xf32, #tpu.memory_space<vmem>>, %arg8: memref<256x256xbf16, #tpu.memory_space<vmem>>, %arg9: memref<1x256xf32, #tpu.memory_space<vmem>>, %arg10: memref<256x512xbf16, #tpu.memory_space<vmem>>, %arg11: memref<1x512xf32, #tpu.memory_space<vmem>>, %arg12: memref<512x1024xbf16, #tpu.memory_space<vmem>>, %arg13: memref<1x1024xf32, #tpu.memory_space<vmem>>, %arg14: memref<8x128xf32, #tpu.memory_space<vmem>>, %arg15: memref<8x1024xbf16, #tpu.memory_space<vmem>>) attributes {dimension_semantics = [#tpu.dimension_semantics<parallel>], iteration_bounds = array<i64: 1>, scalar_prefetch = 0 : i64, scratch_operands = 0 : i64, tpu.core_type = #tpu.core_type<tc>, window_params = [{transform_indices = @transform_0, window_bounds = array<i64: 8, 1024>}, {pipeline_mode = #tpu.pipeline_mode<synchronous>, transform_indices = @transform_1, window_bounds = array<i64: 1024, 512>}, {pipeline_mode = #tpu.pipeline_mode<synchronous>, transform_indices = @transform_2, window_bounds = array<i64: 1, 512>}, {pipeline_mode = #tpu.pipeline_mode<synchronous>, transform_indices = @transform_3, window_bounds = array<i64: 512, 256>}, {pipeline_mode = #tpu.pipeline_mode<synchronous>, transform_indices = @transform_4, window_bounds = array<i64: 1, 256>}, {pipeline_mode = #tpu.pipeline_mode<synchronous>, transform_indices = @transform_5, window_bounds = array<i64: 256, 128>}, {pipeline_mode = #tpu.pipeline_mode<synchronous>, transform_indices = @transform_6, window_bounds = array<i64: 1, 128>}, {pipeline_mode = #tpu.pipeline_mode<synchronous>, transform_indices = @transform_7, window_bounds = array<i64: 256, 256>}, {pipeline_mode = #tpu.pipeline_mode<synchronous>, transform_indices = @transform_8, window_bounds = array<i64: 1, 256>}, {pipeline_mode = #tpu.pipeline_mode<synchronous>, transform_indices = @transform_9, window_bounds = array<i64: 256, 512>}, {pipeline_mode = #tpu.pipeline_mode<synchronous>, transform_indices = @transform_10, window_bounds = array<i64: 1, 512>}, {pipeline_mode = #tpu.pipeline_mode<synchronous>, transform_indices = @transform_11, window_bounds = array<i64: 512, 1024>}, {pipeline_mode = #tpu.pipeline_mode<synchronous>, transform_indices = @transform_12, window_bounds = array<i64: 1, 1024>}, {transform_indices = @transform_13, window_bounds = array<i64: 8, 128>}, {transform_indices = @transform_14, window_bounds = array<i64: 8, 1024>}]} {
    %c0 = arith.constant 0 : index
    %c0_0 = arith.constant 0 : index
    %0 = vector.load %arg1[%c0, %c0_0] : memref<8x1024xbf16, #tpu.memory_space<vmem>>, vector<8x1024xbf16>
    %c0_1 = arith.constant 0 : index
    %c0_2 = arith.constant 0 : index
    %1 = vector.load %arg2[%c0_1, %c0_2] : memref<1024x512xbf16, #tpu.memory_space<vmem>>, vector<1024x512xbf16>
    %cst = arith.constant dense<0.000000e+00> : vector<8x512xf32>
    %2 = tpu.matmul %0, %1, %cst {dimension_numbers = #tpu.dot_dimension_numbers<[1], [0], [0], [1], [0, 0, 1, 1], [], []>} : vector<8x1024xbf16>, vector<1024x512xbf16>, vector<8x512xf32> -> vector<8x512xf32>
    %c0_3 = arith.constant 0 : index
    %c0_4 = arith.constant 0 : index
    %3 = vector.load %arg3[%c0_3, %c0_4] : memref<1x512xf32, #tpu.memory_space<vmem>>, vector<1x512xf32>
    %4 = vector.broadcast %3 : vector<1x512xf32> to vector<8x512xf32>
    %5 = arith.addf %2, %4 : vector<8x512xf32>
    %cst_5 = arith.constant 0.000000e+00 : f32
    %6 = vector.broadcast %cst_5 : f32 to vector<8x512xf32>
    %7 = arith.cmpf ogt, %5, %6 : vector<8x512xf32>
    %cst_6 = arith.constant 2.000000e-01 : f32
    %8 = vector.broadcast %cst_6 : f32 to vector<8x512xf32>
    %9 = arith.mulf %8, %5 : vector<8x512xf32>
    %10 = arith.select %7, %5, %9 : vector<8x512xi1>, vector<8x512xf32>
    %11 = arith.truncf %10 : vector<8x512xf32> to vector<8x512xbf16>
    %c0_7 = arith.constant 0 : index
    %c0_8 = arith.constant 0 : index
    %12 = vector.load %arg4[%c0_7, %c0_8] : memref<512x256xbf16, #tpu.memory_space<vmem>>, vector<512x256xbf16>
    %cst_9 = arith.constant dense<0.000000e+00> : vector<8x256xf32>
    %13 = tpu.matmul %11, %12, %cst_9 {dimension_numbers = #tpu.dot_dimension_numbers<[1], [0], [0], [1], [0, 0, 1, 1], [], []>} : vector<8x512xbf16>, vector<512x256xbf16>, vector<8x256xf32> -> vector<8x256xf32>
    %c0_10 = arith.constant 0 : index
    %c0_11 = arith.constant 0 : index
    %14 = vector.load %arg5[%c0_10, %c0_11] : memref<1x256xf32, #tpu.memory_space<vmem>>, vector<1x256xf32>
    %15 = vector.broadcast %14 : vector<1x256xf32> to vector<8x256xf32>
    %16 = arith.addf %13, %15 : vector<8x256xf32>
    %cst_12 = arith.constant 0.000000e+00 : f32
    %17 = vector.broadcast %cst_12 : f32 to vector<8x256xf32>
    %18 = arith.cmpf ogt, %16, %17 : vector<8x256xf32>
    %cst_13 = arith.constant 2.000000e-01 : f32
    %19 = vector.broadcast %cst_13 : f32 to vector<8x256xf32>
    %20 = arith.mulf %19, %16 : vector<8x256xf32>
    %21 = arith.select %18, %16, %20 : vector<8x256xi1>, vector<8x256xf32>
    %22 = arith.truncf %21 : vector<8x256xf32> to vector<8x256xbf16>
    %c0_14 = arith.constant 0 : index
    %c0_15 = arith.constant 0 : index
    %23 = vector.load %arg6[%c0_14, %c0_15] : memref<256x128xbf16, #tpu.memory_space<vmem>>, vector<256x128xbf16>
    %cst_16 = arith.constant dense<0.000000e+00> : vector<8x128xf32>
    %24 = tpu.matmul %22, %23, %cst_16 {dimension_numbers = #tpu.dot_dimension_numbers<[1], [0], [0], [1], [0, 0, 1, 1], [], []>} : vector<8x256xbf16>, vector<256x128xbf16>, vector<8x128xf32> -> vector<8x128xf32>
    %c0_17 = arith.constant 0 : index
    %c0_18 = arith.constant 0 : index
    %25 = vector.load %arg7[%c0_17, %c0_18] : memref<1x128xf32, #tpu.memory_space<vmem>>, vector<1x128xf32>
    %26 = vector.broadcast %25 : vector<1x128xf32> to vector<8x128xf32>
    %27 = arith.addf %24, %26 : vector<8x128xf32>
    %c0_19 = arith.constant 0 : index
    %c0_20 = arith.constant 0 : index
    %28 = vector.load %arg14[%c0_19, %c0_20] : memref<8x128xf32, #tpu.memory_space<vmem>>, vector<8x128xf32>
    tpu.vector_store %arg14[%c0_19, %c0_20], %27 {strides = array<i32>} : memref<8x128xf32, #tpu.memory_space<vmem>>, vector<8x128xf32>,
    %c0_21 = arith.constant 0 : index
    %c0_22 = arith.constant 0 : index
    %29 = vector.load %arg8[%c0_21, %c0_22] : memref<256x256xbf16, #tpu.memory_space<vmem>>, vector<256x256xbf16>
    %cst_23 = arith.constant dense<0.000000e+00> : vector<8x256xf32>
    %30 = tpu.matmul %22, %29, %cst_23 {dimension_numbers = #tpu.dot_dimension_numbers<[1], [0], [0], [1], [0, 0, 1, 1], [], []>} : vector<8x256xbf16>, vector<256x256xbf16>, vector<8x256xf32> -> vector<8x256xf32>
    %c0_24 = arith.constant 0 : index
    %c0_25 = arith.constant 0 : index
    %31 = vector.load %arg9[%c0_24, %c0_25] : memref<1x256xf32, #tpu.memory_space<vmem>>, vector<1x256xf32>
    %32 = vector.broadcast %31 : vector<1x256xf32> to vector<8x256xf32>
    %33 = arith.addf %30, %32 : vector<8x256xf32>
    %cst_26 = arith.constant 0.000000e+00 : f32
    %34 = vector.broadcast %cst_26 : f32 to vector<8x256xf32>
    %35 = arith.maximumf %33, %34 : vector<8x256xf32>
    %36 = arith.truncf %35 : vector<8x256xf32> to vector<8x256xbf16>
    %c0_27 = arith.constant 0 : index
    %c0_28 = arith.constant 0 : index
    %37 = vector.load %arg10[%c0_27, %c0_28] : memref<256x512xbf16, #tpu.memory_space<vmem>>, vector<256x512xbf16>
    %cst_29 = arith.constant dense<0.000000e+00> : vector<8x512xf32>
    %38 = tpu.matmul %36, %37, %cst_29 {dimension_numbers = #tpu.dot_dimension_numbers<[1], [0], [0], [1], [0, 0, 1, 1], [], []>} : vector<8x256xbf16>, vector<256x512xbf16>, vector<8x512xf32> -> vector<8x512xf32>
    %c0_30 = arith.constant 0 : index
    %c0_31 = arith.constant 0 : index
    %39 = vector.load %arg11[%c0_30, %c0_31] : memref<1x512xf32, #tpu.memory_space<vmem>>, vector<1x512xf32>
    %40 = vector.broadcast %39 : vector<1x512xf32> to vector<8x512xf32>
    %41 = arith.addf %38, %40 : vector<8x512xf32>
    %cst_32 = arith.constant 0.000000e+00 : f32
    %42 = vector.broadcast %cst_32 : f32 to vector<8x512xf32>
    %43 = arith.maximumf %41, %42 : vector<8x512xf32>
    %44 = arith.truncf %43 : vector<8x512xf32> to vector<8x512xbf16>
    %c0_33 = arith.constant 0 : index
    %c0_34 = arith.constant 0 : index
    %45 = vector.load %arg12[%c0_33, %c0_34] : memref<512x1024xbf16, #tpu.memory_space<vmem>>, vector<512x1024xbf16>
    %cst_35 = arith.constant dense<0.000000e+00> : vector<8x1024xf32>
    %46 = tpu.matmul %44, %45, %cst_35 {dimension_numbers = #tpu.dot_dimension_numbers<[1], [0], [0], [1], [0, 0, 1, 1], [], []>} : vector<8x512xbf16>, vector<512x1024xbf16>, vector<8x1024xf32> -> vector<8x1024xf32>
    %c0_36 = arith.constant 0 : index
    %c0_37 = arith.constant 0 : index
    %47 = vector.load %arg13[%c0_36, %c0_37] : memref<1x1024xf32, #tpu.memory_space<vmem>>, vector<1x1024xf32>
    %48 = vector.broadcast %47 : vector<1x1024xf32> to vector<8x1024xf32>
    %49 = arith.addf %46, %48 : vector<8x1024xf32>
    %50 = math.tanh %49 : vector<8x1024xf32>
    %51 = arith.truncf %50 : vector<8x1024xf32> to vector<8x1024xbf16>
    %c0_38 = arith.constant 0 : index
    %c0_39 = arith.constant 0 : index
    %52 = vector.load %arg15[%c0_38, %c0_39] : memref<8x1024xbf16, #tpu.memory_space<vmem>>, vector<8x1024xbf16>
    tpu.vector_store %arg15[%c0_38, %c0_39], %51 {strides = array<i32>} : memref<8x1024xbf16, #tpu.memory_space<vmem>>, vector<8x1024xbf16>,
    return
  }
  func.func @transform_0(%arg0: i32) -> (i32, i32) {
    %c0_i32 = arith.constant 0 : i32
    %c0_i32_0 = arith.constant 0 : i32
    return %arg0, %c0_i32 : i32, i32
  }
  func.func @transform_1(%arg0: i32) -> (i32, i32) {
    %c0_i32 = arith.constant 0 : i32
    %c0_i32_0 = arith.constant 0 : i32
    %c0_i32_1 = arith.constant 0 : i32
    return %c0_i32, %c0_i32_0 : i32, i32
  }
  func.func @transform_2(%arg0: i32) -> (i32, i32) {
    %c0_i32 = arith.constant 0 : i32
    %c0_i32_0 = arith.constant 0 : i32
    %c0_i32_1 = arith.constant 0 : i32
    return %c0_i32, %c0_i32_0 : i32, i32
  }
  func.func @transform_3(%arg0: i32) -> (i32, i32) {
    %c0_i32 = arith.constant 0 : i32
    %c0_i32_0 = arith.constant 0 : i32
    %c0_i32_1 = arith.constant 0 : i32
    return %c0_i32, %c0_i32_0 : i32, i32
  }
  func.func @transform_4(%arg0: i32) -> (i32, i32) {
    %c0_i32 = arith.constant 0 : i32
    %c0_i32_0 = arith.constant 0 : i32
    %c0_i32_1 = arith.constant 0 : i32
    return %c0_i32, %c0_i32_0 : i32, i32
  }
  func.func @transform_5(%arg0: i32) -> (i32, i32) {
    %c0_i32 = arith.constant 0 : i32
    %c0_i32_0 = arith.constant 0 : i32
    %c0_i32_1 = arith.constant 0 : i32
    return %c0_i32, %c0_i32_0 : i32, i32
  }
  func.func @transform_6(%arg0: i32) -> (i32, i32) {
    %c0_i32 = arith.constant 0 : i32
    %c0_i32_0 = arith.constant 0 : i32
    %c0_i32_1 = arith.constant 0 : i32
    return %c0_i32, %c0_i32_0 : i32, i32
  }
  func.func @transform_7(%arg0: i32) -> (i32, i32) {
    %c0_i32 = arith.constant 0 : i32
    %c0_i32_0 = arith.constant 0 : i32
    %c0_i32_1 = arith.constant 0 : i32
    return %c0_i32, %c0_i32_0 : i32, i32
  }
  func.func @transform_8(%arg0: i32) -> (i32, i32) {
    %c0_i32 = arith.constant 0 : i32
    %c0_i32_0 = arith.constant 0 : i32
    %c0_i32_1 = arith.constant 0 : i32
    return %c0_i32, %c0_i32_0 : i32, i32
  }
  func.func @transform_9(%arg0: i32) -> (i32, i32) {
    %c0_i32 = arith.constant 0 : i32
    %c0_i32_0 = arith.constant 0 : i32
    %c0_i32_1 = arith.constant 0 : i32
    return %c0_i32, %c0_i32_0 : i32, i32
  }
  func.func @transform_10(%arg0: i32) -> (i32, i32) {
    %c0_i32 = arith.constant 0 : i32
    %c0_i32_0 = arith.constant 0 : i32
    %c0_i32_1 = arith.constant 0 : i32
    return %c0_i32, %c0_i32_0 : i32, i32
  }
  func.func @transform_11(%arg0: i32) -> (i32, i32) {
    %c0_i32 = arith.constant 0 : i32
    %c0_i32_0 = arith.constant 0 : i32
    %c0_i32_1 = arith.constant 0 : i32
    return %c0_i32, %c0_i32_0 : i32, i32
  }
  func.func @transform_12(%arg0: i32) -> (i32, i32) {
    %c0_i32 = arith.constant 0 : i32
    %c0_i32_0 = arith.constant 0 : i32
    %c0_i32_1 = arith.constant 0 : i32
    return %c0_i32, %c0_i32_0 : i32, i32
  }
  func.func @transform_13(%arg0: i32) -> (i32, i32) {
    %c0_i32 = arith.constant 0 : i32
    %c0_i32_0 = arith.constant 0 : i32
    return %arg0, %c0_i32 : i32, i32
  }
  func.func @transform_14(%arg0: i32) -> (i32, i32) {
    %c0_i32 = arith.constant 0 : i32
    %c0_i32_0 = arith.constant 0 : i32
    return %arg0, %c0_i32 : i32, i32
  }
}

</mosaic_0001>

<bundles_post_ra>
// kernel: _lambda_.1
= control target key start
LH: loop header
LB: loop body
LE: loop exit
PB: predicated region body
PF: predicated region fallthrough
CT: control target
= control target key end

     0   :  { %20 = vsyncpa [#allocation3], 0  ;;  %s9686_s0 = inlined_call_operand.vmem [shape: bf16[8,1024], index: 0, kind: input, shape index: {}]   ;;  %s9687_s1 = inlined_call_operand.hbm [shape: bf16[1024,512], index: 1, kind: input, shape index: {}]   ;;  %s9688_s2 = inlined_call_operand.vmem [shape: f32[1,512], index: 2, kind: input, shape index: {}]   ;;  %s9689_s3 = inlined_call_operand.hbm [shape: bf16[512,256], index: 3, kind: input, shape index: {}]   ;;  %s9690_s4 = inlined_call_operand.vmem [shape: f32[1,256], index: 4, kind: input, shape index: {}]   ;;  %s9691_s5 = inlined_call_operand.hbm [shape: bf16[256,128], index: 5, kind: input, shape index: {}]   ;;  %s9692_s6 = inlined_call_operand.vmem [shape: f32[1,128], index: 6, kind: input, shape index: {}]   ;;  %s9693_s7 = inlined_call_operand.vmem [shape: bf16[256,256], index: 7, kind: input, shape index: {}]   ;;  %s9694_s8 = inlined_call_operand.vmem [shape: f32[1,256], index: 8, kind: input, shape index: {}]   ;;  %s9695_s9 = inlined_call_operand.hbm [shape: bf16[256,512], index: 9, kind: input, shape index: {}]   ;;  %s9696_s10 = inlined_call_operand.vmem [shape: f32[1,512], index: 10, kind: input, shape index: {}]   ;;  %s9697_s11 = inlined_call_operand.hbm [shape: bf16[512,1024], index: 11, kind: input, shape index: {}]   ;;  %s9698_s12 = inlined_call_operand.vmem [shape: f32[1,1024], index: 12, kind: input, shape index: {}]   ;;  %s9699_s13 = inlined_call_operand.vmem [shape: f32[8,128], index: 13, kind: output, shape index: {0}]   ;;  %s9700_s14 = inlined_call_operand.vmem [shape: bf16[8,1024], index: 14, kind: output, shape index: {1}]  }
   0x1   :  { %21 = vsyncpa [#allocation5], 0  ;;  %s44_s15 = sshll.u32 %s9689_s3, 4  ;;  %s45_s15 = int_to_ptr.hbm [resolvable:$true] %s44_s15 }
   0x2   :  { %22 = vsyncpa [#allocation8], 0  ;;  %s9149_s16 = smov [#allocation4]   ;;  %s9150_s18 = smov 128  }
   0x3   :  { %s46_s17 = sshll.u32 %s9149_s16, 4  ;;  %s9151_s19 = smov 8   ;;  %s47_s17 = int_to_ptr.vmem [resolvable:$true] %s46_s17 }
   0x4   :  { %52 = dma.hbm_to_vmem [thread:$0]  %s45_s15, 8192, %s47_s17, [#allocation5], %s9150_s18, %s9150_s18, %s9151_s19  }
   0x5   :  { %s78_s22 = sshll.u32 %s9695_s9, 4  ;;  %s9152_s23 = smov [#allocation7]   ;;  %s79_s22 = int_to_ptr.hbm [resolvable:$true] %s78_s22 }
   0x6   :  { %s80_s24 = sshll.u32 %s9152_s23, 4  ;;  %s29_s27 = sshll.u32 %s9687_s1, 4  ;;  %s81_s24 = int_to_ptr.vmem [resolvable:$true] %s80_s24  ;;  %s30_s27 = int_to_ptr.hbm [resolvable:$true] %s29_s27 }
   0x7   :  { %s9153_s3 = smov 256   ;;  %s9154_s28 = smov 16  }
   0x8   :  { %86 = dma.hbm_to_vmem [thread:$0]  %s79_s22, 8192, %s81_s24, [#allocation8], %s9153_s3, %s9153_s3, %s9154_s28  }
   0x9   :  { %s59_s15 = sshll.u32 %s9691_s5, 4  ;;  %s9155_s16 = smov [#allocation2]   ;;  %s60_s15 = int_to_ptr.hbm [resolvable:$true] %s59_s15 }
   0xa   :  { %s31_s17 = sshll.u32 %s9155_s16, 4  ;;  %s9156_s9 = smov [#allocation6]   ;;  %s32_s17 = int_to_ptr.vmem [resolvable:$true] %s31_s17 }
   0xb   :  { %37 = dma.hbm_to_vmem [thread:$0]  %s30_s27, 32768, %s32_s17, [#allocation3], %s9153_s3, %s9153_s3, %s9154_s28  }
   0xc   :  { %s61_s18 = sshll.u32 %s9156_s9, 4  ;;  %s9157_s19 = smov 64   ;;  %s62_s18 = int_to_ptr.vmem [resolvable:$true] %s61_s18 }
   0xd   :  { %s9158_s20 = smov 4   ;;  %s93_s23 = sshll.u32 %s9697_s11, 4  ;;  %s94_s23 = int_to_ptr.hbm [resolvable:$true] %s93_s23 }
   0xe   :  { %67 = dma.hbm_to_vmem [thread:$0]  %s60_s15, 2048, %s62_s18, [#allocation5], %s9157_s19, %s9157_s19, %s9158_s20  }
   0xf   :  { %s9159_s22 = smov [#allocation9]   ;;  %s9160_s5 = smov 512  }
  0x10   :  { %s95_s24 = sshll.u32 %s9159_s22, 4  ;;  %s9161_s25 = smov 32   ;;  %s96_s24 = int_to_ptr.vmem [resolvable:$true] %s95_s24 }
  0x11   :  { %101 = dma.hbm_to_vmem [thread:$0]  %s94_s23, 32768, %s96_s24, [#allocation8], %s9160_s5, %s9160_s5, %s9161_s25  }
  0x12   :  { %9143 = dma.done.wait [#allocation3], 32768  }
  0x13   :  { %9144 = vsyncadd [#allocation3], 4294934528 }
  0x14   :  { %9145 = dma.done.wait [#allocation5], 10240  }
  0x15   :  { %9146 = vsyncadd [#allocation5], 4294957056 }
  0x16   :  { %9147 = dma.done.wait [#allocation8], 40960  }
  0x17   :  { %9148 = vsyncadd [#allocation8], 4294926336  ;;  %v5666_v0 = vld [vmem:[#allocation2 + $0xe0] sm:$0xf]  ;;  %v8334_v1 = vld [vmem:[#allocation2 + $0xec] sm:$0xf0] }
  0x18   :  { %v5794_v2 = vld [vmem:[#allocation2 + $0x1e0] sm:$0xf]  ;;  %v5667_v3 = vor.u32 %v8334_v1, %v5666_v0  ;;  %v8366_v4 = vld [vmem:[#allocation2 + $0x1ec] sm:$0xf0] }
  0x19   :  { %v5922_v5 = vld [vmem:[#allocation2 + $0x2e0] sm:$0xf]  ;;  %v8398_v6 = vld [vmem:[#allocation2 + $0x2ec] sm:$0xf0]  ;;  %v5795_v7 = vor.u32 %v8366_v4, %v5794_v2 }
  0x1a   :  { %v5923_v8 = vor.u32 %v8398_v6, %v5922_v5  ;;  %v6050_v9 = vld [vmem:[#allocation2 + $0x3e0] sm:$0xf]  ;;  %v8430_v10 = vld [vmem:[#allocation2 + $0x3ec] sm:$0xf0]  ;;  %1702 = vmatpush.bf16.msra.mxu0 %v5667_v3 }
  0x1b   :  { %v5650_v11 = vld [vmem:[#allocation2 + $0xc0] sm:$0xf]  ;;  %v6051_v12 = vor.u32 %v8430_v10, %v6050_v9  ;;  %v8330_v13 = vld [vmem:[#allocation2 + $0xcc] sm:$0xf0]  ;;  %1715 = vmatpush.bf16.msra.mxu1 %v5795_v7 }
  0x1c   :  { %v5778_v14 = vld [vmem:[#allocation2 + $0x1c0] sm:$0xf]  ;;  %v8362_v15 = vld [vmem:[#allocation2 + $0x1cc] sm:$0xf0]  ;;  %1728 = vmatpush.bf16.msra.mxu2 %v5923_v8  ;;  %v5651_v16 = vor.u32 %v8330_v13, %v5650_v11 }
  0x1d   :  { %v5779_v17 = vor.u32 %v8362_v15, %v5778_v14  ;;  %v5906_v18 = vld [vmem:[#allocation2 + $0x2c0] sm:$0xf]  ;;  %v8394_v19 = vld [vmem:[#allocation2 + $0x2cc] sm:$0xf0]  ;;  %1741 = vmatpush.bf16.msra.mxu3 %v6051_v12 }
  0x1e   :  { %v6034_v20 = vld [vmem:[#allocation2 + $0x3c0] sm:$0xf]  ;;  %v5907_v21 = vor.u32 %v8394_v19, %v5906_v18  ;;  %v8426_v22 = vld [vmem:[#allocation2 + $0x3cc] sm:$0xf0]  ;;  %1703 = vmatpush.bf16.msra.mxu0 %v5651_v16 }
  0x1f   :  { %v5634_v23 = vld [vmem:[#allocation2 + $0xa0] sm:$0xf]  ;;  %v8326_v24 = vld [vmem:[#allocation2 + $0xac] sm:$0xf0]  ;;  %v6035_v25 = vor.u32 %v8426_v22, %v6034_v20  ;;  %1716 = vmatpush.bf16.msra.mxu1 %v5779_v17 }
  0x20   :  { %v5762_v26 = vld [vmem:[#allocation2 + $0x1a0] sm:$0xf]  ;;  %v8358_v27 = vld [vmem:[#allocation2 + $0x1ac] sm:$0xf0]  ;;  %v5635_v29 = vor.u32 %v8326_v24, %v5634_v23  ;;  %1729 = vmatpush.bf16.msra.mxu2 %v5907_v21 }
  0x21   :  { %v5890_v28 = vld [vmem:[#allocation2 + $0x2a0] sm:$0xf]  ;;  %v8390_v30 = vld [vmem:[#allocation2 + $0x2ac] sm:$0xf0]  ;;  %v5763_v33 = vor.u32 %v8358_v27, %v5762_v26  ;;  %1742 = vmatpush.bf16.msra.mxu3 %v6035_v25 }
  0x22   :  { %v6018_v31 = vld [vmem:[#allocation2 + $0x3a0] sm:$0xf]  ;;  %v8422_v32 = vld [vmem:[#allocation2 + $0x3ac] sm:$0xf0]  ;;  %v5891_v34 = vor.u32 %v8390_v30, %v5890_v28  ;;  %1704 = vmatpush.bf16.msra.mxu0 %v5635_v29 }
  0x23   :  { %v5618_v35 = vld [vmem:[#allocation2 + $0x80] sm:$0xf]  ;;  %v8322_v36 = vld [vmem:[#allocation2 + $0x8c] sm:$0xf0]  ;;  %v6019_v38 = vor.u32 %v8422_v32, %v6018_v31  ;;  %1717 = vmatpush.bf16.msra.mxu1 %v5763_v33 }
  0x24   :  { %v5746_v37 = vld [vmem:[#allocation2 + $0x180] sm:$0xf]  ;;  %v8354_v39 = vld [vmem:[#allocation2 + $0x18c] sm:$0xf0]  ;;  %v5619_v44 = vor.u32 %v8322_v36, %v5618_v35  ;;  %1730 = vmatpush.bf16.msra.mxu2 %v5891_v34 }
  0x25   :  { %v5874_v40 = vld [vmem:[#allocation2 + $0x280] sm:$0xf]  ;;  %v8386_v41 = vld [vmem:[#allocation2 + $0x28c] sm:$0xf0]  ;;  %v5747_v45 = vor.u32 %v8354_v39, %v5746_v37  ;;  %1743 = vmatpush.bf16.msra.mxu3 %v6019_v38 }
  0x26   :  { %v6002_v42 = vld [vmem:[#allocation2 + $0x380] sm:$0xf]  ;;  %v8418_v43 = vld [vmem:[#allocation2 + $0x38c] sm:$0xf0]  ;;  %v5875_v46 = vor.u32 %v8386_v41, %v5874_v40  ;;  %1705 = vmatpush.bf16.msra.mxu0 %v5619_v44 }
  0x27   :  { %v5602_v47 = vld [vmem:[#allocation2 + $0x60] sm:$0xf]  ;;  %v8318_v48 = vld [vmem:[#allocation2 + $0x6c] sm:$0xf0]  ;;  %v6003_v50 = vor.u32 %v8418_v43, %v6002_v42  ;;  %1718 = vmatpush.bf16.msra.mxu1 %v5747_v45 }
  0x28   :  { %v5730_v49 = vld [vmem:[#allocation2 + $0x160] sm:$0xf]  ;;  %v8350_v51 = vld [vmem:[#allocation2 + $0x16c] sm:$0xf0]  ;;  %v5603_v56 = vor.u32 %v8318_v48, %v5602_v47  ;;  %1731 = vmatpush.bf16.msra.mxu2 %v5875_v46 }
  0x29   :  { %v5858_v52 = vld [vmem:[#allocation2 + $0x260] sm:$0xf]  ;;  %v8382_v53 = vld [vmem:[#allocation2 + $0x26c] sm:$0xf0]  ;;  %v5731_v57 = vor.u32 %v8350_v51, %v5730_v49  ;;  %1744 = vmatpush.bf16.msra.mxu3 %v6003_v50 }
  0x2a   :  { %v5986_v54 = vld [vmem:[#allocation2 + $0x360] sm:$0xf]  ;;  %v8414_v55 = vld [vmem:[#allocation2 + $0x36c] sm:$0xf0]  ;;  %v5859_v58 = vor.u32 %v8382_v53, %v5858_v52  ;;  %1706 = vmatpush.bf16.msra.mxu0 %v5603_v56 }
  0x2b   :  { %v5586_v59 = vld [vmem:[#allocation2 + $0x40] sm:$0xf]  ;;  %v8314_v60 = vld [vmem:[#allocation2 + $0x4c] sm:$0xf0]  ;;  %v5987_v62 = vor.u32 %v8414_v55, %v5986_v54  ;;  %1719 = vmatpush.bf16.msra.mxu1 %v5731_v57 }
  0x2c   :  { %v5714_v61 = vld [vmem:[#allocation2 + $0x140] sm:$0xf]  ;;  %v8346_v63 = vld [vmem:[#allocation2 + $0x14c] sm:$0xf0]  ;;  %v5587_v4 = vor.u32 %v8314_v60, %v5586_v59  ;;  %1732 = vmatpush.bf16.msra.mxu2 %v5859_v58  ;;  %v125_v58 = vld [vmem:[%s9686_s0 + $0x8] sm:$0xff] }
  0x2d   :  { %v5842_v0 = vld [vmem:[#allocation2 + $0x240] sm:$0xf]  ;;  %v8378_v1 = vld [vmem:[#allocation2 + $0x24c] sm:$0xf0]  ;;  %v5715_v5 = vor.u32 %v8346_v63, %v5714_v61  ;;  %1745 = vmatpush.bf16.msra.mxu3 %v5987_v62  ;;  %v400_v63 = vunpack.c.l.b16 %v125_v58 }
  0x2e   :  { %v5970_v2 = vld [vmem:[#allocation2 + $0x340] sm:$0xf]  ;;  %v8410_v3 = vld [vmem:[#allocation2 + $0x34c] sm:$0xf0]  ;;  %v5843_v6 = vor.u32 %v8378_v1, %v5842_v0  ;;  %1707 = vmatpush.bf16.msra.mxu0 %v5587_v4  ;;  %v401_v0 = vunpack.c.h.b16 %v125_v58 }
  0x2f   :  { %v5570_v7 = vld [vmem:[#allocation2 + $0x20] sm:$0xf]  ;;  %v8310_v8 = vld [vmem:[#allocation2 + $0x2c] sm:$0xf0]  ;;  %v5971_v10 = vor.u32 %v8410_v3, %v5970_v2  ;;  %1720 = vmatpush.bf16.msra.mxu1 %v5715_v5  ;;  %v9255_v4 = vpack.c.b16 %v400_v63, %v400_v63 }
  0x30   :  { %v5698_v9 = vld [vmem:[#allocation2 + $0x120] sm:$0xf]  ;;  %v8342_v11 = vld [vmem:[#allocation2 + $0x12c] sm:$0xf0]  ;;  %v5571_v16 = vor.u32 %v8310_v8, %v5570_v7  ;;  %1733 = vmatpush.bf16.msra.mxu2 %v5843_v6  ;;  %v9260_v6 = vpack.c.b16 %v401_v0, %v401_v0 }
  0x31   :  { %v5826_v12 = vld [vmem:[#allocation2 + $0x220] sm:$0xf]  ;;  %v8374_v13 = vld [vmem:[#allocation2 + $0x22c] sm:$0xf0]  ;;  %v5699_v19 = vor.u32 %v8342_v11, %v5698_v9  ;;  %1746 = vmatpush.bf16.msra.mxu3 %v5971_v10 }
  0x32   :  { %v5954_v14 = vld [vmem:[#allocation2 + $0x320] sm:$0xf]  ;;  %v8406_v15 = vld [vmem:[#allocation2 + $0x32c] sm:$0xf0]  ;;  %v5827_v20 = vor.u32 %v8374_v13, %v5826_v12  ;;  %1708 = vmatpush.bf16.msra.mxu0 %v5571_v16 }
  0x33   :  { %v5554_v17 = vld [vmem:[#allocation2] sm:$0xf]  ;;  %v8306_v18 = vld [vmem:[#allocation2 + $0xc] sm:$0xf0]  ;;  %v5955_v24 = vor.u32 %v8406_v15, %v5954_v14  ;;  %1721 = vmatpush.bf16.msra.mxu1 %v5699_v19 }
  0x34   :  { %v5682_v21 = vld [vmem:[#allocation2 + $0x100] sm:$0xf]  ;;  %v8338_v22 = vld [vmem:[#allocation2 + $0x10c] sm:$0xf0]  ;;  %v5555_v31 = vor.u32 %v8306_v18, %v5554_v17  ;;  %1734 = vmatpush.bf16.msra.mxu2 %v5827_v20 }
  0x35   :  { %v5810_v23 = vld [vmem:[#allocation2 + $0x200] sm:$0xf]  ;;  %v8370_v25 = vld [vmem:[#allocation2 + $0x20c] sm:$0xf0]  ;;  %v5683_v35 = vor.u32 %v8338_v22, %v5682_v21  ;;  %1747 = vmatpush.bf16.msra.mxu3 %v5955_v24 }
  0x36   :  { %v5938_v26 = vld [vmem:[#allocation2 + $0x300] sm:$0xf]  ;;  %v8402_v27 = vld [vmem:[#allocation2 + $0x30c] sm:$0xf0]  ;;  %v5811_v36 = vor.u32 %v8370_v25, %v5810_v23  ;;  %1709 = vmatpush.bf16.msra.mxu0 %v5555_v31 }
  0x37   :  { %v6178_v28 = vld [vmem:[#allocation2 + $0x4e0] sm:$0xf]  ;;  %v8462_v29 = vld [vmem:[#allocation2 + $0x4ec] sm:$0xf0]  ;;  %v5939_v39 = vor.u32 %v8402_v27, %v5938_v26  ;;  %1722 = vmatpush.bf16.msra.mxu1 %v5683_v35 }
  0x38   :  { %v6306_v30 = vld [vmem:[#allocation2 + $0x5e0] sm:$0xf]  ;;  %v8494_v32 = vld [vmem:[#allocation2 + $0x5ec] sm:$0xf0]  ;;  %v6179_v40 = vor.u32 %v8462_v29, %v6178_v28  ;;  %1735 = vmatpush.bf16.msra.mxu2 %v5811_v36 }
  0x39   :  { %v6434_v33 = vld [vmem:[#allocation2 + $0x6e0] sm:$0xf]  ;;  %v8526_v34 = vld [vmem:[#allocation2 + $0x6ec] sm:$0xf0]  ;;  %v6307_v41 = vor.u32 %v8494_v32, %v6306_v30  ;;  %1748 = vmatpush.bf16.msra.mxu3 %v5939_v39 }
  0x3a   :  { %v6562_v37 = vld [vmem:[#allocation2 + $0x7e0] sm:$0xf]  ;;  %v8558_v38 = vld [vmem:[#allocation2 + $0x7ec] sm:$0xf0]  ;;  %v6435_v42 = vor.u32 %v8526_v34, %v6434_v33  ;;  %1754 = vmatpush.bf16.msrb.mxu0 %v6179_v40 }
  0x3b   :  { %v6162_v43 = vld [vmem:[#allocation2 + $0x4c0] sm:$0xf]  ;;  %v8458_v44 = vld [vmem:[#allocation2 + $0x4cc] sm:$0xf0]  ;;  %v6563_v46 = vor.u32 %v8558_v38, %v6562_v37  ;;  %1767 = vmatpush.bf16.msrb.mxu1 %v6307_v41  ;;  %1736 = vmatmul.bf16.vlgmr.msra.gmra.mxu2 %v9255_v4 }
  0x3c   :  { %v6290_v45 = vld [vmem:[#allocation2 + $0x5c0] sm:$0xf]  ;;  %v8490_v47 = vld [vmem:[#allocation2 + $0x5cc] sm:$0xf0]  ;;  %v6163_v52 = vor.u32 %v8458_v44, %v6162_v43  ;;  %1780 = vmatpush.bf16.msrb.mxu2 %v6435_v42  ;;  %1749 = vmatmul.bf16.vlgmr.msra.gmra.mxu3 %v9260_v6 }
  0x3d   :  { %v6418_v48 = vld [vmem:[#allocation2 + $0x6c0] sm:$0xf]  ;;  %v8522_v49 = vld [vmem:[#allocation2 + $0x6cc] sm:$0xf0]  ;;  %v6291_v54 = vor.u32 %v8490_v47, %v6290_v45  ;;  %1793 = vmatpush.bf16.msrb.mxu3 %v6563_v46 }
  0x3e   :  { %v6546_v50 = vld [vmem:[#allocation2 + $0x7c0] sm:$0xf]  ;;  %v8554_v51 = vld [vmem:[#allocation2 + $0x7cc] sm:$0xf0]  ;;  %v6419_v55 = vor.u32 %v8522_v49, %v6418_v48  ;;  %1755 = vmatpush.bf16.msrb.mxu0 %v6163_v52 }
  0x3f   :  { %v6146_v53 = vld [vmem:[#allocation2 + $0x4a0] sm:$0xf]  ;;  %v8454_v56 = vld [vmem:[#allocation2 + $0x4ac] sm:$0xf0]  ;;  %v6547_v59 = vor.u32 %v8554_v51, %v6546_v50  ;;  %1768 = vmatpush.bf16.msrb.mxu1 %v6291_v54 }
  0x40   :  { %v6274_v57 = vld [vmem:[#allocation2 + $0x5a0] sm:$0xf]  ;;  %v8486_v60 = vld [vmem:[#allocation2 + $0x5ac] sm:$0xf0]  ;;  %v6147_v3 = vor.u32 %v8454_v56, %v6146_v53  ;;  %1781 = vmatpush.bf16.msrb.mxu2 %v6419_v55 }
  0x41   :  { %v6402_v61 = vld [vmem:[#allocation2 + $0x6a0] sm:$0xf]  ;;  %v8518_v62 = vld [vmem:[#allocation2 + $0x6ac] sm:$0xf0]  ;;  %v6275_v7 = vor.u32 %v8486_v60, %v6274_v57  ;;  %1794 = vmatpush.bf16.msrb.mxu3 %v6547_v59 }
  0x42   :  { %v6530_v1 = vld [vmem:[#allocation2 + $0x7a0] sm:$0xf]  ;;  %v8550_v2 = vld [vmem:[#allocation2 + $0x7ac] sm:$0xf0]  ;;  %v6403_v8 = vor.u32 %v8518_v62, %v6402_v61  ;;  %1756 = vmatpush.bf16.msrb.mxu0 %v6147_v3  ;;  %v127_v3 = vld [vmem:[%s9686_s0 + $0x18] sm:$0xff] }
  0x43   :  { %v124_v5 = vld [vmem:[%s9686_s0] sm:$0xff]  ;;  %v8450_v10 = vld [vmem:[#allocation2 + $0x48c] sm:$0xf0]  ;;  %v6531_v14 = vor.u32 %v8550_v2, %v6530_v1  ;;  %1769 = vmatpush.bf16.msrb.mxu1 %v6275_v7 }
  0x44   :  { %v6130_v9 = vld [vmem:[#allocation2 + $0x480] sm:$0xf]  ;;  %v398_v12 = vunpack.c.l.b16 %v124_v5  ;;  %v399_v13 = vunpack.c.h.b16 %v124_v5  ;;  %v8482_v15 = vld [vmem:[#allocation2 + $0x58c] sm:$0xf0]  ;;  %1782 = vmatpush.bf16.msrb.mxu2 %v6403_v8 }
  0x45   :  { %v6258_v11 = vld [vmem:[#allocation2 + $0x580] sm:$0xf]  ;;  %v8514_v17 = vld [vmem:[#allocation2 + $0x68c] sm:$0xf0]  ;;  %v6131_v22 = vor.u32 %v8450_v10, %v6130_v9  ;;  %1795 = vmatpush.bf16.msrb.mxu3 %v6531_v14  ;;  %v8332_v10 = vld [vmem:[#allocation2 + $0xe4] sm:$0xf] }
  0x46   :  { %v6386_v16 = vld [vmem:[#allocation2 + $0x680] sm:$0xf]  ;;  %v8546_v19 = vld [vmem:[#allocation2 + $0x78c] sm:$0xf0]  ;;  %v9263_v20 = vpack.c.b16 %v398_v12, %v398_v12  ;;  %v9266_v21 = vpack.c.b16 %v399_v13, %v399_v13  ;;  %v6259_v23 = vor.u32 %v8482_v15, %v6258_v11  ;;  %v5668_v11 = vld [vmem:[#allocation2 + $0xf0] sm:$0xf0] }
  0x47   :  { %v6514_v18 = vld [vmem:[#allocation2 + $0x780] sm:$0xf]  ;;  %v6387_v24 = vor.u32 %v8514_v17, %v6386_v16  ;;  %v8446_v26 = vld [vmem:[#allocation2 + $0x46c] sm:$0xf0]  ;;  %1757 = vmatpush.bf16.msrb.mxu0 %v6131_v22  ;;  %v8364_v12 = vld [vmem:[#allocation2 + $0x1e4] sm:$0xf]  ;;  %v404_v17 = vunpack.c.l.b16 %v127_v3 }
  0x48   :  { %v6114_v25 = vld [vmem:[#allocation2 + $0x460] sm:$0xf]  ;;  %v6515_v28 = vor.u32 %v8546_v19, %v6514_v18  ;;  %v8478_v29 = vld [vmem:[#allocation2 + $0x56c] sm:$0xf0]  ;;  %1710 = vmatmul.bf16.vlgmr.msra.gmra.mxu0 %v9263_v20  ;;  %1723 = vmatmul.bf16.vlgmr.msra.gmra.mxu1 %v9266_v21  ;;  %v5796_v14 = vld [vmem:[#allocation2 + $0x1f0] sm:$0xf0] }
  0x49   :  { %v6242_v27 = vld [vmem:[#allocation2 + $0x560] sm:$0xf]  ;;  %v8510_v31 = vld [vmem:[#allocation2 + $0x66c] sm:$0xf0]  ;;  %v6115_v34 = vor.u32 %v8446_v26, %v6114_v25  ;;  %1770 = vmatpush.bf16.msrb.mxu1 %v6259_v23  ;;  %1783 = vmatpush.bf16.msrb.mxu2 %v6387_v24  ;;  %v8396_v15 = vld [vmem:[#allocation2 + $0x2e4] sm:$0xf]  ;;  %v405_v25 = vunpack.c.h.b16 %v127_v3 }
  0x4a   :  { %v6370_v30 = vld [vmem:[#allocation2 + $0x660] sm:$0xf]  ;;  %v8542_v33 = vld [vmem:[#allocation2 + $0x76c] sm:$0xf0]  ;;  %v6243_v35 = vor.u32 %v8478_v29, %v6242_v27  ;;  %1796 = vmatpush.bf16.msrb.mxu3 %v6515_v28  ;;  %v5924_v16 = vld [vmem:[#allocation2 + $0x2f0] sm:$0xf0]  ;;  %v5671_v27 = vor.u32 %v8332_v10, %v5668_v11  ;;  %v5799_v29 = vor.u32 %v8364_v12, %v5796_v14 }
  0x4b   :  { %v6498_v32 = vld [vmem:[#allocation2 + $0x760] sm:$0xf]  ;;  %v6371_v36 = vor.u32 %v8510_v31, %v6370_v30  ;;  %v8442_v38 = vld [vmem:[#allocation2 + $0x44c] sm:$0xf0]  ;;  %1758 = vmatpush.bf16.msrb.mxu0 %v6115_v34  ;;  %v8428_v22 = vld [vmem:[#allocation2 + $0x3e4] sm:$0xf]  ;;  %v5927_v30 = vor.u32 %v8396_v15, %v5924_v16 }
  0x4c   :  { %v6098_v37 = vld [vmem:[#allocation2 + $0x440] sm:$0xf]  ;;  %v6499_v40 = vor.u32 %v8542_v33, %v6498_v32  ;;  %v8474_v41 = vld [vmem:[#allocation2 + $0x54c] sm:$0xf0]  ;;  %v6052_v23 = vld [vmem:[#allocation2 + $0x3f0] sm:$0xf0] }
  0x4d   :  { %v6226_v39 = vld [vmem:[#allocation2 + $0x540] sm:$0xf]  ;;  %v8506_v43 = vld [vmem:[#allocation2 + $0x64c] sm:$0xf0]  ;;  %v6099_v46 = vor.u32 %v8442_v38, %v6098_v37  ;;  %1771 = vmatpush.bf16.msrb.mxu1 %v6243_v35  ;;  %1784 = vmatpush.bf16.msrb.mxu2 %v6371_v36  ;;  %v8328_v31 = vld [vmem:[#allocation2 + $0xc4] sm:$0xf]  ;;  %v6055_v34 = vor.u32 %v8428_v22, %v6052_v23  ;;  %v9276_v38 = vpack.c.b16 %v404_v17, %v404_v17 }
  0x4e   :  { %v6354_v42 = vld [vmem:[#allocation2 + $0x640] sm:$0xf]  ;;  %v8538_v45 = vld [vmem:[#allocation2 + $0x74c] sm:$0xf0]  ;;  %v6227_v47 = vor.u32 %v8474_v41, %v6226_v39  ;;  %1797 = vmatpush.bf16.msrb.mxu3 %v6499_v40  ;;  %v5652_v32 = vld [vmem:[#allocation2 + $0xd0] sm:$0xf0] }
  0x4f   :  { %v6482_v44 = vld [vmem:[#allocation2 + $0x740] sm:$0xf]  ;;  %v6355_v48 = vor.u32 %v8506_v43, %v6354_v42  ;;  %v8438_v50 = vld [vmem:[#allocation2 + $0x42c] sm:$0xf0]  ;;  %1759 = vmatpush.bf16.msrb.mxu0 %v6099_v46  ;;  %v8360_v33 = vld [vmem:[#allocation2 + $0x1c4] sm:$0xf]  ;;  %v9280_v42 = vpack.c.b16 %v405_v25, %v405_v25  ;;  %v5655_v43 = vor.u32 %v8328_v31, %v5652_v32 }
  0x50   :  { %v6082_v49 = vld [vmem:[#allocation2 + $0x420] sm:$0xf]  ;;  %v6483_v52 = vor.u32 %v8538_v45, %v6482_v44  ;;  %v8470_v53 = vld [vmem:[#allocation2 + $0x52c] sm:$0xf0]  ;;  %v5780_v35 = vld [vmem:[#allocation2 + $0x1d0] sm:$0xf0] }
  0x51   :  { %v6210_v51 = vld [vmem:[#allocation2 + $0x520] sm:$0xf]  ;;  %v8502_v55 = vld [vmem:[#allocation2 + $0x62c] sm:$0xf0]  ;;  %v6083_v59 = vor.u32 %v8438_v50, %v6082_v49  ;;  %1772 = vmatpush.bf16.msrb.mxu1 %v6227_v47  ;;  %1785 = vmatpush.bf16.msrb.mxu2 %v6355_v48  ;;  %v8392_v36 = vld [vmem:[#allocation2 + $0x2c4] sm:$0xf]  ;;  %v5783_v45 = vor.u32 %v8360_v33, %v5780_v35 }
  0x52   :  { %v6338_v54 = vld [vmem:[#allocation2 + $0x620] sm:$0xf]  ;;  %v8534_v57 = vld [vmem:[#allocation2 + $0x72c] sm:$0xf0]  ;;  %v6211_v63 = vor.u32 %v8470_v53, %v6210_v51  ;;  %1798 = vmatpush.bf16.msrb.mxu3 %v6483_v52  ;;  %v5908_v37 = vld [vmem:[#allocation2 + $0x2d0] sm:$0xf0] }
  0x53   :  { %v6466_v56 = vld [vmem:[#allocation2 + $0x720] sm:$0xf]  ;;  %v8434_v60 = vld [vmem:[#allocation2 + $0x40c] sm:$0xf0]  ;;  %v6339_v0 = vor.u32 %v8502_v55, %v6338_v54  ;;  %1760 = vmatpush.bf16.msrb.mxu0 %v6083_v59  ;;  %v8424_v39 = vld [vmem:[#allocation2 + $0x3c4] sm:$0xf]  ;;  %v5911_v46 = vor.u32 %v8392_v36, %v5908_v37 }
  0x54   :  { %v6066_v58 = vld [vmem:[#allocation2 + $0x400] sm:$0xf]  ;;  %v8466_v62 = vld [vmem:[#allocation2 + $0x50c] sm:$0xf0]  ;;  %v6467_v5 = vor.u32 %v8534_v57, %v6466_v56  ;;  %v6036_v40 = vld [vmem:[#allocation2 + $0x3d0] sm:$0xf0] }
  0x55   :  { %v6194_v61 = vld [vmem:[#allocation2 + $0x500] sm:$0xf]  ;;  %v8498_v2 = vld [vmem:[#allocation2 + $0x60c] sm:$0xf0]  ;;  %v6067_v13 = vor.u32 %v8434_v60, %v6066_v58  ;;  %1773 = vmatpush.bf16.msrb.mxu1 %v6211_v63  ;;  %1786 = vmatpush.bf16.msrb.mxu2 %v6339_v0  ;;  %v8324_v47 = vld [vmem:[#allocation2 + $0xa4] sm:$0xf]  ;;  %v6039_v50 = vor.u32 %v8424_v39, %v6036_v40 }
  0x56   :  { %v6322_v1 = vld [vmem:[#allocation2 + $0x600] sm:$0xf]  ;;  %v8530_v8 = vld [vmem:[#allocation2 + $0x70c] sm:$0xf0]  ;;  %v6195_v18 = vor.u32 %v8466_v62, %v6194_v61  ;;  %1799 = vmatpush.bf16.msrb.mxu3 %v6467_v5  ;;  %v5636_v48 = vld [vmem:[#allocation2 + $0xb0] sm:$0xf0] }
  0x57   :  { %v6450_v7 = vld [vmem:[#allocation2 + $0x700] sm:$0xf]  ;;  %v126_v9 = vld [vmem:[%s9686_s0 + $0x10] sm:$0xff]  ;;  %v6323_v19 = vor.u32 %v8498_v2, %v6322_v1  ;;  %1761 = vmatpush.bf16.msrb.mxu0 %v6067_v13  ;;  %v8356_v49 = vld [vmem:[#allocation2 + $0x1a4] sm:$0xf]  ;;  %v5639_v56 = vor.u32 %v8324_v47, %v5636_v48 }
  0x58   :  { %v402_v24 = vunpack.c.l.b16 %v126_v9  ;;  %v6451_v26 = vor.u32 %v8530_v8, %v6450_v7  ;;  %v403_v28 = vunpack.c.h.b16 %v126_v9  ;;  %v5764_v51 = vld [vmem:[#allocation2 + $0x1b0] sm:$0xf0]  ;;  %v8388_v52 = vld [vmem:[#allocation2 + $0x2a4] sm:$0xf] }
  0x59   :  { %1774 = vmatpush.bf16.msrb.mxu1 %v6195_v18  ;;  %1787 = vmatpush.bf16.msrb.mxu2 %v6323_v19  ;;  %v5892_v53 = vld [vmem:[#allocation2 + $0x2b0] sm:$0xf0]  ;;  %v8420_v54 = vld [vmem:[#allocation2 + $0x3a4] sm:$0xf]  ;;  %v5767_v57 = vor.u32 %v8356_v49, %v5764_v51 }
  0x5a   :  { %v9278_v41 = vpack.c.b16 %v402_v24, %v402_v24  ;;  %1800 = vmatpush.bf16.msrb.mxu3 %v6451_v26  ;;  %v9282_v44 = vpack.c.b16 %v403_v28, %v403_v28  ;;  %v6020_v55 = vld [vmem:[#allocation2 + $0x3b0] sm:$0xf0]  ;;  %v5895_v58 = vor.u32 %v8388_v52, %v5892_v53  ;;  %v8320_v59 = vld [vmem:[#allocation2 + $0x84] sm:$0xf] }
  0x5b   :  { %1806 = vmatpush.bf16.msra.mxu0 %v5671_v27  ;;  %v5620_v60 = vld [vmem:[#allocation2 + $0x90] sm:$0xf0]  ;;  %v8352_v61 = vld [vmem:[#allocation2 + $0x184] sm:$0xf]  ;;  %v6023_v62 = vor.u32 %v8420_v54, %v6020_v55 }
  0x5c   :  { %1788 = vmatmul.bf16.vlgmr.msrb.gmra.mxu2 %v9276_v38  ;;  %1762 = vmatmul.bf16.vlgmr.msrb.gmra.mxu0 %v9278_v41  ;;  %v5748_v63 = vld [vmem:[#allocation2 + $0x190] sm:$0xf0]  ;;  %v8384_v0 = vld [vmem:[#allocation2 + $0x284] sm:$0xf]  ;;  %v5623_v5 = vor.u32 %v8320_v59, %v5620_v60 }
  0x5d   :  { %1819 = vmatpush.bf16.msra.mxu1 %v5799_v29  ;;  %1832 = vmatpush.bf16.msra.mxu2 %v5927_v30  ;;  %v5876_v1 = vld [vmem:[#allocation2 + $0x290] sm:$0xf0]  ;;  %v8416_v2 = vld [vmem:[#allocation2 + $0x384] sm:$0xf]  ;;  %v5751_v7 = vor.u32 %v8352_v61, %v5748_v63 }
  0x5e   :  { %1845 = vmatpush.bf16.msra.mxu3 %v6055_v34  ;;  %1775 = vmatmul.bf16.vlgmr.msrb.gmra.mxu1 %v9282_v44  ;;  %v6004_v3 = vld [vmem:[#allocation2 + $0x390] sm:$0xf0]  ;;  %v5879_v8 = vor.u32 %v8384_v0, %v5876_v1  ;;  %v8316_v9 = vld [vmem:[#allocation2 + $0x64] sm:$0xf] }
  0x5f   :  { %1801 = vmatmul.bf16.vlgmr.msrb.gmra.mxu3 %v9280_v42  ;;  %1807 = vmatpush.bf16.msra.mxu0 %v5655_v43  ;;  %v5604_v10 = vld [vmem:[#allocation2 + $0x70] sm:$0xf0]  ;;  %v8348_v11 = vld [vmem:[#allocation2 + $0x164] sm:$0xf]  ;;  %v6007_v12 = vor.u32 %v8416_v2, %v6004_v3 }
  0x60   :  { %v5732_v13 = vld [vmem:[#allocation2 + $0x170] sm:$0xf0]  ;;  %v8380_v14 = vld [vmem:[#allocation2 + $0x264] sm:$0xf]  ;;  %v5607_v18 = vor.u32 %v8316_v9, %v5604_v10 }
  0x61   :  { %1820 = vmatpush.bf16.msra.mxu1 %v5783_v45  ;;  %1833 = vmatpush.bf16.msra.mxu2 %v5911_v46  ;;  %v5860_v15 = vld [vmem:[#allocation2 + $0x270] sm:$0xf0]  ;;  %v8412_v16 = vld [vmem:[#allocation2 + $0x364] sm:$0xf]  ;;  %v5735_v19 = vor.u32 %v8348_v11, %v5732_v13 }
  0x62   :  { %1846 = vmatpush.bf16.msra.mxu3 %v6039_v50  ;;  %v5988_v17 = vld [vmem:[#allocation2 + $0x370] sm:$0xf0]  ;;  %v5863_v22 = vor.u32 %v8380_v14, %v5860_v15  ;;  %v8312_v23 = vld [vmem:[#allocation2 + $0x44] sm:$0xf] }
  0x63   :  { %1808 = vmatpush.bf16.msra.mxu0 %v5639_v56  ;;  %v5588_v24 = vld [vmem:[#allocation2 + $0x50] sm:$0xf0]  ;;  %v8344_v25 = vld [vmem:[#allocation2 + $0x144] sm:$0xf]  ;;  %v5991_v26 = vor.u32 %v8412_v16, %v5988_v17 }
  0x64   :  { %v5716_v27 = vld [vmem:[#allocation2 + $0x150] sm:$0xf0]  ;;  %v8376_v28 = vld [vmem:[#allocation2 + $0x244] sm:$0xf]  ;;  %v5591_v32 = vor.u32 %v8312_v23, %v5588_v24 }
  0x65   :  { %1821 = vmatpush.bf16.msra.mxu1 %v5767_v57  ;;  %1834 = vmatpush.bf16.msra.mxu2 %v5895_v58  ;;  %v5844_v29 = vld [vmem:[#allocation2 + $0x250] sm:$0xf0]  ;;  %v8408_v30 = vld [vmem:[#allocation2 + $0x344] sm:$0xf]  ;;  %v5719_v33 = vor.u32 %v8344_v25, %v5716_v27 }
  0x66   :  { %1847 = vmatpush.bf16.msra.mxu3 %v6023_v62  ;;  %v5972_v31 = vld [vmem:[#allocation2 + $0x350] sm:$0xf0]  ;;  %v5847_v34 = vor.u32 %v8376_v28, %v5844_v29  ;;  %v8308_v35 = vld [vmem:[#allocation2 + $0x24] sm:$0xf] }
  0x67   :  { %1809 = vmatpush.bf16.msra.mxu0 %v5623_v5  ;;  %v5572_v36 = vld [vmem:[#allocation2 + $0x30] sm:$0xf0]  ;;  %v8340_v37 = vld [vmem:[#allocation2 + $0x124] sm:$0xf]  ;;  %v5975_v39 = vor.u32 %v8408_v30, %v5972_v31 }
  0x68   :  { %v5700_v40 = vld [vmem:[#allocation2 + $0x130] sm:$0xf0]  ;;  %v8372_v43 = vld [vmem:[#allocation2 + $0x224] sm:$0xf]  ;;  %v5575_v48 = vor.u32 %v8308_v35, %v5572_v36 }
  0x69   :  { %1822 = vmatpush.bf16.msra.mxu1 %v5751_v7  ;;  %1835 = vmatpush.bf16.msra.mxu2 %v5879_v8  ;;  %v5828_v45 = vld [vmem:[#allocation2 + $0x230] sm:$0xf0]  ;;  %v8404_v46 = vld [vmem:[#allocation2 + $0x324] sm:$0xf]  ;;  %v5703_v51 = vor.u32 %v8340_v37, %v5700_v40 }
  0x6a   :  { %1848 = vmatpush.bf16.msra.mxu3 %v6007_v12  ;;  %v5956_v47 = vld [vmem:[#allocation2 + $0x330] sm:$0xf0]  ;;  %v8304_v49 = vld [vmem:[#allocation2 + $0x4] sm:$0xf]  ;;  %v5831_v52 = vor.u32 %v8372_v43, %v5828_v45 }
  0x6b   :  { %1810 = vmatpush.bf16.msra.mxu0 %v5607_v18  ;;  %v5556_v50 = vld [vmem:[#allocation2 + $0x10] sm:$0xf0]  ;;  %v8336_v53 = vld [vmem:[#allocation2 + $0x104] sm:$0xf]  ;;  %v5959_v56 = vor.u32 %v8404_v46, %v5956_v47 }
  0x6c   :  { %v5684_v54 = vld [vmem:[#allocation2 + $0x110] sm:$0xf0]  ;;  %v8368_v55 = vld [vmem:[#allocation2 + $0x204] sm:$0xf]  ;;  %v5559_v63 = vor.u32 %v8304_v49, %v5556_v50 }
  0x6d   :  { %1823 = vmatpush.bf16.msra.mxu1 %v5735_v19  ;;  %1836 = vmatpush.bf16.msra.mxu2 %v5863_v22  ;;  %v5812_v57 = vld [vmem:[#allocation2 + $0x210] sm:$0xf0]  ;;  %v8400_v58 = vld [vmem:[#allocation2 + $0x304] sm:$0xf]  ;;  %v5687_v3 = vor.u32 %v8336_v53, %v5684_v54 }
  0x6e   :  { %1849 = vmatpush.bf16.msra.mxu3 %v5991_v26  ;;  %v5940_v59 = vld [vmem:[#allocation2 + $0x310] sm:$0xf0]  ;;  %v8460_v60 = vld [vmem:[#allocation2 + $0x4e4] sm:$0xf]  ;;  %v5815_v5 = vor.u32 %v8368_v55, %v5812_v57 }
  0x6f   :  { %1811 = vmatpush.bf16.msra.mxu0 %v5591_v32  ;;  %v6180_v61 = vld [vmem:[#allocation2 + $0x4f0] sm:$0xf0]  ;;  %v8492_v62 = vld [vmem:[#allocation2 + $0x5e4] sm:$0xf]  ;;  %v5943_v9 = vor.u32 %v8400_v58, %v5940_v59 }
  0x70   :  { %v6308_v0 = vld [vmem:[#allocation2 + $0x5f0] sm:$0xf0]  ;;  %v8524_v1 = vld [vmem:[#allocation2 + $0x6e4] sm:$0xf]  ;;  %v6183_v10 = vor.u32 %v8460_v60, %v6180_v61 }
  0x71   :  { %1824 = vmatpush.bf16.msra.mxu1 %v5719_v33  ;;  %1837 = vmatpush.bf16.msra.mxu2 %v5847_v34  ;;  %v6436_v2 = vld [vmem:[#allocation2 + $0x6f0] sm:$0xf0]  ;;  %v8556_v7 = vld [vmem:[#allocation2 + $0x7e4] sm:$0xf]  ;;  %v6311_v11 = vor.u32 %v8492_v62, %v6308_v0 }
  0x72   :  { %1850 = vmatpush.bf16.msra.mxu3 %v5975_v39  ;;  %v6564_v8 = vld [vmem:[#allocation2 + $0x7f0] sm:$0xf0]  ;;  %v6439_v12 = vor.u32 %v8524_v1, %v6436_v2  ;;  %v8456_v13 = vld [vmem:[#allocation2 + $0x4c4] sm:$0xf] }
  0x73   :  { %1812 = vmatpush.bf16.msra.mxu0 %v5575_v48  ;;  %v6164_v14 = vld [vmem:[#allocation2 + $0x4d0] sm:$0xf0]  ;;  %v8488_v15 = vld [vmem:[#allocation2 + $0x5c4] sm:$0xf]  ;;  %v6567_v16 = vor.u32 %v8556_v7, %v6564_v8 }
  0x74   :  { %v6292_v17 = vld [vmem:[#allocation2 + $0x5d0] sm:$0xf0]  ;;  %v8520_v18 = vld [vmem:[#allocation2 + $0x6c4] sm:$0xf]  ;;  %v6167_v24 = vor.u32 %v8456_v13, %v6164_v14 }
  0x75   :  { %1825 = vmatpush.bf16.msra.mxu1 %v5703_v51  ;;  %1838 = vmatpush.bf16.msra.mxu2 %v5831_v52  ;;  %v6420_v19 = vld [vmem:[#allocation2 + $0x6d0] sm:$0xf0]  ;;  %v8552_v22 = vld [vmem:[#allocation2 + $0x7c4] sm:$0xf]  ;;  %v6295_v25 = vor.u32 %v8488_v15, %v6292_v17 }
  0x76   :  { %1851 = vmatpush.bf16.msra.mxu3 %v5959_v56  ;;  %v6548_v23 = vld [vmem:[#allocation2 + $0x7d0] sm:$0xf0]  ;;  %v6423_v26 = vor.u32 %v8520_v18, %v6420_v19  ;;  %v8452_v27 = vld [vmem:[#allocation2 + $0x4a4] sm:$0xf] }
  0x77   :  { %1813 = vmatpush.bf16.msra.mxu0 %v5559_v63  ;;  %v6148_v28 = vld [vmem:[#allocation2 + $0x4b0] sm:$0xf0]  ;;  %v8484_v29 = vld [vmem:[#allocation2 + $0x5a4] sm:$0xf]  ;;  %v6551_v30 = vor.u32 %v8552_v22, %v6548_v23 }
  0x78   :  { %v6276_v31 = vld [vmem:[#allocation2 + $0x5b0] sm:$0xf0]  ;;  %v8516_v32 = vld [vmem:[#allocation2 + $0x6a4] sm:$0xf]  ;;  %v6151_v36 = vor.u32 %v8452_v27, %v6148_v28 }
  0x79   :  { %1826 = vmatpush.bf16.msra.mxu1 %v5687_v3  ;;  %1839 = vmatpush.bf16.msra.mxu2 %v5815_v5  ;;  %v6404_v33 = vld [vmem:[#allocation2 + $0x6b0] sm:$0xf0]  ;;  %v8548_v34 = vld [vmem:[#allocation2 + $0x7a4] sm:$0xf]  ;;  %v6279_v37 = vor.u32 %v8484_v29, %v6276_v31 }
  0x7a   :  { %1852 = vmatpush.bf16.msra.mxu3 %v5943_v9  ;;  %v6532_v35 = vld [vmem:[#allocation2 + $0x7b0] sm:$0xf0]  ;;  %1814 = vmatmul.bf16.vlgmr.msra.gmra.mxu0 %v9263_v20  ;;  %v6407_v39 = vor.u32 %v8516_v32, %v6404_v33  ;;  %v8448_v40 = vld [vmem:[#allocation2 + $0x484] sm:$0xf] }
  0x7b   :  { %1858 = vmatpush.bf16.msrb.mxu0 %v6183_v10  ;;  %v6132_v43 = vld [vmem:[#allocation2 + $0x490] sm:$0xf0]  ;;  %v8480_v45 = vld [vmem:[#allocation2 + $0x584] sm:$0xf]  ;;  %v6535_v46 = vor.u32 %v8548_v34, %v6532_v35 }
  0x7c   :  { %1840 = vmatmul.bf16.vlgmr.msra.gmra.mxu2 %v9255_v4  ;;  %1827 = vmatmul.bf16.vlgmr.msra.gmra.mxu1 %v9266_v21  ;;  %v6260_v47 = vld [vmem:[#allocation2 + $0x590] sm:$0xf0]  ;;  %v8512_v48 = vld [vmem:[#allocation2 + $0x684] sm:$0xf]  ;;  %v6135_v52 = vor.u32 %v8448_v40, %v6132_v43  ;;  %v5674_v43 = vld [vmem:[#allocation2 + $0xe8] sm:$0xf] }
  0x7d   :  { %1871 = vmatpush.bf16.msrb.mxu1 %v6311_v11  ;;  %1884 = vmatpush.bf16.msrb.mxu2 %v6439_v12  ;;  %v6388_v49 = vld [vmem:[#allocation2 + $0x690] sm:$0xf0]  ;;  %v8544_v50 = vld [vmem:[#allocation2 + $0x784] sm:$0xf]  ;;  %v6263_v53 = vor.u32 %v8480_v45, %v6260_v47  ;;  %v8335_v45 = vld [vmem:[#allocation2 + $0xf4] sm:$0xf0] }
  0x7e   :  { %1897 = vmatpush.bf16.msrb.mxu3 %v6567_v16  ;;  %v6516_v51 = vld [vmem:[#allocation2 + $0x790] sm:$0xf0]  ;;  %v6391_v54 = vor.u32 %v8512_v48, %v6388_v49  ;;  %v8444_v55 = vld [vmem:[#allocation2 + $0x464] sm:$0xf]  ;;  %v8367_v48 = vld [vmem:[#allocation2 + $0x1f4] sm:$0xf0] }
  0x7f   :  { %1853 = vmatmul.bf16.vlgmr.msra.gmra.mxu3 %v9260_v6  ;;  %1859 = vmatpush.bf16.msrb.mxu0 %v6167_v24  ;;  %v6116_v56 = vld [vmem:[#allocation2 + $0x470] sm:$0xf0]  ;;  %v8476_v57 = vld [vmem:[#allocation2 + $0x564] sm:$0xf]  ;;  %v6519_v58 = vor.u32 %v8544_v50, %v6516_v51  ;;  %v5930_v49 = vld [vmem:[#allocation2 + $0x2e8] sm:$0xf] }
  0x80   :  { %v6244_v59 = vld [vmem:[#allocation2 + $0x570] sm:$0xf0]  ;;  %v8508_v60 = vld [vmem:[#allocation2 + $0x664] sm:$0xf]  ;;  %v6119_v0 = vor.u32 %v8444_v55, %v6116_v56  ;;  %v8399_v50 = vld [vmem:[#allocation2 + $0x2f4] sm:$0xf0]  ;;  %v5675_v56 = vor.u32 %v8335_v45, %v5674_v43 }
  0x81   :  { %1872 = vmatpush.bf16.msrb.mxu1 %v6295_v25  ;;  %1885 = vmatpush.bf16.msrb.mxu2 %v6423_v26  ;;  %v6372_v61 = vld [vmem:[#allocation2 + $0x670] sm:$0xf0]  ;;  %v8540_v62 = vld [vmem:[#allocation2 + $0x764] sm:$0xf]  ;;  %v6247_v1 = vor.u32 %v8476_v57, %v6244_v59  ;;  %v5658_v59 = vld [vmem:[#allocation2 + $0xc8] sm:$0xf] }
  0x82   :  { %1898 = vmatpush.bf16.msrb.mxu3 %v6551_v30  ;;  %v6500_v63 = vld [vmem:[#allocation2 + $0x770] sm:$0xf0]  ;;  %v6375_v2 = vor.u32 %v8508_v60, %v6372_v61  ;;  %v8440_v3 = vld [vmem:[#allocation2 + $0x444] sm:$0xf]  ;;  %v8331_v60 = vld [vmem:[#allocation2 + $0xd4] sm:$0xf0] }
  0x83   :  { %1860 = vmatpush.bf16.msrb.mxu0 %v6151_v36  ;;  %v6100_v5 = vld [vmem:[#allocation2 + $0x450] sm:$0xf0]  ;;  %v8472_v7 = vld [vmem:[#allocation2 + $0x544] sm:$0xf]  ;;  %v6503_v8 = vor.u32 %v8540_v62, %v6500_v63  ;;  %v5786_v61 = vld [vmem:[#allocation2 + $0x1c8] sm:$0xf] }
  0x84   :  { %v6228_v9 = vld [vmem:[#allocation2 + $0x550] sm:$0xf0]  ;;  %v8504_v10 = vld [vmem:[#allocation2 + $0x644] sm:$0xf]  ;;  %v6103_v14 = vor.u32 %v8440_v3, %v6100_v5  ;;  %v8363_v63 = vld [vmem:[#allocation2 + $0x1d4] sm:$0xf0]  ;;  %v5659_v5 = vor.u32 %v8331_v60, %v5658_v59 }
  0x85   :  { %1873 = vmatpush.bf16.msrb.mxu1 %v6279_v37  ;;  %1886 = vmatpush.bf16.msrb.mxu2 %v6407_v39  ;;  %v6356_v11 = vld [vmem:[#allocation2 + $0x650] sm:$0xf0]  ;;  %v8536_v12 = vld [vmem:[#allocation2 + $0x744] sm:$0xf]  ;;  %v6231_v15 = vor.u32 %v8472_v7, %v6228_v9  ;;  %v8427_v3 = vld [vmem:[#allocation2 + $0x3d4] sm:$0xf0]  ;;  %v5787_v7 = vor.u32 %v8363_v63, %v5786_v61 }
  0x86   :  { %1899 = vmatpush.bf16.msrb.mxu3 %v6535_v46  ;;  %v6484_v13 = vld [vmem:[#allocation2 + $0x750] sm:$0xf0]  ;;  %v6359_v16 = vor.u32 %v8504_v10, %v6356_v11  ;;  %v8436_v17 = vld [vmem:[#allocation2 + $0x424] sm:$0xf]  ;;  %v5802_v46 = vld [vmem:[#allocation2 + $0x1e8] sm:$0xf] }
  0x87   :  { %1861 = vmatpush.bf16.msrb.mxu0 %v6135_v52  ;;  %v6084_v18 = vld [vmem:[#allocation2 + $0x430] sm:$0xf0]  ;;  %v8468_v19 = vld [vmem:[#allocation2 + $0x524] sm:$0xf]  ;;  %v6487_v22 = vor.u32 %v8536_v12, %v6484_v13  ;;  %v5803_v57 = vor.u32 %v8367_v48, %v5802_v46  ;;  %v5642_v9 = vld [vmem:[#allocation2 + $0xa8] sm:$0xf] }
  0x88   :  { %v6212_v23 = vld [vmem:[#allocation2 + $0x530] sm:$0xf0]  ;;  %v8500_v24 = vld [vmem:[#allocation2 + $0x624] sm:$0xf]  ;;  %v6087_v28 = vor.u32 %v8436_v17, %v6084_v18  ;;  %v8327_v10 = vld [vmem:[#allocation2 + $0xb4] sm:$0xf0] }
  0x89   :  { %1874 = vmatpush.bf16.msrb.mxu1 %v6263_v53  ;;  %1887 = vmatpush.bf16.msrb.mxu2 %v6391_v54  ;;  %v6340_v25 = vld [vmem:[#allocation2 + $0x630] sm:$0xf0]  ;;  %v8532_v26 = vld [vmem:[#allocation2 + $0x724] sm:$0xf]  ;;  %v6215_v31 = vor.u32 %v8468_v19, %v6212_v23  ;;  %v6058_v53 = vld [vmem:[#allocation2 + $0x3e8] sm:$0xf]  ;;  %v5643_v18 = vor.u32 %v8327_v10, %v5642_v9 }
  0x8a   :  { %1900 = vmatpush.bf16.msrb.mxu3 %v6519_v58  ;;  %v6468_v27 = vld [vmem:[#allocation2 + $0x730] sm:$0xf0]  ;;  %v8432_v29 = vld [vmem:[#allocation2 + $0x404] sm:$0xf]  ;;  %v6343_v32 = vor.u32 %v8500_v24, %v6340_v25  ;;  %v8431_v54 = vld [vmem:[#allocation2 + $0x3f4] sm:$0xf0]  ;;  %v5931_v58 = vor.u32 %v8399_v50, %v5930_v49 }
  0x8b   :  { %1862 = vmatpush.bf16.msrb.mxu0 %v6119_v0  ;;  %v6068_v30 = vld [vmem:[#allocation2 + $0x410] sm:$0xf0]  ;;  %v8464_v33 = vld [vmem:[#allocation2 + $0x504] sm:$0xf]  ;;  %v6471_v36 = vor.u32 %v8532_v26, %v6468_v27  ;;  %v6059_v62 = vor.u32 %v8431_v54, %v6058_v53  ;;  %v5914_v0 = vld [vmem:[#allocation2 + $0x2c8] sm:$0xf] }
  0x8c   :  { %v6196_v34 = vld [vmem:[#allocation2 + $0x510] sm:$0xf0]  ;;  %v8496_v35 = vld [vmem:[#allocation2 + $0x604] sm:$0xf]  ;;  %v6071_v47 = vor.u32 %v8432_v29, %v6068_v30  ;;  %v5770_v11 = vld [vmem:[#allocation2 + $0x1a8] sm:$0xf] }
  0x8d   :  { %1875 = vmatpush.bf16.msrb.mxu1 %v6247_v1  ;;  %1888 = vmatpush.bf16.msrb.mxu2 %v6375_v2  ;;  %v6324_v37 = vld [vmem:[#allocation2 + $0x610] sm:$0xf0]  ;;  %v8528_v39 = vld [vmem:[#allocation2 + $0x704] sm:$0xf]  ;;  %v6199_v51 = vor.u32 %v8464_v33, %v6196_v34  ;;  %v8395_v1 = vld [vmem:[#allocation2 + $0x2d4] sm:$0xf0] }
  0x8e   :  { %1901 = vmatpush.bf16.msrb.mxu3 %v6503_v8  ;;  %v6452_v40 = vld [vmem:[#allocation2 + $0x710] sm:$0xf0]  ;;  %v6327_v52 = vor.u32 %v8496_v35, %v6324_v37  ;;  %v6042_v2 = vld [vmem:[#allocation2 + $0x3c8] sm:$0xf]  ;;  %v5915_v8 = vor.u32 %v8395_v1, %v5914_v0  ;;  %v8359_v13 = vld [vmem:[#allocation2 + $0x1b4] sm:$0xf0] }
  0x8f   :  { %1863 = vmatpush.bf16.msrb.mxu0 %v6103_v14  ;;  %v6455_v55 = vor.u32 %v8528_v39, %v6452_v40  ;;  %v6043_v12 = vor.u32 %v8427_v3, %v6042_v2  ;;  %v5898_v14 = vld [vmem:[#allocation2 + $0x2a8] sm:$0xf]  ;;  %v8423_v17 = vld [vmem:[#allocation2 + $0x3b4] sm:$0xf0]  ;;  %v5771_v19 = vor.u32 %v8359_v13, %v5770_v11 }
  0x90   :  { %v5626_v23 = vld [vmem:[#allocation2 + $0x88] sm:$0xf]  ;;  %v8323_v24 = vld [vmem:[#allocation2 + $0x94] sm:$0xf0] }
  0x91   :  { %1876 = vmatpush.bf16.msrb.mxu1 %v6231_v15  ;;  %1889 = vmatpush.bf16.msrb.mxu2 %v6359_v16  ;;  %v8391_v15 = vld [vmem:[#allocation2 + $0x2b4] sm:$0xf0]  ;;  %v6026_v16 = vld [vmem:[#allocation2 + $0x3a8] sm:$0xf] }
  0x92   :  { %1902 = vmatpush.bf16.msrb.mxu3 %v6487_v22  ;;  %v5899_v22 = vor.u32 %v8391_v15, %v5898_v14  ;;  %v5754_v25 = vld [vmem:[#allocation2 + $0x188] sm:$0xf]  ;;  %v6027_v26 = vor.u32 %v8423_v17, %v6026_v16  ;;  %v8355_v27 = vld [vmem:[#allocation2 + $0x194] sm:$0xf0] }
  0x93   :  { %1864 = vmatpush.bf16.msrb.mxu0 %v6087_v28  ;;  %v5882_v28 = vld [vmem:[#allocation2 + $0x288] sm:$0xf]  ;;  %v8387_v29 = vld [vmem:[#allocation2 + $0x294] sm:$0xf0]  ;;  %v5755_v33 = vor.u32 %v8355_v27, %v5754_v25 }
  0x94   :  { %v6010_v30 = vld [vmem:[#allocation2 + $0x388] sm:$0xf]  ;;  %v5883_v34 = vor.u32 %v8387_v29, %v5882_v28  ;;  %v8351_v40 = vld [vmem:[#allocation2 + $0x174] sm:$0xf0] }
  0x95   :  { %1877 = vmatpush.bf16.msrb.mxu1 %v6215_v31  ;;  %1890 = vmatpush.bf16.msrb.mxu2 %v6343_v32  ;;  %v8419_v31 = vld [vmem:[#allocation2 + $0x394] sm:$0xf0]  ;;  %v5627_v32 = vor.u32 %v8323_v24, %v5626_v23  ;;  %v5610_v35 = vld [vmem:[#allocation2 + $0x68] sm:$0xf] }
  0x96   :  { %1903 = vmatpush.bf16.msrb.mxu3 %v6471_v36  ;;  %v8319_v36 = vld [vmem:[#allocation2 + $0x74] sm:$0xf0]  ;;  %v5738_v37 = vld [vmem:[#allocation2 + $0x168] sm:$0xf]  ;;  %v6011_v39 = vor.u32 %v8419_v31, %v6010_v30 }
  0x97   :  { %1865 = vmatpush.bf16.msrb.mxu0 %v6071_v47  ;;  %v5866_v43 = vld [vmem:[#allocation2 + $0x268] sm:$0xf]  ;;  %v8383_v45 = vld [vmem:[#allocation2 + $0x274] sm:$0xf0]  ;;  %v5611_v48 = vor.u32 %v8319_v36, %v5610_v35  ;;  %v5739_v49 = vor.u32 %v8351_v40, %v5738_v37 }
  0x98   :  { %v5994_v46 = vld [vmem:[#allocation2 + $0x368] sm:$0xf]  ;;  %v8415_v47 = vld [vmem:[#allocation2 + $0x374] sm:$0xf0]  ;;  %v5867_v50 = vor.u32 %v8383_v45, %v5866_v43 }
  0x99   :  { %1878 = vmatpush.bf16.msrb.mxu1 %v6199_v51  ;;  %1891 = vmatpush.bf16.msrb.mxu2 %v6327_v52  ;;  %v5594_v51 = vld [vmem:[#allocation2 + $0x48] sm:$0xf]  ;;  %v8315_v52 = vld [vmem:[#allocation2 + $0x54] sm:$0xf0]  ;;  %v5995_v54 = vor.u32 %v8415_v47, %v5994_v46 }
  0x9a   :  { %1904 = vmatpush.bf16.msrb.mxu3 %v6455_v55  ;;  %1866 = vmatmul.bf16.vlgmr.msrb.gmra.mxu0 %v9278_v41  ;;  %v5722_v53 = vld [vmem:[#allocation2 + $0x148] sm:$0xf]  ;;  %v8347_v55 = vld [vmem:[#allocation2 + $0x154] sm:$0xf0]  ;;  %v5595_v60 = vor.u32 %v8315_v52, %v5594_v51 }
  0x9b   :  { %1910 = vmatpush.bf16.msra.mxu0 %v5675_v56  ;;  %v5850_v56 = vld [vmem:[#allocation2 + $0x248] sm:$0xf]  ;;  %v8411_v59 = vld [vmem:[#allocation2 + $0x354] sm:$0xf0]  ;;  %v5723_v61 = vor.u32 %v8347_v55, %v5722_v53 }
  0x9c   :  { %1892 = vmatmul.bf16.vlgmr.msrb.gmra.mxu2 %v9276_v38  ;;  %1879 = vmatmul.bf16.vlgmr.msrb.gmra.mxu1 %v9282_v44  ;;  %v5578_v63 = vld [vmem:[#allocation2 + $0x28] sm:$0xf]  ;;  %v8311_v0 = vld [vmem:[#allocation2 + $0x34] sm:$0xf0] }
  0x9d   :  { %1923 = vmatpush.bf16.msra.mxu1 %v5803_v57  ;;  %1936 = vmatpush.bf16.msra.mxu2 %v5931_v58  ;;  %v8379_v57 = vld [vmem:[#allocation2 + $0x254] sm:$0xf0]  ;;  %v5978_v58 = vld [vmem:[#allocation2 + $0x348] sm:$0xf]  ;;  %v5579_v10 = vor.u32 %v8311_v0, %v5578_v63 }
  0x9e   :  { %1949 = vmatpush.bf16.msra.mxu3 %v6059_v62  ;;  %v5851_v62 = vor.u32 %v8379_v57, %v5850_v56  ;;  %v5706_v1 = vld [vmem:[#allocation2 + $0x128] sm:$0xf]  ;;  %v5979_v2 = vor.u32 %v8411_v59, %v5978_v58  ;;  %v8343_v3 = vld [vmem:[#allocation2 + $0x134] sm:$0xf0] }
  0x9f   :  { %1905 = vmatmul.bf16.vlgmr.msrb.gmra.mxu3 %v9280_v42  ;;  %1911 = vmatpush.bf16.msra.mxu0 %v5659_v5  ;;  %v5834_v5 = vld [vmem:[#allocation2 + $0x228] sm:$0xf]  ;;  %v8407_v9 = vld [vmem:[#allocation2 + $0x334] sm:$0xf0]  ;;  %v5707_v13 = vor.u32 %v8343_v3, %v5706_v1 }
  0xa0   :  { %v5562_v11 = vld [vmem:[#allocation2 + $0x8] sm:$0xf]  ;;  %v8339_v16 = vld [vmem:[#allocation2 + $0x114] sm:$0xf0] }
  0xa1   :  { %1924 = vmatpush.bf16.msra.mxu1 %v5787_v7  ;;  %1937 = vmatpush.bf16.msra.mxu2 %v5915_v8  ;;  %v8375_v7 = vld [vmem:[#allocation2 + $0x234] sm:$0xf0]  ;;  %v5962_v8 = vld [vmem:[#allocation2 + $0x328] sm:$0xf] }
  0xa2   :  { %1950 = vmatpush.bf16.msra.mxu3 %v6043_v12  ;;  %v8307_v12 = vld [vmem:[#allocation2 + $0x14] sm:$0xf0]  ;;  %v5835_v14 = vor.u32 %v8375_v7, %v5834_v5  ;;  %v5690_v15 = vld [vmem:[#allocation2 + $0x108] sm:$0xf] }
  0xa3   :  { %1912 = vmatpush.bf16.msra.mxu0 %v5643_v18  ;;  %v5818_v17 = vld [vmem:[#allocation2 + $0x208] sm:$0xf]  ;;  %v5963_v18 = vor.u32 %v8407_v9, %v5962_v8  ;;  %v8403_v23 = vld [vmem:[#allocation2 + $0x314] sm:$0xf0]  ;;  %v5563_v27 = vor.u32 %v8307_v12, %v5562_v11  ;;  %v5691_v31 = vor.u32 %v8339_v16, %v5690_v15 }
  0xa4   :  { %v6186_v24 = vld [vmem:[#allocation2 + $0x4e8] sm:$0xf]  ;;  %v8463_v25 = vld [vmem:[#allocation2 + $0x4f4] sm:$0xf0] }
  0xa5   :  { %1925 = vmatpush.bf16.msra.mxu1 %v5771_v19  ;;  %1938 = vmatpush.bf16.msra.mxu2 %v5899_v22  ;;  %v8371_v19 = vld [vmem:[#allocation2 + $0x214] sm:$0xf0]  ;;  %v5946_v22 = vld [vmem:[#allocation2 + $0x308] sm:$0xf]  ;;  %v6187_v36 = vor.u32 %v8463_v25, %v6186_v24 }
  0xa6   :  { %1951 = vmatpush.bf16.msra.mxu3 %v6027_v26  ;;  %v6314_v26 = vld [vmem:[#allocation2 + $0x5e8] sm:$0xf]  ;;  %v8495_v28 = vld [vmem:[#allocation2 + $0x5f4] sm:$0xf0]  ;;  %v5947_v35 = vor.u32 %v8403_v23, %v5946_v22  ;;  %v9303_v22 = vld [vmem:[%s9688_s2] sm:$0xf] }
  0xa7   :  { %1913 = vmatpush.bf16.msra.mxu0 %v5627_v32  ;;  %v6442_v29 = vld [vmem:[#allocation2 + $0x6e8] sm:$0xf]  ;;  %v8527_v30 = vld [vmem:[#allocation2 + $0x6f4] sm:$0xf0]  ;;  %v5819_v32 = vor.u32 %v8371_v19, %v5818_v17  ;;  %v6315_v37 = vor.u32 %v8495_v28, %v6314_v26 }
  0xa8   :  { %v6170_v40 = vld [vmem:[#allocation2 + $0x4c8] sm:$0xf]  ;;  %v8459_v43 = vld [vmem:[#allocation2 + $0x4d4] sm:$0xf0] }
  0xa9   :  { %1926 = vmatpush.bf16.msra.mxu1 %v5755_v33  ;;  %1939 = vmatpush.bf16.msra.mxu2 %v5883_v34  ;;  %v6570_v33 = vld [vmem:[#allocation2 + $0x7e8] sm:$0xf]  ;;  %v8559_v34 = vld [vmem:[#allocation2 + $0x7f4] sm:$0xf0]  ;;  %v6171_v52 = vor.u32 %v8459_v43, %v6170_v40 }
  0xaa   :  { %1952 = vmatpush.bf16.msra.mxu3 %v6011_v39  ;;  %v6443_v39 = vor.u32 %v8527_v30, %v6442_v29  ;;  %v6298_v45 = vld [vmem:[#allocation2 + $0x5c8] sm:$0xf]  ;;  %v6571_v46 = vor.u32 %v8559_v34, %v6570_v33  ;;  %v8491_v47 = vld [vmem:[#allocation2 + $0x5d4] sm:$0xf0]  ;;  %v386_v30 = vperm.slane %v9303_v22, 0 }
  0xab   :  { %1914 = vmatpush.bf16.msra.mxu0 %v5611_v48  ;;  %v6426_v48 = vld [vmem:[#allocation2 + $0x6c8] sm:$0xf]  ;;  %v8555_v51 = vld [vmem:[#allocation2 + $0x7d4] sm:$0xf0]  ;;  %v6299_v53 = vor.u32 %v8491_v47, %v6298_v45 }
  0xac   :  { %v6154_v55 = vld [vmem:[#allocation2 + $0x4a8] sm:$0xf]  ;;  %v8455_v56 = vld [vmem:[#allocation2 + $0x4b4] sm:$0xf0] }
  0xad   :  { %1927 = vmatpush.bf16.msra.mxu1 %v5739_v49  ;;  %1940 = vmatpush.bf16.msra.mxu2 %v5867_v50  ;;  %v8523_v49 = vld [vmem:[#allocation2 + $0x6d4] sm:$0xf0]  ;;  %v6554_v50 = vld [vmem:[#allocation2 + $0x7c8] sm:$0xf]  ;;  %v6155_v0 = vor.u32 %v8455_v56, %v6154_v55 }
  0xae   :  { %1953 = vmatpush.bf16.msra.mxu3 %v5995_v54  ;;  %v6427_v54 = vor.u32 %v8523_v49, %v6426_v48  ;;  %v6282_v57 = vld [vmem:[#allocation2 + $0x5a8] sm:$0xf]  ;;  %v6555_v58 = vor.u32 %v8555_v51, %v6554_v50  ;;  %v8487_v59 = vld [vmem:[#allocation2 + $0x5b4] sm:$0xf0] }
  0xaf   :  { %1915 = vmatpush.bf16.msra.mxu0 %v5595_v60  ;;  %v6410_v60 = vld [vmem:[#allocation2 + $0x6a8] sm:$0xf]  ;;  %v8551_v63 = vld [vmem:[#allocation2 + $0x7b4] sm:$0xf0]  ;;  %v6283_v1 = vor.u32 %v8487_v59, %v6282_v57 }
  0xb0   :  { %v6138_v3 = vld [vmem:[#allocation2 + $0x488] sm:$0xf]  ;;  %v8451_v5 = vld [vmem:[#allocation2 + $0x494] sm:$0xf0] }
  0xb1   :  { %1928 = vmatpush.bf16.msra.mxu1 %v5723_v61  ;;  %1941 = vmatpush.bf16.msra.mxu2 %v5851_v62  ;;  %v8519_v61 = vld [vmem:[#allocation2 + $0x6b4] sm:$0xf0]  ;;  %v6538_v62 = vld [vmem:[#allocation2 + $0x7a8] sm:$0xf] }
  0xb2   :  { %1954 = vmatpush.bf16.msra.mxu3 %v5979_v2  ;;  %v6411_v2 = vor.u32 %v8519_v61, %v6410_v60  ;;  %v6266_v7 = vld [vmem:[#allocation2 + $0x588] sm:$0xf]  ;;  %v6539_v8 = vor.u32 %v8551_v63, %v6538_v62  ;;  %v8483_v9 = vld [vmem:[#allocation2 + $0x594] sm:$0xf0] }
  0xb3   :  { %1916 = vmatpush.bf16.msra.mxu0 %v5579_v10  ;;  %v6394_v10 = vld [vmem:[#allocation2 + $0x688] sm:$0xf]  ;;  %v8515_v11 = vld [vmem:[#allocation2 + $0x694] sm:$0xf0]  ;;  %v6267_v16 = vor.u32 %v8483_v9, %v6266_v7 }
  0xb4   :  { %v6522_v12 = vld [vmem:[#allocation2 + $0x788] sm:$0xf]  ;;  %v6395_v17 = vor.u32 %v8515_v11, %v6394_v10  ;;  %v8479_v24 = vld [vmem:[#allocation2 + $0x574] sm:$0xf0] }
  0xb5   :  { %1929 = vmatpush.bf16.msra.mxu1 %v5707_v13  ;;  %1942 = vmatpush.bf16.msra.mxu2 %v5835_v14  ;;  %v8547_v13 = vld [vmem:[#allocation2 + $0x794] sm:$0xf0]  ;;  %v6139_v14 = vor.u32 %v8451_v5, %v6138_v3  ;;  %v6122_v15 = vld [vmem:[#allocation2 + $0x468] sm:$0xf] }
  0xb6   :  { %1955 = vmatpush.bf16.msra.mxu3 %v5963_v18  ;;  %v8447_v18 = vld [vmem:[#allocation2 + $0x474] sm:$0xf0]  ;;  %v6250_v19 = vld [vmem:[#allocation2 + $0x568] sm:$0xf]  ;;  %v6523_v23 = vor.u32 %v8547_v13, %v6522_v12 }
  0xb7   :  { %1917 = vmatpush.bf16.msra.mxu0 %v5563_v27  ;;  %v6378_v25 = vld [vmem:[#allocation2 + $0x668] sm:$0xf]  ;;  %v8511_v26 = vld [vmem:[#allocation2 + $0x674] sm:$0xf0]  ;;  %v6123_v29 = vor.u32 %v8447_v18, %v6122_v15  ;;  %v8365_v18 = vld [vmem:[#allocation2 + $0x1ec] sm:$0xf] }
  0xb8   :  { %v6506_v27 = vld [vmem:[#allocation2 + $0x768] sm:$0xf]  ;;  %v8543_v28 = vld [vmem:[#allocation2 + $0x774] sm:$0xf0] }
  0xb9   :  { %1930 = vmatpush.bf16.msra.mxu1 %v5691_v31  ;;  %1943 = vmatpush.bf16.msra.mxu2 %v5819_v32  ;;  %v6251_v31 = vor.u32 %v8479_v24, %v6250_v19  ;;  %v6379_v32 = vor.u32 %v8511_v26, %v6378_v25  ;;  %v6106_v33 = vld [vmem:[#allocation2 + $0x448] sm:$0xf]  ;;  %v8443_v34 = vld [vmem:[#allocation2 + $0x454] sm:$0xf0]  ;;  %v5804_v24 = vld [vmem:[#allocation2 + $0x1f8] sm:$0xf0] }
  0xba   :  { %1956 = vmatpush.bf16.msra.mxu3 %v5947_v35  ;;  %1918 = vmatmul.bf16.vlgmr.msra.gmra.mxu0 %v9263_v20  ;;  %v6234_v35 = vld [vmem:[#allocation2 + $0x548] sm:$0xf]  ;;  %v8507_v40 = vld [vmem:[#allocation2 + $0x654] sm:$0xf0]  ;;  %v6107_v47 = vor.u32 %v8443_v34, %v6106_v33  ;;  %v8397_v25 = vld [vmem:[#allocation2 + $0x2ec] sm:$0xf] }
  0xbb   :  { %1962 = vmatpush.bf16.msrb.mxu0 %v6187_v36  ;;  %v6507_v36 = vor.u32 %v8543_v28, %v6506_v27  ;;  %v6490_v43 = vld [vmem:[#allocation2 + $0x748] sm:$0xf]  ;;  %v8539_v45 = vld [vmem:[#allocation2 + $0x754] sm:$0xf0]  ;;  %v5932_v26 = vld [vmem:[#allocation2 + $0x2f8] sm:$0xf0] }
  0xbc   :  { %1944 = vmatmul.bf16.vlgmr.msra.gmra.mxu2 %v9255_v4  ;;  %1931 = vmatmul.bf16.vlgmr.msra.gmra.mxu1 %v9266_v21  ;;  %v6491_v56 = vor.u32 %v8539_v45, %v6490_v43  ;;  %v8471_v57 = vld [vmem:[#allocation2 + $0x534] sm:$0xf0]  ;;  %v6474_v62 = vld [vmem:[#allocation2 + $0x728] sm:$0xf]  ;;  %v8361_v43 = vld [vmem:[#allocation2 + $0x1cc] sm:$0xf] }
  0xbd   :  { %1975 = vmatpush.bf16.msrb.mxu1 %v6315_v37  ;;  %1988 = vmatpush.bf16.msrb.mxu2 %v6443_v39  ;;  %v8475_v37 = vld [vmem:[#allocation2 + $0x554] sm:$0xf0]  ;;  %v6362_v39 = vld [vmem:[#allocation2 + $0x648] sm:$0xf] }
  0xbe   :  { %2001 = vmatpush.bf16.msrb.mxu3 %v6571_v46  ;;  %v6235_v50 = vor.u32 %v8475_v37, %v6234_v35  ;;  %v6363_v51 = vor.u32 %v8507_v40, %v6362_v39  ;;  %v1737_v55 = vpop.f32.mrf.mxu2  ;;  %v8503_v59 = vld [vmem:[#allocation2 + $0x634] sm:$0xf0]  ;;  %v6330_v10 = vld [vmem:[#allocation2 + $0x608] sm:$0xf]  ;;  %v5935_v37 = vor.u32 %v8397_v25, %v5932_v26  ;;  %v8329_v39 = vld [vmem:[#allocation2 + $0xcc] sm:$0xf] }
  0xbf   :  { %1957 = vmatmul.bf16.vlgmr.msra.gmra.mxu3 %v9260_v6  ;;  %1963 = vmatpush.bf16.msrb.mxu0 %v6171_v52  ;;  %v6090_v52 = vld [vmem:[#allocation2 + $0x428] sm:$0xf]  ;;  %v1750_v61 = vpop.f32.mrf.mxu3  ;;  %v8535_v63 = vld [vmem:[#allocation2 + $0x734] sm:$0xf0]  ;;  %v5660_v40 = vld [vmem:[#allocation2 + $0xd8] sm:$0xf0] }
  0xc0   :  { %v8467_v9 = vld [vmem:[#allocation2 + $0x514] sm:$0xf0]  ;;  %v6475_v11 = vor.u32 %v8535_v63, %v6474_v62  ;;  %v6458_v13 = vld [vmem:[#allocation2 + $0x708] sm:$0xf]  ;;  %v6028_v62 = vld [vmem:[#allocation2 + $0x3b8] sm:$0xf0] }
  0xc1   :  { %1976 = vmatpush.bf16.msrb.mxu1 %v6299_v53  ;;  %1989 = vmatpush.bf16.msrb.mxu2 %v6427_v54  ;;  %v8439_v53 = vld [vmem:[#allocation2 + $0x434] sm:$0xf0]  ;;  %v6218_v54 = vld [vmem:[#allocation2 + $0x528] sm:$0xf] }
  0xc2   :  { %2002 = vmatpush.bf16.msrb.mxu3 %v6555_v58  ;;  %v6346_v58 = vld [vmem:[#allocation2 + $0x628] sm:$0xf]  ;;  %v6219_v5 = vor.u32 %v8471_v57, %v6218_v54  ;;  %v8499_v12 = vld [vmem:[#allocation2 + $0x614] sm:$0xf0]  ;;  %v8325_v54 = vld [vmem:[#allocation2 + $0xac] sm:$0xf] }
  0xc3   :  { %1964 = vmatpush.bf16.msrb.mxu0 %v6155_v0  ;;  %v6091_v0 = vor.u32 %v8439_v53, %v6090_v52  ;;  %v6347_v7 = vor.u32 %v8503_v59, %v6346_v58  ;;  %v5772_v58 = vld [vmem:[#allocation2 + $0x1b8] sm:$0xf0]  ;;  %v8389_v59 = vld [vmem:[#allocation2 + $0x2ac] sm:$0xf] }
  0xc5   :  { %1977 = vmatpush.bf16.msrb.mxu1 %v6283_v1  ;;  %1990 = vmatpush.bf16.msrb.mxu2 %v6411_v2  ;;  %v1711_v46 = vpop.f32.mrf.mxu0  ;;  %v1724_v49 = vpop.f32.mrf.mxu1  ;;  %v6074_v1 = vld [vmem:[#allocation2 + $0x408] sm:$0xf]  ;;  %v8435_v2 = vld [vmem:[#allocation2 + $0x414] sm:$0xf0] }
  0xc6   :  { %2003 = vmatpush.bf16.msrb.mxu3 %v6539_v8  ;;  %v1712_v48 = vadd.f32 %v1711_v46, %v386_v30  ;;  %v6202_v8 = vld [vmem:[#allocation2 + $0x508] sm:$0xf]  ;;  %v8429_v30 = vld [vmem:[#allocation2 + $0x3ec] sm:$0xf]  ;;  %v5788_v46 = vld [vmem:[#allocation2 + $0x1d8] sm:$0xf0] }
  0xc7   :  { %1965 = vmatpush.bf16.msrb.mxu0 %v6139_v14  ;;  %v8531_v14 = vld [vmem:[#allocation2 + $0x714] sm:$0xf0]  ;;  %v6203_v28 = vor.u32 %v8467_v9, %v6202_v8  ;;  %v1752_v35 = vpop.f32.mrf.mxu3  ;;  %v5791_v52 = vor.u32 %v8361_v43, %v5788_v46  ;;  %v5756_v8 = vld [vmem:[#allocation2 + $0x198] sm:$0xf0]  ;;  %v8385_v9 = vld [vmem:[#allocation2 + $0x28c] sm:$0xf] }
  0xc8   :  { %v1725_v60 = vadd.f32 %v1724_v49, %v1712_v48  ;;  %v6459_v33 = vor.u32 %v8531_v14, %v6458_v13  ;;  %v5916_v48 = vld [vmem:[#allocation2 + $0x2d8] sm:$0xf0]  ;;  %v8425_v49 = vld [vmem:[#allocation2 + $0x3cc] sm:$0xf] }
  0xc9   :  { %1978 = vmatpush.bf16.msrb.mxu1 %v6267_v16  ;;  %1991 = vmatpush.bf16.msrb.mxu2 %v6395_v17  ;;  %v8333_v16 = vld [vmem:[#allocation2 + $0xec] sm:$0xf]  ;;  %v5676_v17 = vld [vmem:[#allocation2 + $0xf8] sm:$0xf0] }
  0xca   :  { %2004 = vmatpush.bf16.msrb.mxu3 %v6523_v23  ;;  %v1738_v3 = vadd.f32 %v1737_v55, %v1725_v60  ;;  %v6075_v23 = vor.u32 %v8435_v2, %v6074_v1  ;;  %v5679_v34 = vor.u32 %v8333_v16, %v5676_v17  ;;  %v5644_v55 = vld [vmem:[#allocation2 + $0xb8] sm:$0xf0]  ;;  %v8321_v2 = vld [vmem:[#allocation2 + $0x8c] sm:$0xf] }
  0xcb   :  { %1966 = vmatpush.bf16.msrb.mxu0 %v6123_v29  ;;  %v6331_v29 = vor.u32 %v8499_v12, %v6330_v10  ;;  %v5900_v60 = vld [vmem:[#allocation2 + $0x2b8] sm:$0xf0]  ;;  %v5647_v63 = vor.u32 %v8325_v54, %v5644_v55 }
  0xcc   :  { %v9306_v15 = vadd.f32 %v1750_v61, %v1738_v3  ;;  %v8421_v61 = vld [vmem:[#allocation2 + $0x3ac] sm:$0xf]  ;;  %v5903_v1 = vor.u32 %v8389_v59, %v5900_v60  ;;  %v5628_v3 = vld [vmem:[#allocation2 + $0x98] sm:$0xf0] }
  0xcd   :  { %1979 = vmatpush.bf16.msrb.mxu1 %v6251_v31  ;;  %1992 = vmatpush.bf16.msrb.mxu2 %v6379_v32  ;;  %v1713_v19 = vpop.f32.mrf.mxu0  ;;  %v1726_v27 = vpop.f32.mrf.mxu1  ;;  %v6060_v31 = vld [vmem:[#allocation2 + $0x3f8] sm:$0xf0]  ;;  %v5631_v13 = vor.u32 %v8321_v2, %v5628_v3  ;;  %v8305_v3 = vld [vmem:[#allocation2 + $0xc] sm:$0xf] }
  0xce   :  { %2005 = vmatpush.bf16.msrb.mxu3 %v6507_v36  ;;  %v1739_v32 = vpop.f32.mrf.mxu2  ;;  %v5807_v36 = vor.u32 %v8365_v18, %v5804_v24  ;;  %v6063_v45 = vor.u32 %v8429_v30, %v6060_v31  ;;  %v5884_v10 = vld [vmem:[#allocation2 + $0x298] sm:$0xf0]  ;;  %v8317_v18 = vld [vmem:[#allocation2 + $0x6c] sm:$0xf] }
  0xcf   :  { %1967 = vmatpush.bf16.msrb.mxu0 %v6107_v47  ;;  %v8393_v47 = vld [vmem:[#allocation2 + $0x2cc] sm:$0xf]  ;;  %v6012_v12 = vld [vmem:[#allocation2 + $0x398] sm:$0xf0]  ;;  %v5887_v17 = vor.u32 %v8385_v9, %v5884_v10 }
  0xd0   :  { %v5919_v53 = vor.u32 %v8393_v47, %v5916_v48  ;;  %v5612_v19 = vld [vmem:[#allocation2 + $0x78] sm:$0xf0]  ;;  %v8413_v30 = vld [vmem:[#allocation2 + $0x36c] sm:$0xf] }
  0xd1   :  { %1980 = vmatpush.bf16.msrb.mxu1 %v6235_v50  ;;  %1993 = vmatpush.bf16.msrb.mxu2 %v6363_v51  ;;  %v6044_v50 = vld [vmem:[#allocation2 + $0x3d8] sm:$0xf0]  ;;  %v5663_v51 = vor.u32 %v8329_v39, %v5660_v40  ;;  %v8345_v39 = vld [vmem:[#allocation2 + $0x14c] sm:$0xf] }
  0xd2   :  { %2006 = vmatpush.bf16.msrb.mxu3 %v6491_v56  ;;  %v8357_v56 = vld [vmem:[#allocation2 + $0x1ac] sm:$0xf]  ;;  %v6047_v57 = vor.u32 %v8425_v49, %v6044_v50  ;;  %v5740_v27 = vld [vmem:[#allocation2 + $0x178] sm:$0xf0] }
  0xd3   :  { %1968 = vmatpush.bf16.msrb.mxu0 %v6091_v0  ;;  %v5775_v0 = vor.u32 %v8357_v56, %v5772_v58  ;;  %v5996_v31 = vld [vmem:[#allocation2 + $0x378] sm:$0xf0]  ;;  %v8409_v49 = vld [vmem:[#allocation2 + $0x34c] sm:$0xf] }
  0xd4   :  { %v5724_v43 = vld [vmem:[#allocation2 + $0x158] sm:$0xf0]  ;;  %v8309_v56 = vld [vmem:[#allocation2 + $0x2c] sm:$0xf] }
  0xd5   :  { %1981 = vmatpush.bf16.msrb.mxu1 %v6219_v5  ;;  %1994 = vmatpush.bf16.msrb.mxu2 %v6347_v7  ;;  %v8353_v5 = vld [vmem:[#allocation2 + $0x18c] sm:$0xf]  ;;  %v6031_v7 = vor.u32 %v8421_v61, %v6028_v62  ;;  %v5852_v46 = vld [vmem:[#allocation2 + $0x258] sm:$0xf0]  ;;  %v5727_v54 = vor.u32 %v8345_v39, %v5724_v43 }
  0xd6   :  { %2007 = vmatpush.bf16.msrb.mxu3 %v6475_v11  ;;  %v8417_v11 = vld [vmem:[#allocation2 + $0x38c] sm:$0xf]  ;;  %v5759_v16 = vor.u32 %v8353_v5, %v5756_v8  ;;  %v5980_v50 = vld [vmem:[#allocation2 + $0x358] sm:$0xf0] }
  0xd7   :  { %1969 = vmatpush.bf16.msrb.mxu0 %v6075_v23  ;;  %v8349_v23 = vld [vmem:[#allocation2 + $0x16c] sm:$0xf]  ;;  %v6015_v26 = vor.u32 %v8417_v11, %v6012_v12  ;;  %v5983_v60 = vor.u32 %v8409_v49, %v5980_v50  ;;  %v5708_v61 = vld [vmem:[#allocation2 + $0x138] sm:$0xf0] }
  0xd8   :  { %v8341_v58 = vld [vmem:[#allocation2 + $0x12c] sm:$0xf]  ;;  %v5564_v5 = vld [vmem:[#allocation2 + $0x18] sm:$0xf0] }
  0xd9   :  { %1982 = vmatpush.bf16.msrb.mxu1 %v6203_v28  ;;  %1995 = vmatpush.bf16.msrb.mxu2 %v6331_v29  ;;  %v1763_v14 = vpop.f32.mrf.mxu0  ;;  %v8381_v28 = vld [vmem:[#allocation2 + $0x26c] sm:$0xf]  ;;  %v5868_v29 = vld [vmem:[#allocation2 + $0x278] sm:$0xf0] }
  0xda   :  { %2008 = vmatpush.bf16.msrb.mxu3 %v6459_v33  ;;  %1970 = vmatmul.bf16.vlgmr.msrb.gmra.mxu0 %v9278_v41  ;;  %v1764_v24 = vadd.f32 %v1763_v14, %v9306_v15  ;;  %v5615_v33 = vor.u32 %v8317_v18, %v5612_v19  ;;  %v5871_v35 = vor.u32 %v8381_v28, %v5868_v29  ;;  %v8373_v62 = vld [vmem:[#allocation2 + $0x22c] sm:$0xf]  ;;  %v5692_v10 = vld [vmem:[#allocation2 + $0x118] sm:$0xf0] }
  0xdb   :  { %2014 = vmatpush.bf16.msra.mxu0 %v5679_v34  ;;  %v1776_v25 = vpop.f32.mrf.mxu1  ;;  %v5743_v34 = vor.u32 %v8349_v23, %v5740_v27  ;;  %v5999_v15 = vor.u32 %v8413_v30, %v5996_v31  ;;  %v8337_v9 = vld [vmem:[#allocation2 + $0x10c] sm:$0xf]  ;;  %v5820_v14 = vld [vmem:[#allocation2 + $0x218] sm:$0xf0] }
  0xdc   :  { %1996 = vmatmul.bf16.vlgmr.msrb.gmra.mxu2 %v9276_v38  ;;  %1983 = vmatmul.bf16.vlgmr.msrb.gmra.mxu1 %v9282_v44  ;;  %v1777_v32 = vadd.f32 %v1776_v25, %v1764_v24  ;;  %v8369_v11 = vld [vmem:[#allocation2 + $0x20c] sm:$0xf]  ;;  %v6188_v23 = vld [vmem:[#allocation2 + $0x4f8] sm:$0xf0]  ;;  %v5567_v25 = vor.u32 %v8305_v3, %v5564_v5  ;;  %v5695_v29 = vor.u32 %v8337_v9, %v5692_v10 }
  0xdd   :  { %2027 = vmatpush.bf16.msra.mxu1 %v5807_v36  ;;  %2040 = vmatpush.bf16.msra.mxu2 %v5935_v37  ;;  %v8313_v36 = vld [vmem:[#allocation2 + $0x4c] sm:$0xf]  ;;  %v5596_v37 = vld [vmem:[#allocation2 + $0x58] sm:$0xf0]  ;;  %v5823_v30 = vor.u32 %v8369_v11, %v5820_v14 }
  0xde   :  { %2053 = vmatpush.bf16.msra.mxu3 %v6063_v45  ;;  %v8377_v45 = vld [vmem:[#allocation2 + $0x24c] sm:$0xf]  ;;  %v6444_v28 = vld [vmem:[#allocation2 + $0x6f8] sm:$0xf0] }
  0xdf   :  { %2009 = vmatmul.bf16.vlgmr.msrb.gmra.mxu3 %v9280_v42  ;;  %2015 = vmatpush.bf16.msra.mxu0 %v5663_v51  ;;  %v1789_v40 = vpop.f32.mrf.mxu2  ;;  %v5599_v51 = vor.u32 %v8313_v36, %v5596_v37  ;;  %v5855_v55 = vor.u32 %v8377_v45, %v5852_v46  ;;  %v8461_v19 = vld [vmem:[#allocation2 + $0x4ec] sm:$0xf]  ;;  %v6172_v39 = vld [vmem:[#allocation2 + $0x4d8] sm:$0xf0] }
  0xe0   :  { %v1790_v47 = vadd.f32 %v1789_v40, %v1777_v32  ;;  %v8493_v24 = vld [vmem:[#allocation2 + $0x5ec] sm:$0xf]  ;;  %v6572_v32 = vld [vmem:[#allocation2 + $0x7f8] sm:$0xf0] }
  0xe1   :  { %2028 = vmatpush.bf16.msra.mxu1 %v5791_v52  ;;  %2041 = vmatpush.bf16.msra.mxu2 %v5919_v53  ;;  %v1765_v53 = vpop.f32.mrf.mxu0  ;;  %v8525_v27 = vld [vmem:[#allocation2 + $0x6ec] sm:$0xf]  ;;  %v6300_v43 = vld [vmem:[#allocation2 + $0x5d8] sm:$0xf0] }
  0xe2   :  { %2054 = vmatpush.bf16.msra.mxu3 %v6047_v57  ;;  %v1802_v48 = vpop.f32.mrf.mxu3  ;;  %v5580_v57 = vld [vmem:[#allocation2 + $0x38] sm:$0xf0]  ;;  %v8557_v31 = vld [vmem:[#allocation2 + $0x7ec] sm:$0xf]  ;;  %v6447_v36 = vor.u32 %v8525_v27, %v6444_v28 }
  0xe3   :  { %2016 = vmatpush.bf16.msra.mxu0 %v5647_v63  ;;  %v9313_v52 = vadd.f32 %v1802_v48, %v1790_v47  ;;  %v1778_v59 = vpop.f32.mrf.mxu1  ;;  %v5836_v63 = vld [vmem:[#allocation2 + $0x238] sm:$0xf0]  ;;  %v5583_v2 = vor.u32 %v8309_v56, %v5580_v57  ;;  %v8457_v37 = vld [vmem:[#allocation2 + $0x4cc] sm:$0xf] }
  0xe4   :  { %v5839_v8 = vor.u32 %v8373_v62, %v5836_v63  ;;  %v8489_v40 = vld [vmem:[#allocation2 + $0x5cc] sm:$0xf]  ;;  %v6428_v46 = vld [vmem:[#allocation2 + $0x6d8] sm:$0xf0]  ;;  %v6175_v49 = vor.u32 %v8457_v37, %v6172_v39 }
  0xe5   :  { %2029 = vmatpush.bf16.msra.mxu1 %v5775_v0  ;;  %2042 = vmatpush.bf16.msra.mxu2 %v5903_v1  ;;  %v8405_v0 = vld [vmem:[#allocation2 + $0x32c] sm:$0xf]  ;;  %v5964_v1 = vld [vmem:[#allocation2 + $0x338] sm:$0xf0]  ;;  %v6303_v50 = vor.u32 %v8489_v40, %v6300_v43  ;;  %vm2118_vm1 = vcmp.gt.f32.partialorder %v9313_v52, 0.0 }
  0xe6   :  { %2055 = vmatpush.bf16.msra.mxu3 %v6031_v7  ;;  %v5711_v7 = vor.u32 %v8341_v58, %v5708_v61  ;;  %v8521_v45 = vld [vmem:[#allocation2 + $0x6cc] sm:$0xf]  ;;  %v6556_v48 = vld [vmem:[#allocation2 + $0x7d8] sm:$0xf0] }
  0xe7   :  { %2017 = vmatpush.bf16.msra.mxu0 %v5631_v13  ;;  %v1791_v12 = vpop.f32.mrf.mxu2  ;;  %v5967_v13 = vor.u32 %v8405_v0, %v5964_v1  ;;  %v8553_v47 = vld [vmem:[#allocation2 + $0x7cc] sm:$0xf]  ;;  %v6284_v57 = vld [vmem:[#allocation2 + $0x5b8] sm:$0xf0] }
  0xe8   :  { %v8453_v53 = vld [vmem:[#allocation2 + $0x4ac] sm:$0xf]  ;;  %v6559_v56 = vor.u32 %v8553_v47, %v6556_v48  ;;  %v6412_v59 = vld [vmem:[#allocation2 + $0x6b8] sm:$0xf0] }
  0xe9   :  { %2030 = vmatpush.bf16.msra.mxu1 %v5759_v16  ;;  %2043 = vmatpush.bf16.msra.mxu2 %v5887_v17  ;;  %v8401_v16 = vld [vmem:[#allocation2 + $0x30c] sm:$0xf]  ;;  %v5948_v17 = vld [vmem:[#allocation2 + $0x318] sm:$0xf0] }
  0xea   :  { %2056 = vmatpush.bf16.msra.mxu3 %v6015_v26  ;;  %v1804_v18 = vpop.f32.mrf.mxu3  ;;  %v6316_v26 = vld [vmem:[#allocation2 + $0x5f8] sm:$0xf0]  ;;  %v8517_v58 = vld [vmem:[#allocation2 + $0x6ac] sm:$0xf] }
  0xeb   :  { %2018 = vmatpush.bf16.msra.mxu0 %v5615_v33  ;;  %v5951_v33 = vor.u32 %v8401_v16, %v5948_v17  ;;  %v6540_v61 = vld [vmem:[#allocation2 + $0x7b8] sm:$0xf0]  ;;  %v6415_v0 = vor.u32 %v8517_v58, %v6412_v59  ;;  %v8449_v1 = vld [vmem:[#allocation2 + $0x48c] sm:$0xf]  ;;  %v387_v58 = vperm.slane %v9303_v22, 1 }
  0xec   :  { %v6268_v5 = vld [vmem:[#allocation2 + $0x598] sm:$0xf0]  ;;  %v8545_v9 = vld [vmem:[#allocation2 + $0x78c] sm:$0xf]  ;;  %v8575_v22 = vld [vmem:[#allocation4 + $0x74] sm:$0xf0] }
  0xed   :  { %2031 = vmatpush.bf16.msra.mxu1 %v5743_v34  ;;  %2044 = vmatpush.bf16.msra.mxu2 %v5871_v35  ;;  %v6191_v34 = vor.u32 %v8461_v19, %v6188_v23  ;;  %v6319_v35 = vor.u32 %v8493_v24, %v6316_v26  ;;  %v8445_v12 = vld [vmem:[#allocation2 + $0x46c] sm:$0xf]  ;;  %v6252_v18 = vld [vmem:[#allocation2 + $0x578] sm:$0xf0] }
  0xee   :  { %2057 = vmatpush.bf16.msra.mxu3 %v5999_v15  ;;  %v6575_v15 = vor.u32 %v8557_v31, %v6572_v32  ;;  %v8477_v14 = vld [vmem:[#allocation2 + $0x56c] sm:$0xf]  ;;  %v6380_v23 = vld [vmem:[#allocation2 + $0x678] sm:$0xf0] }
  0xef   :  { %2019 = vmatpush.bf16.msra.mxu0 %v5599_v51  ;;  %v6431_v51 = vor.u32 %v8521_v45, %v6428_v46  ;;  %v8509_v19 = vld [vmem:[#allocation2 + $0x66c] sm:$0xf]  ;;  %v6255_v27 = vor.u32 %v8477_v14, %v6252_v18  ;;  %v6492_v40 = vld [vmem:[#allocation2 + $0x758] sm:$0xf0] }
  0xf0   :  { %v8541_v24 = vld [vmem:[#allocation2 + $0x76c] sm:$0xf]  ;;  %v6383_v28 = vor.u32 %v8509_v19, %v6380_v23  ;;  %v6092_v48 = vld [vmem:[#allocation2 + $0x438] sm:$0xf0] }
  0xf1   :  { %2032 = vmatpush.bf16.msra.mxu1 %v5727_v54  ;;  %2045 = vmatpush.bf16.msra.mxu2 %v5855_v55  ;;  %v6156_v54 = vld [vmem:[#allocation2 + $0x4b8] sm:$0xf0]  ;;  %v8485_v55 = vld [vmem:[#allocation2 + $0x5ac] sm:$0xf] }
  0xf2   :  { %2058 = vmatpush.bf16.msra.mxu3 %v5983_v60  ;;  %v8549_v60 = vld [vmem:[#allocation2 + $0x7ac] sm:$0xf]  ;;  %v6159_v62 = vor.u32 %v8453_v53, %v6156_v54  ;;  %v6287_v63 = vor.u32 %v8485_v55, %v6284_v57  ;;  %v6220_v53 = vld [vmem:[#allocation2 + $0x538] sm:$0xf0] }
  0xf3   :  { %2020 = vmatpush.bf16.msra.mxu0 %v5583_v2  ;;  %v6140_v2 = vld [vmem:[#allocation2 + $0x498] sm:$0xf0]  ;;  %v6543_v3 = vor.u32 %v8549_v60, %v6540_v61  ;;  %v8473_v31 = vld [vmem:[#allocation2 + $0x54c] sm:$0xf] }
  0xf4   :  { %v8537_v39 = vld [vmem:[#allocation2 + $0x74c] sm:$0xf]  ;;  %v6348_v55 = vld [vmem:[#allocation2 + $0x638] sm:$0xf0] }
  0xf5   :  { %2033 = vmatpush.bf16.msra.mxu1 %v5711_v7  ;;  %2046 = vmatpush.bf16.msra.mxu2 %v5839_v8  ;;  %v8513_v7 = vld [vmem:[#allocation2 + $0x68c] sm:$0xf]  ;;  %v6396_v8 = vld [vmem:[#allocation2 + $0x698] sm:$0xf0] }
  0xf6   :  { %2059 = vmatpush.bf16.msra.mxu3 %v5967_v13  ;;  %v6399_v11 = vor.u32 %v8513_v7, %v6396_v8  ;;  %v6124_v13 = vld [vmem:[#allocation2 + $0x478] sm:$0xf0]  ;;  %v8437_v47 = vld [vmem:[#allocation2 + $0x42c] sm:$0xf] }
  0xf7   :  { %2021 = vmatpush.bf16.msra.mxu0 %v5567_v25  ;;  %v9319_v10 = vpop.f32.mrf.mxu0  ;;  %v6508_v25 = vld [vmem:[#allocation2 + $0x778] sm:$0xf0]  ;;  %v6127_v26 = vor.u32 %v8445_v12, %v6124_v13  ;;  %v8501_v54 = vld [vmem:[#allocation2 + $0x62c] sm:$0xf]  ;;  %v6095_v59 = vor.u32 %v8437_v47, %v6092_v48  ;;  %v8591_v12 = vld [vmem:[#allocation4 + $0xf4] sm:$0xf0] }
  0xf8   :  { %v6476_v57 = vld [vmem:[#allocation2 + $0x738] sm:$0xf0]  ;;  %v8433_v60 = vld [vmem:[#allocation2 + $0x40c] sm:$0xf]  ;;  %v6602_v47 = vld [vmem:[#allocation4 + $0x30] sm:$0xf] }
  0xf9   :  { %2034 = vmatpush.bf16.msra.mxu1 %v5695_v29  ;;  %2047 = vmatpush.bf16.msra.mxu2 %v5823_v30  ;;  %v9321_v16 = vpop.f32.mrf.mxu1  ;;  %v8441_v29 = vld [vmem:[#allocation2 + $0x44c] sm:$0xf]  ;;  %v6108_v30 = vld [vmem:[#allocation2 + $0x458] sm:$0xf0]  ;;  %v6666_v48 = vld [vmem:[#allocation4 + $0xb0] sm:$0xf] }
  0xfa   :  { %2060 = vmatpush.bf16.msra.mxu3 %v5951_v33  ;;  %2022 = vmatmul.bf16.vlgmr.msra.gmra.mxu0 %v9263_v20  ;;  %v6524_v20 = vld [vmem:[#allocation2 + $0x798] sm:$0xf0]  ;;  %v6511_v33 = vor.u32 %v8541_v24, %v6508_v25  ;;  %v8529_v7 = vld [vmem:[#allocation2 + $0x70c] sm:$0xf]  ;;  %v6626_v24 = vld [vmem:[#allocation4 + $0x60] sm:$0xf] }
  0xfb   :  { %2066 = vmatpush.bf16.msrb.mxu0 %v6191_v34  ;;  %v6527_v17 = vor.u32 %v8545_v9, %v6524_v20  ;;  %v6236_v34 = vld [vmem:[#allocation2 + $0x558] sm:$0xf0]  ;;  %v6634_v20 = vld [vmem:[#allocation4 + $0x70] sm:$0xf]  ;;  %v8573_v25 = vld [vmem:[#allocation4 + $0x64] sm:$0xf0] }
  0xfc   :  { %2048 = vmatmul.bf16.vlgmr.msra.gmra.mxu2 %v9255_v4  ;;  %2035 = vmatmul.bf16.vlgmr.msra.gmra.mxu1 %v9266_v21  ;;  %v8481_v4 = vld [vmem:[#allocation2 + $0x58c] sm:$0xf]  ;;  %v6239_v45 = vor.u32 %v8473_v31, %v6236_v34  ;;  %v6460_v9 = vld [vmem:[#allocation2 + $0x718] sm:$0xf0]  ;;  %v6635_v18 = vor.u32 %v8575_v22, %v6634_v20  ;;  %v8571_v31 = vld [vmem:[#allocation4 + $0x54] sm:$0xf0] }
  0xfd   :  { %2079 = vmatpush.bf16.msrb.mxu1 %v6319_v35  ;;  %2092 = vmatpush.bf16.msrb.mxu2 %v6447_v36  ;;  %v6271_v21 = vor.u32 %v8481_v4, %v6268_v5  ;;  %v8505_v35 = vld [vmem:[#allocation2 + $0x64c] sm:$0xf]  ;;  %v6364_v36 = vld [vmem:[#allocation2 + $0x658] sm:$0xf0]  ;;  %v8563_v20 = vld [vmem:[#allocation4 + $0x14] sm:$0xf0] }
  0xfe   :  { %2105 = vmatpush.bf16.msrb.mxu3 %v6575_v15  ;;  %v6111_v15 = vor.u32 %v8441_v29, %v6108_v30  ;;  %v6367_v46 = vor.u32 %v8505_v35, %v6364_v36  ;;  %v6332_v5 = vld [vmem:[#allocation2 + $0x618] sm:$0xf0]  ;;  %v6618_v30 = vld [vmem:[#allocation4 + $0x50] sm:$0xf] }
  0xff   :  { %2061 = vmatmul.bf16.vlgmr.msra.gmra.mxu3 %v9260_v6  ;;  %2067 = vmatpush.bf16.msrb.mxu0 %v6175_v49  ;;  %v6143_v6 = vor.u32 %v8449_v1, %v6140_v2  ;;  %v9323_v32 = vpop.f32.mrf.mxu2  ;;  %v1817_v43 = vpop.f32.mrf.mxu0  ;;  %v8469_v49 = vld [vmem:[#allocation2 + $0x52c] sm:$0xf]  ;;  %v6204_v1 = vld [vmem:[#allocation2 + $0x518] sm:$0xf0]  ;;  %v6619_v34 = vor.u32 %v8571_v31, %v6618_v30  ;;  %v6730_v30 = vld [vmem:[#allocation4 + $0x130] sm:$0xf] }
 0x100   :  { %v6223_v61 = vor.u32 %v8469_v49, %v6220_v53  ;;  %v8607_v43 = vld [vmem:[#allocation4 + $0x174] sm:$0xf0]  ;;  %v8605_v53 = vld [vmem:[#allocation4 + $0x164] sm:$0xf0] }
 0x101   :  { %2080 = vmatpush.bf16.msrb.mxu1 %v6303_v50  ;;  %2093 = vmatpush.bf16.msrb.mxu2 %v6431_v51  ;;  %v1830_v50 = vpop.f32.mrf.mxu1  ;;  %v6495_v51 = vor.u32 %v8537_v39, %v6492_v40  ;;  %v8569_v39 = vld [vmem:[#allocation4 + $0x44] sm:$0xf0]  ;;  %v6674_v40 = vld [vmem:[#allocation4 + $0xc0] sm:$0xf]  ;;  %v8599_v31 = vld [vmem:[#allocation4 + $0x134] sm:$0xf0] }
 0x102   :  { %2106 = vmatpush.bf16.msrb.mxu3 %v6559_v56  ;;  %v9325_v37 = vpop.f32.mrf.mxu3  ;;  %v8533_v56 = vld [vmem:[#allocation2 + $0x72c] sm:$0xf] }
 0x103   :  { %2068 = vmatpush.bf16.msrb.mxu0 %v6159_v62  ;;  %v6351_v62 = vor.u32 %v8501_v54, %v6348_v55  ;;  %v6479_v4 = vor.u32 %v8533_v56, %v6476_v57 }
 0x105   :  { %2081 = vmatpush.bf16.msrb.mxu1 %v6287_v63  ;;  %2094 = vmatpush.bf16.msrb.mxu2 %v6415_v0  ;;  %v6076_v63 = vld [vmem:[#allocation2 + $0x418] sm:$0xf0]  ;;  %v8465_v0 = vld [vmem:[#allocation2 + $0x50c] sm:$0xf] }
 0x106   :  { %2107 = vmatpush.bf16.msrb.mxu3 %v6543_v3  ;;  %v8497_v3 = vld [vmem:[#allocation2 + $0x60c] sm:$0xf]  ;;  %v6207_v13 = vor.u32 %v8465_v0, %v6204_v1  ;;  %v6746_v1 = vld [vmem:[#allocation4 + $0x150] sm:$0xf] }
 0x107   :  { %2069 = vmatpush.bf16.msrb.mxu0 %v6143_v6  ;;  %v1843_v2 = vpop.f32.mrf.mxu2  ;;  %v1816_v6 = vadd.f32 %v9319_v10, %v387_v58  ;;  %v6335_v14 = vor.u32 %v8497_v3, %v6332_v5  ;;  %v6627_v10 = vor.u32 %v8573_v25, %v6626_v24  ;;  %v6594_v58 = vld [vmem:[#allocation4 + $0x20] sm:$0xf] }
 0x108   :  { %v8603_v2 = vld [vmem:[#allocation4 + $0x154] sm:$0xf0] }
 0x109   :  { %2082 = vmatpush.bf16.msrb.mxu1 %v6271_v21  ;;  %2095 = vmatpush.bf16.msrb.mxu2 %v6399_v11  ;;  %v6079_v21 = vor.u32 %v8433_v60, %v6076_v63  ;;  %v6698_v11 = vld [vmem:[#allocation4 + $0xf0] sm:$0xf]  ;;  %v1829_v23 = vadd.f32 %v9321_v16, %v1816_v6  ;;  %v6658_v60 = vld [vmem:[#allocation4 + $0xa0] sm:$0xf] }
 0x10a   :  { %2108 = vmatpush.bf16.msrb.mxu3 %v6527_v17  ;;  %v1856_v8 = vpop.f32.mrf.mxu3  ;;  %v6463_v17 = vor.u32 %v8529_v7, %v6460_v9  ;;  %v6699_v19 = vor.u32 %v8591_v12, %v6698_v11  ;;  %v6682_v16 = vld [vmem:[#allocation4 + $0xd0] sm:$0xf]  ;;  %v6738_v11 = vld [vmem:[#allocation4 + $0x140] sm:$0xf]  ;;  %v2122_v12 = vmul.f32 0.2, %v9313_v52 }
 0x10b   :  { %2070 = vmatpush.bf16.msrb.mxu0 %v6127_v26  ;;  %v6690_v26 = vld [vmem:[#allocation4 + $0xe0] sm:$0xf]  ;;  %v1842_v29 = vadd.f32 %v9323_v32, %v1829_v23  ;;  %v8585_v32 = vld [vmem:[#allocation4 + $0xc4] sm:$0xf0]  ;;  %v6586_v9 = vld [vmem:[#allocation4 + $0x10] sm:$0xf] }
 0x10c   :  { %v6650_v6 = vld [vmem:[#allocation4 + $0x90] sm:$0xf]  ;;  %v8577_v23 = vld [vmem:[#allocation4 + $0x84] sm:$0xf0] }
 0x10d   :  { %2083 = vmatpush.bf16.msrb.mxu1 %v6255_v27  ;;  %2096 = vmatpush.bf16.msrb.mxu2 %v6383_v28  ;;  %v8589_v27 = vld [vmem:[#allocation4 + $0xe4] sm:$0xf0]  ;;  %v1855_v35 = vadd.f32 %v9325_v37, %v1842_v29  ;;  %v8583_v37 = vld [vmem:[#allocation4 + $0xb4] sm:$0xf0] }
 0x10e   :  { %2109 = vmatpush.bf16.msrb.mxu3 %v6511_v33  ;;  %v6691_v28 = vor.u32 %v8589_v27, %v6690_v26  ;;  %v8587_v33 = vld [vmem:[#allocation4 + $0xd4] sm:$0xf0]  ;;  %v6667_v57 = vor.u32 %v8583_v37, %v6666_v48  ;;  %v8574_v27 = vld [vmem:[#allocation4 + $0x74] sm:$0xf] }
 0x10f   :  { %2071 = vmatpush.bf16.msrb.mxu0 %v6111_v15  ;;  %v6683_v36 = vor.u32 %v8587_v33, %v6682_v16  ;;  %v6762_v15 = vld [vmem:[#allocation4 + $0x170] sm:$0xf]  ;;  %v8590_v16 = vld [vmem:[#allocation4 + $0xf4] sm:$0xf]  ;;  %v6700_v33 = vld [vmem:[#allocation4 + $0xf8] sm:$0xf0] }
 0x110   :  { %v8595_v37 = vld [vmem:[#allocation4 + $0x114] sm:$0xf0] }
 0x111   :  { %2084 = vmatpush.bf16.msrb.mxu1 %v6239_v45  ;;  %2097 = vmatpush.bf16.msrb.mxu2 %v6367_v46  ;;  %v6763_v45 = vor.u32 %v8607_v43, %v6762_v15  ;;  %v6675_v46 = vor.u32 %v8585_v32, %v6674_v40  ;;  %v2126_v40 = vsel %vm2118_vm1, %v9313_v52, %v2122_v12  ;;  %v8572_v15 = vld [vmem:[#allocation4 + $0x64] sm:$0xf]  ;;  %v6628_v43 = vld [vmem:[#allocation4 + $0x68] sm:$0xf0] }
 0x112   :  { %2110 = vmatpush.bf16.msrb.mxu3 %v6495_v51  ;;  %v6754_v51 = vld [vmem:[#allocation4 + $0x160] sm:$0xf]  ;;  %v6703_v32 = vor.u32 %v8590_v16, %v6700_v33  ;;  %v9341_v48 = vpack.c.bf16 %v2126_v40, %v2126_v40  ;;  %v6756_v12 = vld [vmem:[#allocation4 + $0x168] sm:$0xf0]  ;;  %v6588_v16 = vld [vmem:[#allocation4 + $0x18] sm:$0xf0] }
 0x113   :  { %2072 = vmatpush.bf16.msrb.mxu0 %v6095_v59  ;;  %v6755_v55 = vor.u32 %v8605_v53, %v6754_v51  ;;  %v8565_v59 = vld [vmem:[#allocation4 + $0x24] sm:$0xf0]  ;;  %v8570_v51 = vld [vmem:[#allocation4 + $0x54] sm:$0xf]  ;;  %v6620_v53 = vld [vmem:[#allocation4 + $0x58] sm:$0xf0] }
 0x114   :  { %v6595_v3 = vor.u32 %v8565_v59, %v6594_v58  ;;  %v8593_v58 = vld [vmem:[#allocation4 + $0x104] sm:$0xf0]  ;;  %v8606_v59 = vld [vmem:[#allocation4 + $0x174] sm:$0xf] }
 0x115   :  { %2085 = vmatpush.bf16.msrb.mxu1 %v6223_v61  ;;  %2098 = vmatpush.bf16.msrb.mxu2 %v6351_v62  ;;  %v8581_v62 = vld [vmem:[#allocation4 + $0xa4] sm:$0xf0] }
 0x116   :  { %2111 = vmatpush.bf16.msrb.mxu3 %v6479_v4  ;;  %v6747_v4 = vor.u32 %v8603_v2, %v6746_v1  ;;  %v6659_v7 = vor.u32 %v8581_v62, %v6658_v60  ;;  %v6764_v60 = vld [vmem:[#allocation4 + $0x178] sm:$0xf0]  ;;  %v8584_v2 = vld [vmem:[#allocation4 + $0xc4] sm:$0xf] }
 0x117   :  { %2073 = vmatpush.bf16.msrb.mxu0 %v6079_v21  ;;  %v8579_v21 = vld [vmem:[#allocation4 + $0x94] sm:$0xf0] }
 0x118   :  { %v6651_v26 = vor.u32 %v8579_v21, %v6650_v6  ;;  %v6668_v6 = vld [vmem:[#allocation4 + $0xb8] sm:$0xf0] }
 0x119   :  { %2086 = vmatpush.bf16.msrb.mxu1 %v6207_v13  ;;  %2099 = vmatpush.bf16.msrb.mxu2 %v6335_v14  ;;  %v1880_v50 = vpop.f32.mrf.mxu1  ;;  %v6578_v13 = vld [vmem:[#allocation4] sm:$0xf]  ;;  %v8601_v14 = vld [vmem:[#allocation4 + $0x144] sm:$0xf0] }
 0x11a   :  { %2112 = vmatpush.bf16.msrb.mxu3 %v6463_v17  ;;  %2074 = vmatmul.bf16.vlgmr.msrb.gmra.mxu0 %v9278_v41  ;;  %v6610_v41 = vld [vmem:[#allocation4 + $0x40] sm:$0xf]  ;;  %v6587_v17 = vor.u32 %v8563_v20, %v6586_v9  ;;  %v6739_v24 = vor.u32 %v8601_v14, %v6738_v11  ;;  %v6604_v9 = vld [vmem:[#allocation4 + $0x38] sm:$0xf0]  ;;  %v8582_v20 = vld [vmem:[#allocation4 + $0xb4] sm:$0xf] }
 0x11b   :  { %2524 = vmatpush.bf16.msra.mxu0 %v6635_v18  ;;  %v8561_v18 = vld [vmem:[#allocation4 + $0x4] sm:$0xf0]  ;;  %v8604_v11 = vld [vmem:[#allocation4 + $0x164] sm:$0xf] }
 0x11c   :  { %2087 = vmatmul.bf16.vlgmr.msrb.gmra.mxu1 %v9282_v44  ;;  %2100 = vmatmul.bf16.vlgmr.msrb.gmra.mxu2 %v9276_v38  ;;  %v6611_v44 = vor.u32 %v8569_v39, %v6610_v41  ;;  %v1867_v38 = vpop.f32.mrf.mxu0 }
 0x11d   :  { %2537 = vmatpush.bf16.msra.mxu1 %v6699_v19  ;;  %2113 = vmatmul.bf16.vlgmr.msrb.gmra.mxu3 %v9280_v42  ;;  %v8567_v42 = vld [vmem:[#allocation4 + $0x34] sm:$0xf0]  ;;  %v1868_v49 = vadd.f32 %v1867_v38, %v1855_v35  ;;  %v6642_v19 = vld [vmem:[#allocation4 + $0x80] sm:$0xf]  ;;  %v6579_v35 = vor.u32 %v8561_v18, %v6578_v13  ;;  %v6759_v13 = vor.u32 %v8604_v11, %v6756_v12  ;;  %v8564_v18 = vld [vmem:[#allocation4 + $0x24] sm:$0xf] }
 0x11e   :  { %2550 = vmatpush.bf16.msra.mxu2 %v6763_v45  ;;  %v6603_v56 = vor.u32 %v8567_v42, %v6602_v47  ;;  %v6643_v41 = vor.u32 %v8577_v23, %v6642_v19  ;;  %v8588_v45 = vld [vmem:[#allocation4 + $0xe4] sm:$0xf]  ;;  %v6722_v38 = vld [vmem:[#allocation4 + $0x120] sm:$0xf]  ;;  %v6596_v19 = vld [vmem:[#allocation4 + $0x28] sm:$0xf0] }
 0x11f   :  { %2525 = vmatpush.bf16.msra.mxu0 %v6627_v10  ;;  %v1881_v54 = vadd.f32 %v1880_v50, %v1868_v49  ;;  %v1893_v61 = vpop.f32.mrf.mxu2  ;;  %v6636_v10 = vld [vmem:[#allocation4 + $0x78] sm:$0xf0]  ;;  %v6631_v49 = vor.u32 %v8572_v15, %v6628_v43  ;;  %v6714_v50 = vld [vmem:[#allocation4 + $0x110] sm:$0xf]  ;;  %v8580_v23 = vld [vmem:[#allocation4 + $0xa4] sm:$0xf] }
 0x120   :  { %v6639_v39 = vor.u32 %v8574_v27, %v6636_v10  ;;  %v8602_v27 = vld [vmem:[#allocation4 + $0x154] sm:$0xf]  ;;  %v6748_v10 = vld [vmem:[#allocation4 + $0x158] sm:$0xf0]  ;;  %v6810_v11 = vld [vmem:[#allocation4 + $0x1d0] sm:$0xf] }
 0x121   :  { %2538 = vmatpush.bf16.msra.mxu1 %v6691_v28  ;;  %v1894_v63 = vadd.f32 %v1893_v61, %v1881_v54  ;;  %v1882_v22 = vpop.f32.mrf.mxu1  ;;  %v8586_v54 = vld [vmem:[#allocation4 + $0xd4] sm:$0xf]  ;;  %v6623_v61 = vor.u32 %v8570_v51, %v6620_v53  ;;  %v8596_v53 = vld [vmem:[#allocation4 + $0x124] sm:$0xf]  ;;  %v8619_v12 = vld [vmem:[#allocation4 + $0x1d4] sm:$0xf0] }
 0x122   :  { %2551 = vmatpush.bf16.msra.mxu2 %v6755_v55  ;;  %v1906_v0 = vpop.f32.mrf.mxu3  ;;  %v6715_v55 = vor.u32 %v8595_v37, %v6714_v50  ;;  %v8598_v50 = vld [vmem:[#allocation4 + $0x134] sm:$0xf]  ;;  %v6732_v37 = vld [vmem:[#allocation4 + $0x138] sm:$0xf0] }
 0x123   :  { %2526 = vmatpush.bf16.msra.mxu0 %v6619_v34  ;;  %v1907_v8 = vadd.f32 %v1906_v0, %v1894_v63  ;;  %v6731_v34 = vor.u32 %v8599_v31, %v6730_v30  ;;  %v8568_v63 = vld [vmem:[#allocation4 + $0x44] sm:$0xf]  ;;  %v6612_v0 = vld [vmem:[#allocation4 + $0x48] sm:$0xf0]  ;;  %v8562_v31 = vld [vmem:[#allocation4 + $0x14] sm:$0xf]  ;;  %v6735_v51 = vor.u32 %v8598_v50, %v6732_v37 }
 0x124   :  { %v1869_v5 = vpop.f32.mrf.mxu0  ;;  %v6591_v40 = vor.u32 %v8562_v31, %v6588_v16  ;;  %v6786_v31 = vld [vmem:[#allocation4 + $0x1a0] sm:$0xf]  ;;  %v8613_v16 = vld [vmem:[#allocation4 + $0x1a4] sm:$0xf0] }
 0x125   :  { %2539 = vmatpush.bf16.msra.mxu1 %v6683_v36  ;;  %v2123_v25 = vmul.f32 0.2, %v1907_v8  ;;  %vm2119_vm0 = vcmp.gt.f32.partialorder %v1907_v8, 0.0  ;;  %v6615_v5 = vor.u32 %v8568_v63, %v6612_v0  ;;  %v6716_v63 = vld [vmem:[#allocation4 + $0x118] sm:$0xf0] }
 0x126   :  { %2552 = vmatpush.bf16.msra.mxu2 %v6747_v4  ;;  %v6676_v4 = vld [vmem:[#allocation4 + $0xc8] sm:$0xf0] }
 0x127   :  { %2527 = vmatpush.bf16.msra.mxu0 %v6611_v44  ;;  %v1895_v28 = vpop.f32.mrf.mxu2  ;;  %v2127_v36 = vsel %vm2119_vm0, %v1907_v8, %v2123_v25  ;;  %v6692_v44 = vld [vmem:[#allocation4 + $0xe8] sm:$0xf0]  ;;  %v8566_v8 = vld [vmem:[#allocation4 + $0x34] sm:$0xf] }
 0x128   :  { %v9339_v47 = vpack.c.bf16 %v2127_v36, %v2127_v36  ;;  %v6695_v52 = vor.u32 %v8588_v45, %v6692_v44  ;;  %v6607_v14 = vor.u32 %v8566_v8, %v6604_v9  ;;  %v6599_v28 = vor.u32 %v8564_v18, %v6596_v19  ;;  %v8560_v44 = vld [vmem:[#allocation4 + $0x4] sm:$0xf]  ;;  %v6818_v8 = vld [vmem:[#allocation4 + $0x1e0] sm:$0xf]  ;;  %v8621_v9 = vld [vmem:[#allocation4 + $0x1e4] sm:$0xf0] }
 0x129   :  { %2540 = vmatpush.bf16.msra.mxu1 %v6675_v46  ;;  %v8597_v46 = vld [vmem:[#allocation4 + $0x124] sm:$0xf0] }
 0x12a   :  { %v1908_v29 = vpop.f32.mrf.mxu3  ;;  %2553 = vmatpush.bf16.msra.mxu2 %v6739_v24  ;;  %v6723_v42 = vor.u32 %v8597_v46, %v6722_v38  ;;  %v6660_v24 = vld [vmem:[#allocation4 + $0xa8] sm:$0xf0]  ;;  %v8576_v46 = vld [vmem:[#allocation4 + $0x84] sm:$0xf]  ;;  %v8617_v19 = vld [vmem:[#allocation4 + $0x1c4] sm:$0xf0] }
 0x12b   :  { %2528 = vmatpush.bf16.msra.mxu0 %v6603_v56  ;;  %v6684_v56 = vld [vmem:[#allocation4 + $0xd8] sm:$0xf0]  ;;  %v6751_v29 = vor.u32 %v8602_v27, %v6748_v10  ;;  %v6663_v30 = vor.u32 %v8580_v23, %v6660_v24  ;;  %v6580_v38 = vld [vmem:[#allocation4 + $0x8] sm:$0xf0]  ;;  %v6794_v24 = vld [vmem:[#allocation4 + $0x1b0] sm:$0xf] }
 0x12c   :  { %v6687_v62 = vor.u32 %v8586_v54, %v6684_v56  ;;  %v6724_v54 = vld [vmem:[#allocation4 + $0x128] sm:$0xf0]  ;;  %v6583_v56 = vor.u32 %v8560_v44, %v6580_v38  ;;  %v8622_v44 = vld [vmem:[#allocation4 + $0x1f4] sm:$0xf]  ;;  %v6828_v38 = vld [vmem:[#allocation4 + $0x1f8] sm:$0xf0] }
 0x12d   :  { %2541 = vmatpush.bf16.msra.mxu1 %v6667_v57  ;;  %v6706_v57 = vld [vmem:[#allocation4 + $0x100] sm:$0xf] }
 0x12e   :  { %2554 = vmatpush.bf16.msra.mxu2 %v6731_v34  ;;  %v6707_v1 = vor.u32 %v8593_v58, %v6706_v57  ;;  %v8578_v34 = vld [vmem:[#allocation4 + $0x94] sm:$0xf]  ;;  %v6826_v57 = vld [vmem:[#allocation4 + $0x1f0] sm:$0xf] }
 0x12f   :  { %2529 = vmatpush.bf16.msra.mxu0 %v6595_v3  ;;  %v6767_v3 = vor.u32 %v8606_v59, %v6764_v60  ;;  %v8623_v59 = vld [vmem:[#allocation4 + $0x1f4] sm:$0xf0]  ;;  %v6727_v60 = vor.u32 %v8596_v53, %v6724_v54  ;;  %v6812_v53 = vld [vmem:[#allocation4 + $0x1d8] sm:$0xf0] }
 0x131   :  { %2542 = vmatpush.bf16.msra.mxu1 %v6659_v7  ;;  %v6679_v7 = vor.u32 %v8584_v2, %v6676_v4  ;;  %v8592_v2 = vld [vmem:[#allocation4 + $0x104] sm:$0xf]  ;;  %v6708_v4 = vld [vmem:[#allocation4 + $0x108] sm:$0xf0] }
 0x132   :  { %2555 = vmatpush.bf16.msra.mxu2 %v6723_v42  ;;  %v6644_v42 = vld [vmem:[#allocation4 + $0x88] sm:$0xf0] }
 0x133   :  { %2530 = vmatpush.bf16.msra.mxu0 %v6587_v17  ;;  %v6671_v17 = vor.u32 %v8582_v20, %v6668_v6  ;;  %v6647_v58 = vor.u32 %v8576_v46, %v6644_v42  ;;  %v6831_v46 = vor.u32 %v8622_v44, %v6828_v38  ;;  %v8620_v42 = vld [vmem:[#allocation4 + $0x1e4] sm:$0xf] }
 0x135   :  { %2543 = vmatpush.bf16.msra.mxu1 %v6651_v26 }
 0x136   :  { %2556 = vmatpush.bf16.msra.mxu2 %v6715_v55 }
 0x137   :  { %2531 = vmatpush.bf16.msra.mxu0 %v6579_v35  ;;  %v1919_v22 = vpop.f32.mrf.mxu0  ;;  %v6652_v35 = vld [vmem:[#allocation4 + $0x98] sm:$0xf0] }
 0x138   :  { %v6655_v45 = vor.u32 %v8578_v34, %v6652_v35 }
 0x139   :  { %2544 = vmatpush.bf16.msra.mxu1 %v6643_v41  ;;  %v9345_v21 = vpop.f32.mrf.mxu1  ;;  %v8600_v41 = vld [vmem:[#allocation4 + $0x144] sm:$0xf] }
 0x13a   :  { %2532 = vmatmul.bf16.vlgmr.msra.gmra.mxu0 %v9341_v48  ;;  %2557 = vmatpush.bf16.msra.mxu2 %v6707_v1 }
 0x13b   :  { %2576 = vmatpush.bf16.msrb.mxu0 %v6639_v39  ;;  %v6740_v39 = vld [vmem:[#allocation4 + $0x148] sm:$0xf0] }
 0x13c   :  { %2545 = vmatmul.bf16.vlgmr.msra.gmra.mxu1 %v9339_v47  ;;  %v6743_v43 = vor.u32 %v8600_v41, %v6740_v39  ;;  %v6778_v41 = vld [vmem:[#allocation4 + $0x190] sm:$0xf]  ;;  %v8611_v39 = vld [vmem:[#allocation4 + $0x194] sm:$0xf0] }
 0x13d   :  { %2589 = vmatpush.bf16.msrb.mxu1 %v6703_v32  ;;  %v9350_v32 = vld [vmem:[%s9688_s2] sm:$0xf] }
 0x13e   :  { %2602 = vmatpush.bf16.msrb.mxu2 %v6767_v3  ;;  %v388_v15 = vperm.slane %v9350_v32, 2 }
 0x13f   :  { %2577 = vmatpush.bf16.msrb.mxu0 %v6631_v49  ;;  %v1945_v25 = vpop.f32.mrf.mxu2  ;;  %v1921_v33 = vpop.f32.mrf.mxu0 }
 0x140   :  { %v1920_v55 = vadd.f32 %v1919_v22, %v388_v15  ;;  %v6819_v22 = vor.u32 %v8621_v9, %v6818_v8  ;;  %v6770_v15 = vld [vmem:[#allocation4 + $0x180] sm:$0xf]  ;;  %v8610_v9 = vld [vmem:[#allocation4 + $0x194] sm:$0xf] }
 0x141   :  { %2590 = vmatpush.bf16.msrb.mxu1 %v6695_v52  ;;  %v1934_v36 = vpop.f32.mrf.mxu1 }
 0x142   :  { %2603 = vmatpush.bf16.msrb.mxu2 %v6759_v13  ;;  %v1958_v26 = vpop.f32.mrf.mxu3  ;;  %v1933_v0 = vadd.f32 %v9345_v21, %v1920_v55  ;;  %v6811_v13 = vor.u32 %v8619_v12, %v6810_v11  ;;  %v6787_v36 = vor.u32 %v8613_v16, %v6786_v31  ;;  %v8608_v11 = vld [vmem:[#allocation4 + $0x184] sm:$0xf]  ;;  %v6772_v12 = vld [vmem:[#allocation4 + $0x188] sm:$0xf0]  ;;  %v2198_v31 = vld [vmem:[%s9690_s4] sm:$0x3] }
 0x143   :  { %2578 = vmatpush.bf16.msrb.mxu0 %v6623_v61  ;;  %v6827_v61 = vor.u32 %v8623_v59, %v6826_v57  ;;  %v6804_v59 = vld [vmem:[#allocation4 + $0x1c8] sm:$0xf0]  ;;  %v2200_v16 = vperm.slane %v2198_v31, 0 }
 0x144   :  { %v1946_v3 = vadd.f32 %v1945_v25, %v1933_v0  ;;  %v8615_v25 = vld [vmem:[#allocation4 + $0x1b4] sm:$0xf0]  ;;  %v6796_v0 = vld [vmem:[#allocation4 + $0x1b8] sm:$0xf0] }
 0x145   :  { %2591 = vmatpush.bf16.msrb.mxu1 %v6687_v62  ;;  %v8594_v62 = vld [vmem:[#allocation4 + $0x114] sm:$0xf]  ;;  %2563 = vmatpush.bf16.msra.mxu3 %v6827_v61 }
 0x146   :  { %2604 = vmatpush.bf16.msrb.mxu2 %v6751_v29  ;;  %v6719_v1 = vor.u32 %v8594_v62, %v6716_v63  ;;  %v6795_v29 = vor.u32 %v8615_v25, %v6794_v24  ;;  %v389_v62 = vperm.slane %v9350_v32, 3  ;;  %v8614_v63 = vld [vmem:[#allocation4 + $0x1b4] sm:$0xf]  ;;  %v6775_v32 = vor.u32 %v8608_v11, %v6772_v12 }
 0x147   :  { %2579 = vmatpush.bf16.msrb.mxu0 %v6615_v5  ;;  %v1947_v49 = vpop.f32.mrf.mxu2  ;;  %v6711_v5 = vor.u32 %v8592_v2, %v6708_v4  ;;  %v6799_v2 = vor.u32 %v8614_v63, %v6796_v0  ;;  %v8612_v4 = vld [vmem:[#allocation4 + $0x1a4] sm:$0xf]  ;;  %v8626_v11 = vld [vmem:[#allocation6 + $0x10] sm:$0xff] }
 0x148   :  { %v6820_v49 = vld [vmem:[#allocation4 + $0x1e8] sm:$0xf0] }
 0x149   :  { %2592 = vmatpush.bf16.msrb.mxu1 %v6679_v7  ;;  %v1959_v7 = vadd.f32 %v1958_v26, %v1946_v3  ;;  %2564 = vmatpush.bf16.msra.mxu3 %v6819_v22  ;;  %v6823_v37 = vor.u32 %v8620_v42, %v6820_v49  ;;  %v6788_v3 = vld [vmem:[#allocation4 + $0x1a8] sm:$0xf0]  ;;  %v8631_v42 = vld [vmem:[#allocation6 + $0x38] sm:$0xff]  ;;  %v8630_v49 = vld [vmem:[#allocation6 + $0x30] sm:$0xff] }
 0x14a   :  { %2605 = vmatpush.bf16.msrb.mxu2 %v6743_v43  ;;  %v1960_v52 = vpop.f32.mrf.mxu3  ;;  %v8609_v43 = vld [vmem:[#allocation4 + $0x184] sm:$0xf0] }
 0x14b   :  { %2580 = vmatpush.bf16.msrb.mxu0 %v6607_v14 }
 0x14d   :  { %2593 = vmatpush.bf16.msrb.mxu1 %v6671_v17  ;;  %2565 = vmatpush.bf16.msra.mxu3 %v6811_v13 }
 0x14e   :  { %2606 = vmatpush.bf16.msrb.mxu2 %v6735_v51  ;;  %v8618_v51 = vld [vmem:[#allocation4 + $0x1d4] sm:$0xf] }
 0x14f   :  { %2581 = vmatpush.bf16.msrb.mxu0 %v6599_v28  ;;  %v6815_v55 = vor.u32 %v8618_v51, %v6812_v53  ;;  %v8639_v53 = vld [vmem:[#allocation6 + $0x78] sm:$0xff] }
 0x151   :  { %2594 = vmatpush.bf16.msrb.mxu1 %v6663_v30 }
 0x152   :  { %2607 = vmatpush.bf16.msrb.mxu2 %v6727_v60 }
 0x153   :  { %2582 = vmatpush.bf16.msrb.mxu0 %v6591_v40  ;;  %v6779_v40 = vor.u32 %v8611_v39, %v6778_v41 }
 0x155   :  { %2595 = vmatpush.bf16.msrb.mxu1 %v6655_v45  ;;  %v6771_v45 = vor.u32 %v8609_v43, %v6770_v15 }
 0x156   :  { %2608 = vmatpush.bf16.msrb.mxu2 %v6719_v1 }
 0x157   :  { %2583 = vmatpush.bf16.msrb.mxu0 %v6583_v56  ;;  %v1971_v20 = vpop.f32.mrf.mxu0 }
 0x158   :  { %v1972_v6 = vadd.f32 %v1971_v20, %v1959_v7  ;;  %v6791_v7 = vor.u32 %v8612_v4, %v6788_v3  ;;  %v6780_v20 = vld [vmem:[#allocation4 + $0x198] sm:$0xf0]  ;;  %v8649_v3 = vld [vmem:[%s9693_s7 + $0x44] sm:$0xf0] }
 0x159   :  { %2596 = vmatpush.bf16.msrb.mxu1 %v6647_v58  ;;  %v1984_v21 = vpop.f32.mrf.mxu1  ;;  %v8616_v58 = vld [vmem:[#allocation4 + $0x1c4] sm:$0xf]  ;;  %v6783_v22 = vor.u32 %v8610_v9, %v6780_v20 }
 0x15a   :  { %2584 = vmatmul.bf16.vlgmr.msrb.gmra.mxu0 %v9341_v48  ;;  %2609 = vmatpush.bf16.msrb.mxu2 %v6711_v5  ;;  %v1985_v48 = vadd.f32 %v1984_v21, %v1972_v6  ;;  %v6807_v61 = vor.u32 %v8616_v58, %v6804_v59  ;;  %v6938_v58 = vld [vmem:[%s9693_s7 + $0x50] sm:$0xf]  ;;  %v8651_v59 = vld [vmem:[%s9693_s7 + $0x54] sm:$0xf0] }
 0x15b   :  { %2768 = vmatpush.bf16.msra.mxu0 %v8631_v42  ;;  %v6939_v0 = vor.u32 %v8651_v59, %v6938_v58  ;;  %v8665_v42 = vld [vmem:[%s9693_s7 + $0xc4] sm:$0xf0]  ;;  %v8670_v58 = vld [vmem:[%s9693_s7 + $0xf4] sm:$0xf] }
 0x15c   :  { %2597 = vmatmul.bf16.vlgmr.msrb.gmra.mxu1 %v9339_v47  ;;  %v6802_v47 = vld [vmem:[#allocation4 + $0x1c0] sm:$0xf] }
 0x15d   :  { %v6803_v23 = vor.u32 %v8617_v19, %v6802_v47  ;;  %2781 = vmatpush.bf16.msra.mxu1 %v8639_v53  ;;  %v6986_v53 = vld [vmem:[%s9693_s7 + $0xb0] sm:$0xf] }
 0x15f   :  { %v1997_v14 = vpop.f32.mrf.mxu2  ;;  %v1973_v27 = vpop.f32.mrf.mxu0  ;;  %2566 = vmatpush.bf16.msra.mxu3 %v6803_v23  ;;  %2769 = vmatpush.bf16.msra.mxu0 %v8630_v49  ;;  %v8648_v49 = vld [vmem:[%s9693_s7 + $0x44] sm:$0xf] }
 0x160   :  { %v1998_v17 = vadd.f32 %v1997_v14, %v1985_v48 }
 0x161   :  { %v1986_v10 = vpop.f32.mrf.mxu1 }
 0x162   :  { %v2010_v18 = vpop.f32.mrf.mxu3 }
 0x163   :  { %v2011_v26 = vadd.f32 %v2010_v18, %v1998_v17  ;;  %2567 = vmatpush.bf16.msra.mxu3 %v6795_v29 }
 0x165   :  { %vm2120_vm2 = vcmp.gt.f32.partialorder %v2011_v26, 0.0  ;;  %v2124_v28 = vmul.f32 0.2, %v2011_v26 }
 0x167   :  { %v2128_v30 = vsel %vm2120_vm2, %v2011_v26, %v2124_v28  ;;  %v1999_v34 = vpop.f32.mrf.mxu2  ;;  %2568 = vmatpush.bf16.msra.mxu3 %v6787_v36 }
 0x168   :  { %v2132_v33 = vpack.c.bf16 %v2128_v30, %v2128_v30 }
 0x16a   :  { %v2012_v35 = vpop.f32.mrf.mxu3  ;;  %2558 = vmatmul.bf16.vlgmr.msra.gmra.mxu2 %v2132_v33 }
 0x16b   :  { %2569 = vmatpush.bf16.msra.mxu3 %v6779_v40  ;;  %v2201_v40 = vperm.slane %v2198_v31, 1  ;;  %v8643_v31 = vld [vmem:[%s9693_s7 + $0x14] sm:$0xf0] }
 0x16f   :  { %2570 = vmatpush.bf16.msra.mxu3 %v6771_v45 }
 0x173   :  { %2615 = vmatpush.bf16.msrb.mxu3 %v6831_v46 }
 0x177   :  { %v2023_v50 = vpop.f32.mrf.mxu0  ;;  %2616 = vmatpush.bf16.msrb.mxu3 %v6823_v37  ;;  %v6954_v37 = vld [vmem:[%s9693_s7 + $0x70] sm:$0xf] }
 0x178   :  { %v2024_v8 = vadd.f32 %v2023_v50, %v389_v62  ;;  %v8629_v50 = vld [vmem:[#allocation6 + $0x28] sm:$0xff]  ;;  %v8671_v62 = vld [vmem:[%s9693_s7 + $0xf4] sm:$0xf0] }
 0x179   :  { %v2036_v52 = vpop.f32.mrf.mxu1  ;;  %2770 = vmatpush.bf16.msra.mxu0 %v8629_v50 }
 0x17a   :  { %2610 = vmatmul.bf16.vlgmr.msrb.gmra.mxu2 %v2132_v33  ;;  %v2037_v6 = vadd.f32 %v2036_v52, %v2024_v8  ;;  %v8655_v52 = vld [vmem:[%s9693_s7 + $0x74] sm:$0xf0] }
 0x17b   :  { %2617 = vmatpush.bf16.msrb.mxu3 %v6815_v55  ;;  %v6955_v51 = vor.u32 %v8655_v52, %v6954_v37  ;;  %v8653_v55 = vld [vmem:[%s9693_s7 + $0x64] sm:$0xf0]  ;;  %v8627_v8 = vld [vmem:[#allocation6 + $0x18] sm:$0xff]  ;;  %v6932_v37 = vld [vmem:[%s9693_s7 + $0x48] sm:$0xf0] }
 0x17c   :  { %v6935_v52 = vor.u32 %v8648_v49, %v6932_v37  ;;  %v8700_v49 = vld [vmem:[#allocation7 + $0xe4] sm:$0xf]  ;;  %v7140_v37 = vld [vmem:[#allocation7 + $0xf0] sm:$0xf0] }
 0x17d   :  { %2993 = vmatpush.bf16.msra.mxu2 %v6955_v51  ;;  %v8632_v51 = vld [vmem:[#allocation6 + $0x40] sm:$0xff] }
 0x17f   :  { %v2049_v54 = vpop.f32.mrf.mxu2  ;;  %v2025_v57 = vpop.f32.mrf.mxu0  ;;  %2618 = vmatpush.bf16.msrb.mxu3 %v6807_v61  ;;  %v7018_v61 = vld [vmem:[%s9693_s7 + $0xf0] sm:$0xf] }
 0x180   :  { %v2050_v21 = vadd.f32 %v2049_v54, %v2037_v6  ;;  %v6946_v54 = vld [vmem:[%s9693_s7 + $0x60] sm:$0xf]  ;;  %v8638_v57 = vld [vmem:[#allocation6 + $0x70] sm:$0xff]  ;;  %v7019_v4 = vor.u32 %v8671_v62, %v7018_v61  ;;  %v8661_v62 = vld [vmem:[%s9693_s7 + $0xa4] sm:$0xf0] }
 0x181   :  { %v2038_v60 = vpop.f32.mrf.mxu1  ;;  %2782 = vmatpush.bf16.msra.mxu1 %v8638_v57  ;;  %v6922_v6 = vld [vmem:[%s9693_s7 + $0x30] sm:$0xf]  ;;  %v6924_v57 = vld [vmem:[%s9693_s7 + $0x38] sm:$0xf0]  ;;  %v6978_v61 = vld [vmem:[%s9693_s7 + $0xa0] sm:$0xf] }
 0x182   :  { %v2062_v56 = vpop.f32.mrf.mxu3  ;;  %v8628_v60 = vld [vmem:[#allocation6 + $0x20] sm:$0xff] }
 0x183   :  { %2619 = vmatpush.bf16.msrb.mxu3 %v6799_v2  ;;  %v2063_v13 = vadd.f32 %v2062_v56, %v2050_v21  ;;  %v6947_v56 = vor.u32 %v8653_v55, %v6946_v54  ;;  %v6930_v2 = vld [vmem:[%s9693_s7 + $0x40] sm:$0xf]  ;;  %2771 = vmatpush.bf16.msra.mxu0 %v8628_v60  ;;  %v8647_v21 = vld [vmem:[%s9693_s7 + $0x34] sm:$0xf0]  ;;  %v7020_v60 = vld [vmem:[%s9693_s7 + $0xf8] sm:$0xf0] }
 0x184   :  { %v6931_v20 = vor.u32 %v8649_v3, %v6930_v2  ;;  %v8663_v54 = vld [vmem:[%s9693_s7 + $0xb4] sm:$0xf0]  ;;  %v6916_v2 = vld [vmem:[%s9693_s7 + $0x28] sm:$0xf0]  ;;  %v6979_v3 = vor.u32 %v8661_v62, %v6978_v61  ;;  %v8734_v61 = vld [vmem:[#allocation7 + $0x1ec] sm:$0xf0] }
 0x185   :  { %2994 = vmatpush.bf16.msra.mxu2 %v6947_v56  ;;  %v6987_v55 = vor.u32 %v8663_v54, %v6986_v53  ;;  %v8646_v56 = vld [vmem:[%s9693_s7 + $0x34] sm:$0xf]  ;;  %v7143_v53 = vor.u32 %v8700_v49, %v7140_v37  ;;  %v8696_v54 = vld [vmem:[#allocation7 + $0xc4] sm:$0xf]  ;;  %v8678_v37 = vld [vmem:[#allocation7 + $0x2c] sm:$0xf0] }
 0x186   :  { %v6927_v59 = vor.u32 %v8646_v56, %v6924_v57  ;;  %v7106_v57 = vld [vmem:[#allocation7 + $0xa0] sm:$0xf]  ;;  %v8692_v62 = vld [vmem:[#allocation7 + $0xa4] sm:$0xf] }
 0x187   :  { %v2051_v1 = vpop.f32.mrf.mxu2  ;;  %2620 = vmatpush.bf16.msrb.mxu3 %v6791_v7  ;;  %v8669_v7 = vld [vmem:[%s9693_s7 + $0xe4] sm:$0xf0]  ;;  %2772 = vmatpush.bf16.msra.mxu0 %v8627_v8 }
 0x188   :  { %v8637_v1 = vld [vmem:[#allocation6 + $0x68] sm:$0xff] }
 0x189   :  { %2995 = vmatpush.bf16.msra.mxu2 %v6939_v0  ;;  %2783 = vmatpush.bf16.msra.mxu1 %v8637_v1  ;;  %v7023_v0 = vor.u32 %v8670_v58, %v7020_v60  ;;  %v8644_v1 = vld [vmem:[%s9693_s7 + $0x24] sm:$0xf]  ;;  %v7266_v60 = vld [vmem:[#allocation7 + $0x1e0] sm:$0xf] }
 0x18a   :  { %v2064_v5 = vpop.f32.mrf.mxu3 }
 0x18b   :  { %2621 = vmatpush.bf16.msrb.mxu3 %v6783_v22  ;;  %v7010_v5 = vld [vmem:[%s9693_s7 + $0xe0] sm:$0xf]  ;;  %2773 = vmatpush.bf16.msra.mxu0 %v8626_v11  ;;  %v8666_v11 = vld [vmem:[%s9693_s7 + $0xd4] sm:$0xf] }
 0x18c   :  { %v7011_v9 = vor.u32 %v8669_v7, %v7010_v5  ;;  %v8636_v22 = vld [vmem:[#allocation6 + $0x60] sm:$0xff]  ;;  %v7012_v5 = vld [vmem:[%s9693_s7 + $0xe8] sm:$0xf0]  ;;  %v6919_v7 = vor.u32 %v8644_v1, %v6916_v2  ;;  %v7267_v1 = vor.u32 %v8734_v61, %v7266_v60 }
 0x18d   :  { %2996 = vmatpush.bf16.msra.mxu2 %v6931_v20  ;;  %2784 = vmatpush.bf16.msra.mxu1 %v8636_v22  ;;  %v8659_v20 = vld [vmem:[%s9693_s7 + $0x94] sm:$0xf0]  ;;  %v8642_v22 = vld [vmem:[%s9693_s7 + $0x14] sm:$0xf]  ;;  %v7250_v2 = vld [vmem:[#allocation7 + $0x1c0] sm:$0xf] }
 0x18e   :  { %v7026_v60 = vld [vmem:[#allocation7] sm:$0xf] }
 0x18f   :  { %2622 = vmatpush.bf16.msrb.mxu3 %v6775_v32  ;;  %v6923_v32 = vor.u32 %v8647_v21, %v6922_v6  ;;  %v6908_v21 = vld [vmem:[%s9693_s7 + $0x18] sm:$0xf0] }
 0x191   :  { %2997 = vmatpush.bf16.msra.mxu2 %v6923_v32  ;;  %v6911_v32 = vor.u32 %v8642_v22, %v6908_v21  ;;  %v8732_v21 = vld [vmem:[#allocation7 + $0x1e4] sm:$0xf] }
 0x197   :  { %v2075_v48 = vpop.f32.mrf.mxu0 }
 0x198   :  { %v2076_v17 = vadd.f32 %v2075_v48, %v2063_v13  ;;  %v8635_v13 = vld [vmem:[#allocation6 + $0x58] sm:$0xff]  ;;  %v6914_v48 = vld [vmem:[%s9693_s7 + $0x20] sm:$0xf] }
 0x199   :  { %v2088_v14 = vpop.f32.mrf.mxu1  ;;  %2785 = vmatpush.bf16.msra.mxu1 %v8635_v13 }
 0x19a   :  { %v2089_v18 = vadd.f32 %v2088_v14, %v2076_v17  ;;  %v8645_v14 = vld [vmem:[%s9693_s7 + $0x24] sm:$0xf0] }
 0x19b   :  { %v8625_v17 = vld [vmem:[#allocation6 + $0x8] sm:$0xff] }
 0x19c   :  { %2774 = vmatpush.bf16.msra.mxu0 %v8625_v17  ;;  %v8640_v17 = vld [vmem:[%s9693_s7 + $0x4] sm:$0xf] }
 0x19f   :  { %v2101_v47 = vpop.f32.mrf.mxu2  ;;  %v2077_v24 = vpop.f32.mrf.mxu0 }
 0x1a0   :  { %v2102_v19 = vadd.f32 %v2101_v47, %v2089_v18  ;;  %v2114_v23 = vpop.f32.mrf.mxu3  ;;  %v8654_v18 = vld [vmem:[%s9693_s7 + $0x74] sm:$0xf]  ;;  %v6956_v47 = vld [vmem:[%s9693_s7 + $0x78] sm:$0xf0] }
 0x1a1   :  { %v2090_v25 = vpop.f32.mrf.mxu1  ;;  %v6959_v24 = vor.u32 %v8654_v18, %v6956_v47  ;;  %v6900_v47 = vld [vmem:[%s9693_s7 + $0x8] sm:$0xf0] }
 0x1a2   :  { %v2115_v26 = vadd.f32 %v2114_v23, %v2102_v19  ;;  %v6915_v19 = vor.u32 %v8645_v14, %v6914_v48  ;;  %v8624_v23 = vld [vmem:[#allocation6] sm:$0xff]  ;;  %v8657_v14 = vld [vmem:[%s9693_s7 + $0x84] sm:$0xf0] }
 0x1a3   :  { %2775 = vmatpush.bf16.msra.mxu0 %v8624_v23  ;;  %v6962_v48 = vld [vmem:[%s9693_s7 + $0x80] sm:$0xf]  ;;  %v6996_v23 = vld [vmem:[%s9693_s7 + $0xc8] sm:$0xf0] }
 0x1a4   :  { %vm2121_vm3 = vcmp.gt.f32.partialorder %v2115_v26, 0.0  ;;  %v2125_v27 = vmul.f32 0.2, %v2115_v26  ;;  %2998 = vmatpush.bf16.msra.mxu2 %v6915_v19  ;;  %v6963_v18 = vor.u32 %v8657_v14, %v6962_v48  ;;  %v8664_v19 = vld [vmem:[%s9693_s7 + $0xc4] sm:$0xf] }
 0x1a5   :  { %v7092_v48 = vld [vmem:[#allocation7 + $0x90] sm:$0xf0] }
 0x1a6   :  { %v2129_v10 = vsel %vm2121_vm3, %v2115_v26, %v2125_v27  ;;  %v8652_v26 = vld [vmem:[%s9693_s7 + $0x64] sm:$0xf]  ;;  %v6948_v27 = vld [vmem:[%s9693_s7 + $0x68] sm:$0xf0] }
 0x1a7   :  { %v2133_v28 = vpack.c.bf16 %v2129_v10, %v2129_v10  ;;  %v2103_v29 = vpop.f32.mrf.mxu2  ;;  %3019 = vmatpush.bf16.msrb.mxu0 %v6959_v24  ;;  %v6951_v10 = vor.u32 %v8652_v26, %v6948_v27  ;;  %v6903_v24 = vor.u32 %v8640_v17, %v6900_v47  ;;  %v6999_v26 = vor.u32 %v8664_v19, %v6996_v23  ;;  %v8662_v27 = vld [vmem:[%s9693_s7 + $0xb4] sm:$0xf] }
 0x1a8   :  { %v2116_v30 = vpop.f32.mrf.mxu3  ;;  %v8634_v29 = vld [vmem:[#allocation6 + $0x50] sm:$0xff] }
 0x1a9   :  { %2571 = vmatmul.bf16.vlgmr.msra.gmra.mxu3 %v2133_v28  ;;  %v6906_v30 = vld [vmem:[%s9693_s7 + $0x10] sm:$0xf]  ;;  %2786 = vmatpush.bf16.msra.mxu1 %v8634_v29  ;;  %v8660_v29 = vld [vmem:[%s9693_s7 + $0xa4] sm:$0xf]  ;;  %v7252_v47 = vld [vmem:[#allocation7 + $0x1d0] sm:$0xf0] }
 0x1aa   :  { %3006 = vmatpush.bf16.msra.mxu3 %v7019_v4  ;;  %v8668_v4 = vld [vmem:[%s9693_s7 + $0xe4] sm:$0xf] }
 0x1ab   :  { %3020 = vmatpush.bf16.msrb.mxu0 %v6951_v10  ;;  %v7015_v8 = vor.u32 %v8668_v4, %v7012_v5  ;;  %v6988_v10 = vld [vmem:[%s9693_s7 + $0xb8] sm:$0xf0]  ;;  %v8730_v5 = vld [vmem:[#allocation7 + $0x1cc] sm:$0xf0] }
 0x1ac   :  { %v7251_v22 = vor.u32 %v8730_v5, %v7250_v2  ;;  %v8703_v5 = vld [vmem:[#allocation7 + $0xf4] sm:$0xf0] }
 0x1ae   :  { %3007 = vmatpush.bf16.msra.mxu3 %v7011_v9  ;;  %v6970_v9 = vld [vmem:[%s9693_s7 + $0x90] sm:$0xf] }
 0x1af   :  { %v6971_v6 = vor.u32 %v8659_v20, %v6970_v9  ;;  %v7090_v9 = vld [vmem:[#allocation7 + $0x80] sm:$0xf]  ;;  %v8690_v20 = vld [vmem:[#allocation7 + $0x8c] sm:$0xf0] }
 0x1b7   :  { %v2533_v33 = vpop.f32.mrf.mxu0 }
 0x1b8   :  { %v2534_v34 = vadd.f32 %v2533_v33, %v2200_v16  ;;  %v6907_v16 = vor.u32 %v8643_v31, %v6906_v30  ;;  %v7002_v33 = vld [vmem:[%s9693_s7 + $0xd0] sm:$0xf]  ;;  %v6980_v30 = vld [vmem:[%s9693_s7 + $0xa8] sm:$0xf0] }
 0x1b9   :  { %v2546_v35 = vpop.f32.mrf.mxu1  ;;  %2623 = vmatmul.bf16.vlgmr.msrb.gmra.mxu3 %v2133_v28  ;;  %v6983_v31 = vor.u32 %v8660_v29, %v6980_v30  ;;  %v7234_v30 = vld [vmem:[#allocation7 + $0x1a0] sm:$0xf] }
 0x1ba   :  { %v9360_v36 = vadd.f32 %v2546_v35, %v2534_v34  ;;  %v8667_v34 = vld [vmem:[%s9693_s7 + $0xd4] sm:$0xf0]  ;;  %v8650_v35 = vld [vmem:[%s9693_s7 + $0x54] sm:$0xf]  ;;  %2999 = vmatpush.bf16.msra.mxu2 %v6907_v16 }
 0x1bb   :  { %v8658_v16 = vld [vmem:[%s9693_s7 + $0x94] sm:$0xf] }
 0x1bf   :  { %v2535_v41 = vpop.f32.mrf.mxu0 }
 0x1c0   :  { %v7003_v41 = vor.u32 %v8667_v34, %v7002_v33  ;;  %v6972_v33 = vld [vmem:[%s9693_s7 + $0x98] sm:$0xf0] }
 0x1c1   :  { %v2548_v39 = vpop.f32.mrf.mxu1 }
 0x1c2   :  { %v6940_v39 = vld [vmem:[%s9693_s7 + $0x58] sm:$0xf0]  ;;  %3008 = vmatpush.bf16.msra.mxu3 %v7003_v41  ;;  %v6975_v41 = vor.u32 %v8658_v16, %v6972_v33  ;;  %v8724_v16 = vld [vmem:[#allocation7 + $0x1a4] sm:$0xf] }
 0x1d7   :  { %v2585_v15 = vpop.f32.mrf.mxu0 }
 0x1d8   :  { %v2586_v43 = vadd.f32 %v2585_v15, %v2201_v40  ;;  %v6943_v40 = vor.u32 %v8650_v35, %v6940_v39  ;;  %v8633_v15 = vld [vmem:[#allocation6 + $0x48] sm:$0xff] }
 0x1d9   :  { %v2598_v45 = vpop.f32.mrf.mxu1  ;;  %2787 = vmatpush.bf16.msra.mxu1 %v8633_v15  ;;  %v6964_v15 = vld [vmem:[%s9693_s7 + $0x88] sm:$0xf0] }
 0x1da   :  { %v9362_v44 = vadd.f32 %v2598_v45, %v2586_v43  ;;  %v6898_v43 = vld [vmem:[%s9693_s7] sm:$0xf]  ;;  %v8641_v45 = vld [vmem:[%s9693_s7 + $0x4] sm:$0xf0]  ;;  %3021 = vmatpush.bf16.msrb.mxu0 %v6943_v40  ;;  %v8656_v40 = vld [vmem:[%s9693_s7 + $0x84] sm:$0xf] }
 0x1dd   :  { %2788 = vmatpush.bf16.msra.mxu1 %v8632_v51  ;;  %v8698_v51 = vld [vmem:[#allocation7 + $0xcc] sm:$0xf0] }
 0x1de   :  { %3022 = vmatpush.bf16.msrb.mxu0 %v6935_v52  ;;  %v7122_v52 = vld [vmem:[#allocation7 + $0xc0] sm:$0xf] }
 0x1df   :  { %v2587_v38 = vpop.f32.mrf.mxu0  ;;  %v7123_v56 = vor.u32 %v8698_v51, %v7122_v52  ;;  %v8676_v52 = vld [vmem:[#allocation7 + $0x24] sm:$0xf] }
 0x1e0   :  { %v6899_v38 = vor.u32 %v8641_v45, %v6898_v43 }
 0x1e1   :  { %v2600_v46 = vpop.f32.mrf.mxu1  ;;  %3032 = vmatpush.bf16.msrb.mxu1 %v7023_v0  ;;  %v7108_v0 = vld [vmem:[#allocation7 + $0xb0] sm:$0xf0] }
 0x1e2   :  { %v6994_v46 = vld [vmem:[%s9693_s7 + $0xc0] sm:$0xf]  ;;  %3000 = vmatpush.bf16.msra.mxu2 %v6899_v38  ;;  %3023 = vmatpush.bf16.msrb.mxu0 %v6927_v59  ;;  %v6967_v38 = vor.u32 %v8656_v40, %v6964_v15  ;;  %v8694_v59 = vld [vmem:[#allocation7 + $0xac] sm:$0xf0]  ;;  %v8680_v15 = vld [vmem:[#allocation7 + $0x44] sm:$0xf] }
 0x1e3   :  { %v6995_v50 = vor.u32 %v8665_v42, %v6994_v46 }
 0x1e5   :  { %3009 = vmatpush.bf16.msra.mxu3 %v6995_v50  ;;  %3033 = vmatpush.bf16.msrb.mxu1 %v7015_v8  ;;  %v7111_v8 = vor.u32 %v8692_v62, %v7108_v0  ;;  %v8674_v62 = vld [vmem:[#allocation7 + $0xc] sm:$0xf0]  ;;  %v8672_v0 = vld [vmem:[#allocation7 + $0x4] sm:$0xf] }
 0x1e6   :  { %3024 = vmatpush.bf16.msrb.mxu0 %v6919_v7  ;;  %v7027_v2 = vor.u32 %v8674_v62, %v7026_v60 }
 0x1e9   :  { %3010 = vmatpush.bf16.msra.mxu3 %v6987_v55  ;;  %v7124_v55 = vld [vmem:[#allocation7 + $0xd0] sm:$0xf0] }
 0x1ea   :  { %3025 = vmatpush.bf16.msrb.mxu0 %v6911_v32  ;;  %v7127_v58 = vor.u32 %v8696_v54, %v7124_v55  ;;  %v7202_v54 = vld [vmem:[#allocation7 + $0x160] sm:$0xf]  ;;  %v8718_v55 = vld [vmem:[#allocation7 + $0x16c] sm:$0xf0] }
 0x1ed   :  { %v9388_v63 = vpop.f32.mrf.mxu2  ;;  %3011 = vmatpush.bf16.msra.mxu3 %v6979_v3  ;;  %v7107_v3 = vor.u32 %v8694_v59, %v7106_v57  ;;  %v7203_v57 = vor.u32 %v8718_v55, %v7202_v54  ;;  %v7204_v59 = vld [vmem:[#allocation7 + $0x170] sm:$0xf0]  ;;  %v7260_v55 = vld [vmem:[#allocation7 + $0x1d8] sm:$0xf0] }
 0x1ee   :  { %3026 = vmatpush.bf16.msrb.mxu0 %v6903_v24  ;;  %v2560_v34 = vadd.f32 %v9388_v63, %v9360_v36  ;;  %v7138_v36 = vld [vmem:[#allocation7 + $0xe0] sm:$0xf]  ;;  %v8702_v63 = vld [vmem:[#allocation7 + $0xec] sm:$0xf0] }
 0x1ef   :  { %v7139_v50 = vor.u32 %v8702_v63, %v7138_v36  ;;  %v7074_v24 = vld [vmem:[#allocation7 + $0x60] sm:$0xf]  ;;  %v7220_v63 = vld [vmem:[#allocation7 + $0x190] sm:$0xf0] }
 0x1f1   :  { %3012 = vmatpush.bf16.msra.mxu3 %v6971_v6  ;;  %3443 = vmatpush.bf16.msrb.mxu2 %v7139_v50  ;;  %v7042_v50 = vld [vmem:[#allocation7 + $0x20] sm:$0xf] }
 0x1f2   :  { %v7043_v51 = vor.u32 %v8678_v37, %v7042_v50  ;;  %v7100_v50 = vld [vmem:[#allocation7 + $0x98] sm:$0xf0] }
 0x1f5   :  { %v2561_v12 = vpop.f32.mrf.mxu2  ;;  %3013 = vmatpush.bf16.msra.mxu3 %v6963_v18  ;;  %3444 = vmatpush.bf16.msrb.mxu2 %v7123_v56  ;;  %v8728_v18 = vld [vmem:[#allocation7 + $0x1c4] sm:$0xf] }
 0x1f6   :  { %v7004_v12 = vld [vmem:[%s9693_s7 + $0xd8] sm:$0xf0]  ;;  %v7255_v23 = vor.u32 %v8728_v18, %v7252_v47  ;;  %v8710_v47 = vld [vmem:[#allocation7 + $0x12c] sm:$0xf0] }
 0x1f7   :  { %v7007_v13 = vor.u32 %v8666_v11, %v7004_v12  ;;  %v7268_v11 = vld [vmem:[#allocation7 + $0x1f0] sm:$0xf0]  ;;  %v8688_v12 = vld [vmem:[#allocation7 + $0x84] sm:$0xf] }
 0x1f8   :  { %v7095_v17 = vor.u32 %v8688_v12, %v7092_v48  ;;  %v7188_v12 = vld [vmem:[#allocation7 + $0x150] sm:$0xf0]  ;;  %v8699_v48 = vld [vmem:[#allocation7 + $0xd4] sm:$0xf0] }
 0x1f9   :  { %3034 = vmatpush.bf16.msrb.mxu1 %v7007_v13  ;;  %3456 = vmatpush.bf16.msrb.mxu3 %v7267_v1  ;;  %v7091_v13 = vor.u32 %v8690_v20, %v7090_v9  ;;  %v7028_v1 = vld [vmem:[#allocation7 + $0x10] sm:$0xf0]  ;;  %v7148_v9 = vld [vmem:[#allocation7 + $0xf8] sm:$0xf0]  ;;  %v7186_v20 = vld [vmem:[#allocation7 + $0x140] sm:$0xf] }
 0x1fa   :  { %3445 = vmatpush.bf16.msrb.mxu2 %v7107_v3  ;;  %v7146_v3 = vld [vmem:[#allocation7 + $0xe8] sm:$0xf] }
 0x1fd   :  { %v9420_v25 = vpop.f32.mrf.mxu2  ;;  %3035 = vmatpush.bf16.msrb.mxu1 %v6999_v26  ;;  %3457 = vmatpush.bf16.msrb.mxu3 %v7251_v22  ;;  %v8686_v26 = vld [vmem:[#allocation7 + $0x6c] sm:$0xf0] }
 0x1fe   :  { %v2612_v4 = vadd.f32 %v9420_v25, %v9362_v44  ;;  %v7271_v25 = vor.u32 %v8732_v21, %v7268_v11  ;;  %3446 = vmatpush.bf16.msrb.mxu2 %v7091_v13  ;;  %v8714_v22 = vld [vmem:[#allocation7 + $0x14c] sm:$0xf0]  ;;  %v8712_v11 = vld [vmem:[#allocation7 + $0x144] sm:$0xf]  ;;  %v7130_v13 = vld [vmem:[#allocation7 + $0xc8] sm:$0xf] }
 0x1ff   :  { %v7187_v21 = vor.u32 %v8714_v22, %v7186_v20  ;;  %v8681_v20 = vld [vmem:[#allocation7 + $0x4c] sm:$0xf] }
 0x205   :  { %v2613_v28 = vpop.f32.mrf.mxu2 }
 0x206   :  { %v6991_v28 = vor.u32 %v8662_v27, %v6988_v10  ;;  %v8684_v27 = vld [vmem:[#allocation7 + $0x64] sm:$0xf]  ;;  %v7075_v10 = vor.u32 %v8686_v26, %v7074_v24 }
 0x208   :  { %3036 = vmatpush.bf16.msrb.mxu1 %v6991_v28  ;;  %v7076_v28 = vld [vmem:[#allocation7 + $0x70] sm:$0xf0]  ;;  %3447 = vmatpush.bf16.msrb.mxu2 %v7075_v10  ;;  %v8695_v10 = vld [vmem:[#allocation7 + $0xb4] sm:$0xf0] }
 0x209   :  { %v7079_v29 = vor.u32 %v8684_v27, %v7076_v28  ;;  %v7114_v27 = vld [vmem:[#allocation7 + $0xa8] sm:$0xf]  ;;  %v8693_v28 = vld [vmem:[#allocation7 + $0xac] sm:$0xf] }
 0x20c   :  { %3037 = vmatpush.bf16.msrb.mxu1 %v6983_v31  ;;  %v8726_v31 = vld [vmem:[#allocation7 + $0x1ac] sm:$0xf0] }
 0x20d   :  { %v7235_v33 = vor.u32 %v8726_v31, %v7234_v30  ;;  %v7116_v30 = vld [vmem:[#allocation7 + $0xb8] sm:$0xf0]  ;;  %v7154_v31 = vld [vmem:[#allocation7 + $0x100] sm:$0xf] }
 0x20f   :  { %3458 = vmatpush.bf16.msrb.mxu3 %v7235_v33  ;;  %v7119_v33 = vor.u32 %v8693_v28, %v7116_v30  ;;  %v7212_v28 = vld [vmem:[#allocation7 + $0x178] sm:$0xf0] }
 0x210   :  { %3038 = vmatpush.bf16.msrb.mxu1 %v6975_v41  ;;  %v8682_v41 = vld [vmem:[#allocation7 + $0x4c] sm:$0xf0] }
 0x214   :  { %3039 = vmatpush.bf16.msrb.mxu1 %v6967_v38  ;;  %v7218_v38 = vld [vmem:[#allocation7 + $0x180] sm:$0xf] }
 0x22c   :  { %v2572_v35 = vpop.f32.mrf.mxu3 }
 0x22d   :  { %v2573_v39 = vadd.f32 %v2572_v35, %v2560_v34  ;;  %v7236_v34 = vld [vmem:[#allocation7 + $0x1b0] sm:$0xf0]  ;;  %v7058_v35 = vld [vmem:[#allocation7 + $0x40] sm:$0xf] }
 0x22e   :  { %v7059_v40 = vor.u32 %v8682_v41, %v7058_v35  ;;  %v8704_v35 = vld [vmem:[#allocation7 + $0x104] sm:$0xf]  ;;  %v7156_v41 = vld [vmem:[#allocation7 + $0x110] sm:$0xf0] }
 0x22f   :  { %vm2628_vm4 = vcmp.gt.f32.partialorder %v2573_v39, 0.0  ;;  %v2630_v43 = vmul.f32 0.2, %v2573_v39 }
 0x230   :  { %3448 = vmatpush.bf16.msrb.mxu2 %v7059_v40  ;;  %v7159_v40 = vor.u32 %v8704_v35, %v7156_v41  ;;  %v7036_v35 = vld [vmem:[#allocation7 + $0x18] sm:$0xf0]  ;;  %v7194_v41 = vld [vmem:[#allocation7 + $0x148] sm:$0xf] }
 0x231   :  { %v2632_v45 = vsel %vm2628_vm4, %v2573_v39, %v2630_v43  ;;  %v7239_v39 = vor.u32 %v8724_v16, %v7236_v34  ;;  %v7060_v43 = vld [vmem:[#allocation7 + $0x50] sm:$0xf0]  ;;  %v8706_v16 = vld [vmem:[#allocation7 + $0x10c] sm:$0xf0] }
 0x232   :  { %v2634_v46 = vpack.c.bf16 %v2632_v45, %v2632_v45  ;;  %v7063_v45 = vor.u32 %v8680_v15, %v7060_v43  ;;  %v7155_v34 = vor.u32 %v8706_v16, %v7154_v31  ;;  %v8735_v15 = vld [vmem:[#allocation7 + $0x1f4] sm:$0xf0]  ;;  %v8733_v43 = vld [vmem:[#allocation7 + $0x1ec] sm:$0xf]  ;;  %v7034_v31 = vld [vmem:[#allocation7 + $0x8] sm:$0xf] }
 0x233   :  { %v8675_v16 = vld [vmem:[#allocation7 + $0x14] sm:$0xf0] }
 0x234   :  { %v2574_v42 = vpop.f32.mrf.mxu3  ;;  %2776 = vmatmul.bf16.vlgmr.msra.gmra.mxu0 %v2634_v46  ;;  %3001 = vmatmul.bf16.vlgmr.msra.gmra.mxu2 %v2634_v46 }
 0x235   :  { %3469 = vmatpush.bf16.msra.mxu0 %v7143_v53  ;;  %v8720_v42 = vld [vmem:[#allocation7 + $0x184] sm:$0xf]  ;;  %v7044_v53 = vld [vmem:[#allocation7 + $0x30] sm:$0xf0]  ;;  %3449 = vmatpush.bf16.msrb.mxu2 %v7043_v51  ;;  %v8731_v51 = vld [vmem:[#allocation7 + $0x1d4] sm:$0xf0] }
 0x236   :  { %v7223_v49 = vor.u32 %v8720_v42, %v7220_v63  ;;  %v7047_v56 = vor.u32 %v8676_v52, %v7044_v53  ;;  %v7098_v42 = vld [vmem:[#allocation7 + $0x88] sm:$0xf]  ;;  %v8689_v63 = vld [vmem:[#allocation7 + $0x8c] sm:$0xf] }
 0x237   :  { %v7103_v37 = vor.u32 %v8689_v63, %v7100_v50  ;;  %v7258_v52 = vld [vmem:[#allocation7 + $0x1c8] sm:$0xf]  ;;  %v8729_v53 = vld [vmem:[#allocation7 + $0x1cc] sm:$0xf] }
 0x238   :  { %v7259_v54 = vor.u32 %v8731_v51, %v7258_v52  ;;  %v8709_v63 = vld [vmem:[#allocation7 + $0x12c] sm:$0xf]  ;;  %v7180_v52 = vld [vmem:[#allocation7 + $0x138] sm:$0xf0]  ;;  %v7162_v51 = vld [vmem:[#allocation7 + $0x108] sm:$0xf] }
 0x239   :  { %3470 = vmatpush.bf16.msra.mxu0 %v7127_v58  ;;  %v8716_v58 = vld [vmem:[#allocation7 + $0x164] sm:$0xf]  ;;  %3450 = vmatpush.bf16.msrb.mxu2 %v7027_v2  ;;  %v8725_v2 = vld [vmem:[#allocation7 + $0x1ac] sm:$0xf] }
 0x23a   :  { %v7207_v61 = vor.u32 %v8716_v58, %v7204_v59  ;;  %v8687_v58 = vld [vmem:[#allocation7 + $0x74] sm:$0xf0]  ;;  %v8685_v59 = vld [vmem:[#allocation7 + $0x6c] sm:$0xf] }
 0x23c   :  { %v2624_v7 = vpop.f32.mrf.mxu3 }
 0x23d   :  { %v2625_v6 = vadd.f32 %v2624_v7, %v2612_v4  ;;  %3471 = vmatpush.bf16.msra.mxu0 %v7111_v8  ;;  %v7031_v4 = vor.u32 %v8672_v0, %v7028_v1  ;;  %v8701_v7 = vld [vmem:[#allocation7 + $0xec] sm:$0xf]  ;;  %v7147_v8 = vor.u32 %v8703_v5, %v7146_v3  ;;  %v7242_v0 = vld [vmem:[#allocation7 + $0x1a8] sm:$0xf]  ;;  %v8727_v1 = vld [vmem:[#allocation7 + $0x1b4] sm:$0xf0] }
 0x23e   :  { %v7244_v3 = vld [vmem:[#allocation7 + $0x1b8] sm:$0xf0] }
 0x23f   :  { %vm2629_vm5 = vcmp.gt.f32.partialorder %v2625_v6, 0.0  ;;  %v2631_v32 = vmul.f32 0.2, %v2625_v6  ;;  %3495 = vmatpush.bf16.msra.mxu2 %v7147_v8  ;;  %v7066_v8 = vld [vmem:[#allocation7 + $0x48] sm:$0xf] }
 0x241   :  { %v2633_v44 = vsel %vm2629_vm5, %v2625_v6, %v2631_v32  ;;  %3472 = vmatpush.bf16.msra.mxu0 %v7095_v17  ;;  %v7151_v6 = vor.u32 %v8701_v7, %v7148_v9  ;;  %v7191_v32 = vor.u32 %v8712_v11, %v7188_v12  ;;  %v7170_v17 = vld [vmem:[#allocation7 + $0x120] sm:$0xf]  ;;  %v7247_v7 = vor.u32 %v8725_v2, %v7244_v3  ;;  %v8683_v9 = vld [vmem:[#allocation7 + $0x54] sm:$0xf0]  ;;  %v7226_v11 = vld [vmem:[#allocation7 + $0x188] sm:$0xf] }
 0x242   :  { %v2635_v14 = vpack.c.bf16 %v2633_v44, %v2633_v44  ;;  %v7131_v44 = vor.u32 %v8699_v48, %v7130_v13  ;;  %v7171_v24 = vor.u32 %v8710_v47, %v7170_v17  ;;  %v7067_v22 = vor.u32 %v8683_v9, %v7066_v8  ;;  %v8723_v12 = vld [vmem:[#allocation7 + $0x194] sm:$0xf0]  ;;  %v7228_v48 = vld [vmem:[#allocation7 + $0x198] sm:$0xf0]  ;;  %v8677_v17 = vld [vmem:[#allocation7 + $0x2c] sm:$0xf] }
 0x243   :  { %v7227_v13 = vor.u32 %v8723_v12, %v7226_v11  ;;  %v7052_v47 = vld [vmem:[#allocation7 + $0x38] sm:$0xf0]  ;;  %v8788_v11 = vld [vmem:[#allocation9 + $0x19c] sm:$0xf0] }
 0x244   :  { %v2626_v19 = vpop.f32.mrf.mxu3  ;;  %2789 = vmatmul.bf16.vlgmr.msra.gmra.mxu1 %v2635_v14  ;;  %3014 = vmatmul.bf16.vlgmr.msra.gmra.mxu3 %v2635_v14 }
 0x245   :  { %3027 = vmatmul.bf16.vlgmr.msrb.gmra.mxu0 %v2634_v46  ;;  %3482 = vmatpush.bf16.msra.mxu1 %v7271_v25  ;;  %v8722_v46 = vld [vmem:[#allocation7 + $0x18c] sm:$0xf0]  ;;  %v8697_v25 = vld [vmem:[#allocation7 + $0xcc] sm:$0xf]  ;;  %v8708_v19 = vld [vmem:[#allocation7 + $0x124] sm:$0xf] }
 0x246   :  { %3473 = vmatpush.bf16.msra.mxu0 %v7079_v29  ;;  %v7219_v36 = vor.u32 %v8722_v46, %v7218_v38  ;;  %3496 = vmatpush.bf16.msra.mxu2 %v7131_v44  ;;  %v7115_v29 = vor.u32 %v8695_v10, %v7114_v27  ;;  %v8717_v27 = vld [vmem:[#allocation7 + $0x16c] sm:$0xf] }
 0x247   :  { %v7215_v30 = vor.u32 %v8717_v27, %v7212_v28  ;;  %v7986_v28 = vld [vmem:[#allocation9 + $0x580] sm:$0xf] }
 0x248   :  { %3459 = vmatpush.bf16.msrb.mxu3 %v7219_v36  ;;  %v8691_v36 = vld [vmem:[#allocation7 + $0x94] sm:$0xf0] }
 0x249   :  { %3483 = vmatpush.bf16.msra.mxu1 %v7255_v23  ;;  %v7172_v23 = vld [vmem:[#allocation7 + $0x130] sm:$0xf0] }
 0x24a   :  { %3474 = vmatpush.bf16.msra.mxu0 %v7063_v45  ;;  %v7175_v26 = vor.u32 %v8708_v19, %v7172_v23  ;;  %3497 = vmatpush.bf16.msra.mxu2 %v7115_v29  ;;  %v7276_v45 = vld [vmem:[#allocation7 + $0x1f8] sm:$0xf0]  ;;  %v7055_v23 = vor.u32 %v8677_v17, %v7052_v47  ;;  %v8018_v17 = vld [vmem:[#allocation9 + $0x5c0] sm:$0xf] }
 0x24b   :  { %v7279_v46 = vor.u32 %v8733_v43, %v7276_v45  ;;  %v8713_v43 = vld [vmem:[#allocation7 + $0x14c] sm:$0xf]  ;;  %v7196_v45 = vld [vmem:[#allocation7 + $0x158] sm:$0xf0] }
 0x24c   :  { %3460 = vmatpush.bf16.msrb.mxu3 %v7203_v57  ;;  %v7082_v57 = vld [vmem:[#allocation7 + $0x68] sm:$0xf] }
 0x24d   :  { %3484 = vmatpush.bf16.msra.mxu1 %v7239_v39  ;;  %v7274_v39 = vld [vmem:[#allocation7 + $0x1e8] sm:$0xf]  ;;  %v7083_v60 = vor.u32 %v8687_v58, %v7082_v57  ;;  %v7164_v57 = vld [vmem:[#allocation7 + $0x118] sm:$0xf0] }
 0x24e   :  { %3475 = vmatpush.bf16.msra.mxu0 %v7047_v56  ;;  %v7275_v38 = vor.u32 %v8735_v15, %v7274_v39  ;;  %v7263_v56 = vor.u32 %v8729_v53, %v7260_v55  ;;  %v8715_v39 = vld [vmem:[#allocation7 + $0x154] sm:$0xf0] }
 0x24f   :  { %v7195_v15 = vor.u32 %v8715_v39, %v7194_v41  ;;  %v8707_v55 = vld [vmem:[#allocation7 + $0x114] sm:$0xf0]  ;;  %v8852_v41 = vld [vmem:[#allocation9 + $0x39c] sm:$0xf0] }
 0x250   :  { %3461 = vmatpush.bf16.msrb.mxu3 %v7187_v21  ;;  %v8242_v39 = vld [vmem:[#allocation9 + $0x780] sm:$0xf] }
 0x251   :  { %3485 = vmatpush.bf16.msra.mxu1 %v7223_v49  ;;  %v7099_v49 = vor.u32 %v8691_v36, %v7098_v42  ;;  %v7178_v42 = vld [vmem:[#allocation7 + $0x128] sm:$0xf]  ;;  %v8711_v36 = vld [vmem:[#allocation7 + $0x134] sm:$0xf0] }
 0x252   :  { %3476 = vmatpush.bf16.msra.mxu0 %v7031_v4  ;;  %v7243_v4 = vor.u32 %v8727_v1, %v7242_v0 }
 0x253   :  { %3498 = vmatpush.bf16.msra.mxu2 %v7099_v49  ;;  %v2827_v49 = vld [vmem:[%s9694_s8] sm:$0x3] }
 0x254   :  { %3040 = vmatmul.bf16.vlgmr.msrb.gmra.mxu1 %v2635_v14  ;;  %v7132_v14 = vld [vmem:[#allocation7 + $0xd8] sm:$0xf0]  ;;  %3462 = vmatpush.bf16.msrb.mxu3 %v7171_v24  ;;  %v7210_v24 = vld [vmem:[#allocation7 + $0x168] sm:$0xf] }
 0x255   :  { %3486 = vmatpush.bf16.msra.mxu1 %v7207_v61  ;;  %v7135_v18 = vor.u32 %v8697_v25, %v7132_v14  ;;  %v7084_v61 = vld [vmem:[#allocation7 + $0x78] sm:$0xf0]  ;;  %v7050_v25 = vld [vmem:[#allocation7 + $0x28] sm:$0xf]  ;;  %v8679_v14 = vld [vmem:[#allocation7 + $0x34] sm:$0xf0] }
 0x256   :  { %3521 = vmatpush.bf16.msrb.mxu0 %v7151_v6  ;;  %v7087_v62 = vor.u32 %v8685_v59, %v7084_v61  ;;  %v7068_v6 = vld [vmem:[#allocation7 + $0x58] sm:$0xf0]  ;;  %v2829_v59 = vperm.slane %v2827_v49, 0 }
 0x257   :  { %3499 = vmatpush.bf16.msra.mxu2 %v7083_v60  ;;  %v7071_v21 = vor.u32 %v8681_v20, %v7068_v6 }
 0x258   :  { %3463 = vmatpush.bf16.msrb.mxu3 %v7155_v34  ;;  %v7035_v34 = vor.u32 %v8675_v16, %v7034_v31  ;;  %v8916_v31 = vld [vmem:[#allocation9 + $0x59c] sm:$0xf0] }
 0x259   :  { %3487 = vmatpush.bf16.msra.mxu1 %v7191_v32  ;;  %v8721_v32 = vld [vmem:[#allocation7 + $0x18c] sm:$0xf] }
 0x25a   :  { %3522 = vmatpush.bf16.msrb.mxu0 %v7135_v18  ;;  %v7231_v44 = vor.u32 %v8721_v32, %v7228_v48  ;;  %v7051_v18 = vor.u32 %v8679_v14, %v7050_v25  ;;  %v7442_v48 = vld [vmem:[#allocation9 + $0x140] sm:$0xf] }
 0x25b   :  { %3500 = vmatpush.bf16.msra.mxu2 %v7067_v22  ;;  %v2830_v22 = vperm.slane %v2827_v49, 1  ;;  %v7762_v14 = vld [vmem:[#allocation9 + $0x3c0] sm:$0xf] }
 0x25c   :  { %3508 = vmatpush.bf16.msra.mxu3 %v7275_v38  ;;  %v9005_v38 = vld [vmem:[%s9692_s6] ss:$0 sm:$0xff] }
 0x25d   :  { %3488 = vmatpush.bf16.msra.mxu1 %v7175_v26  ;;  %v8719_v26 = vld [vmem:[#allocation7 + $0x174] sm:$0xf0]  ;;  %v7698_v49 = vld [vmem:[#allocation9 + $0x340] sm:$0xf] }
 0x25e   :  { %3523 = vmatpush.bf16.msrb.mxu0 %v7119_v33  ;;  %v7211_v10 = vor.u32 %v8719_v26, %v7210_v24  ;;  %v8673_v33 = vld [vmem:[#allocation7 + $0xc] sm:$0xf]  ;;  %v8988_v24 = vld [vmem:[#allocation9 + $0x7dc] sm:$0xf0] }
 0x25f   :  { %3501 = vmatpush.bf16.msra.mxu2 %v7051_v18  ;;  %v8924_v18 = vld [vmem:[#allocation9 + $0x5dc] sm:$0xf0] }
 0x260   :  { %3509 = vmatpush.bf16.msra.mxu3 %v7259_v54  ;;  %v7183_v54 = vor.u32 %v8709_v63, %v7180_v52  ;;  %v8019_v26 = vor.u32 %v8924_v18, %v8018_v17  ;;  %v8210_v52 = vld [vmem:[#allocation9 + $0x740] sm:$0xf]  ;;  %v8792_v17 = vld [vmem:[#allocation9 + $0x1c4] sm:$0xf] }
 0x261   :  { %3489 = vmatpush.bf16.msra.mxu1 %v7159_v40  ;;  %v7039_v40 = vor.u32 %v8673_v33, %v7036_v35  ;;  %v7730_v33 = vld [vmem:[#allocation9 + $0x380] sm:$0xf]  ;;  %v7508_v18 = vld [vmem:[#allocation9 + $0x1e0] sm:$0xf0] }
 0x262   :  { %3524 = vmatpush.bf16.msrb.mxu0 %v7103_v37  ;;  %v7179_v37 = vor.u32 %v8711_v36, %v7178_v42  ;;  %v8908_v42 = vld [vmem:[#allocation9 + $0x55c] sm:$0xf0]  ;;  %v7731_v63 = vor.u32 %v8852_v41, %v7730_v33 }
 0x263   :  { %3502 = vmatpush.bf16.msra.mxu2 %v7035_v34  ;;  %v8940_v33 = vld [vmem:[#allocation9 + $0x65c] sm:$0xf0] }
 0x264   :  { %3510 = vmatpush.bf16.msra.mxu3 %v7243_v4 }
 0x265   :  { %3534 = vmatpush.bf16.msrb.mxu1 %v7279_v46  ;;  %v7199_v46 = vor.u32 %v8713_v43, %v7196_v45  ;;  %v7378_v45 = vld [vmem:[#allocation9 + $0xc0] sm:$0xf] }
 0x266   :  { %3525 = vmatpush.bf16.msrb.mxu0 %v7087_v62  ;;  %v7163_v62 = vor.u32 %v8707_v55, %v7162_v51  ;;  %v8972_v51 = vld [vmem:[#allocation9 + $0x75c] sm:$0xf0] }
 0x268   :  { %3511 = vmatpush.bf16.msra.mxu3 %v7227_v13 }
 0x269   :  { %3535 = vmatpush.bf16.msrb.mxu1 %v7263_v56  ;;  %v8705_v56 = vld [vmem:[#allocation7 + $0x10c] sm:$0xf] }
 0x26a   :  { %3526 = vmatpush.bf16.msrb.mxu0 %v7071_v21  ;;  %v7167_v0 = vor.u32 %v8705_v56, %v7164_v57  ;;  %v7474_v21 = vld [vmem:[#allocation9 + $0x180] sm:$0xf] }
 0x26b   :  { %v7475_v32 = vor.u32 %v8788_v11, %v7474_v21  ;;  %v8756_v56 = vld [vmem:[#allocation9 + $0x9c] sm:$0xf0] }
 0x26c   :  { %3512 = vmatpush.bf16.msra.mxu3 %v7211_v10  ;;  %v7410_v10 = vld [vmem:[#allocation9 + $0x100] sm:$0xf] }
 0x26d   :  { %3536 = vmatpush.bf16.msrb.mxu1 %v7247_v7  ;;  %v8796_v7 = vld [vmem:[#allocation9 + $0x1dc] sm:$0xf0] }
 0x26e   :  { %3527 = vmatpush.bf16.msrb.mxu0 %v7055_v23  ;;  %v8274_v23 = vld [vmem:[#allocation9 + $0x7c0] sm:$0xf] }
 0x26f   :  { %v8275_v34 = vor.u32 %v8988_v24, %v8274_v23  ;;  %v7922_v57 = vld [vmem:[#allocation9 + $0x500] sm:$0xf] }
 0x270   :  { %3513 = vmatpush.bf16.msra.mxu3 %v7195_v15  ;;  %v7987_v15 = vor.u32 %v8916_v31, %v7986_v28  ;;  %v8828_v21 = vld [vmem:[#allocation9 + $0x2dc] sm:$0xf0] }
 0x271   :  { %3537 = vmatpush.bf16.msrb.mxu1 %v7231_v44  ;;  %v8780_v44 = vld [vmem:[#allocation9 + $0x15c] sm:$0xf0] }
 0x272   :  { %3528 = vmatpush.bf16.msrb.mxu0 %v7039_v40  ;;  %v7443_v27 = vor.u32 %v8780_v44, %v7442_v48  ;;  %v8980_v40 = vld [vmem:[#allocation9 + $0x79c] sm:$0xf0] }
 0x273   :  { %v8146_v11 = vld [vmem:[#allocation9 + $0x6c0] sm:$0xf] }
 0x274   :  { %3514 = vmatpush.bf16.msra.mxu3 %v7179_v37  ;;  %v8844_v37 = vld [vmem:[#allocation9 + $0x35c] sm:$0xf0] }
 0x275   :  { %3538 = vmatpush.bf16.msrb.mxu1 %v7215_v30  ;;  %v8772_v30 = vld [vmem:[#allocation9 + $0x11c] sm:$0xf0] }
 0x276   :  { %v7411_v43 = vor.u32 %v8772_v30, %v7410_v10  ;;  %v8740_v48 = vld [vmem:[#allocation9 + $0x1c] sm:$0xf0]  ;;  %v7476_v30 = vld [vmem:[#allocation9 + $0x1a0] sm:$0xf0] }
 0x277   :  { %v8948_v23 = vld [vmem:[#allocation9 + $0x69c] sm:$0xf0] }
 0x278   :  { %3515 = vmatpush.bf16.msra.mxu3 %v7163_v62  ;;  %v8836_v62 = vld [vmem:[#allocation9 + $0x31c] sm:$0xf0] }
 0x279   :  { %3539 = vmatpush.bf16.msrb.mxu1 %v7199_v46  ;;  %v7954_v46 = vld [vmem:[#allocation9 + $0x540] sm:$0xf] }
 0x27a   :  { %v7955_v55 = vor.u32 %v8908_v42, %v7954_v46  ;;  %v7570_v10 = vld [vmem:[#allocation9 + $0x240] sm:$0xf]  ;;  %v8848_v46 = vld [vmem:[#allocation9 + $0x384] sm:$0xf] }
 0x27b   :  { %v8812_v31 = vld [vmem:[#allocation9 + $0x25c] sm:$0xf0]  ;;  %v7732_v42 = vld [vmem:[#allocation9 + $0x3a0] sm:$0xf0] }
 0x27c   :  { %v7571_v41 = vor.u32 %v8812_v31, %v7570_v10  ;;  %v7348_v31 = vld [vmem:[#allocation9 + $0xa0] sm:$0xf0] }
 0x27d   :  { %3540 = vmatpush.bf16.msrb.mxu1 %v7183_v54  ;;  %v7346_v54 = vld [vmem:[#allocation9 + $0x80] sm:$0xf] }
 0x281   :  { %3541 = vmatpush.bf16.msrb.mxu1 %v7167_v0  ;;  %v8178_v0 = vld [vmem:[#allocation9 + $0x700] sm:$0xf] }
 0x2b1   :  { %v9564_v5 = vpop.f32.mrf.mxu0 }
 0x2b2   :  { %v2778_v53 = vadd.f32 %v9005_v38, %v9564_v5  ;;  %v7506_v5 = vld [vmem:[#allocation9 + $0x1c0] sm:$0xf] }
 0x2b3   :  { %v7507_v20 = vor.u32 %v8796_v7, %v7506_v5  ;;  %v8764_v38 = vld [vmem:[#allocation9 + $0xdc] sm:$0xf0] }
 0x2b4   :  { %v8748_v5 = vld [vmem:[#allocation9 + $0x5c] sm:$0xf0] }
 0x2b5   :  { %v7890_v7 = vld [vmem:[#allocation9 + $0x4c0] sm:$0xf] }
 0x2b7   :  { %v3002_v19 = vpop.f32.mrf.mxu2 }
 0x2b8   :  { %v3003_v1 = vadd.f32 %v3002_v19, %v2829_v59  ;;  %v8860_v19 = vld [vmem:[#allocation9 + $0x3dc] sm:$0xf0]  ;;  %v7699_v59 = vor.u32 %v8844_v37, %v7698_v49  ;;  %v7700_v49 = vld [vmem:[#allocation9 + $0x360] sm:$0xf0] }
 0x2b9   :  { %v2779_v29 = vpop.f32.mrf.mxu0  ;;  %v7763_v16 = vor.u32 %v8860_v19, %v7762_v14  ;;  %v8114_v19 = vld [vmem:[#allocation9 + $0x680] sm:$0xf]  ;;  %v8832_v37 = vld [vmem:[#allocation9 + $0x304] sm:$0xf] }
 0x2ba   :  { %v8115_v28 = vor.u32 %v8948_v23, %v8114_v19  ;;  %v8020_v19 = vld [vmem:[#allocation9 + $0x5e0] sm:$0xf0] }
 0x2bf   :  { %v3004_v50 = vpop.f32.mrf.mxu2 }
 0x2c0   :  { %v8243_v50 = vor.u32 %v8980_v40, %v8242_v39  ;;  %v7538_v40 = vld [vmem:[#allocation9 + $0x200] sm:$0xf] }
 0x2c1   :  { %v2790_v58 = vpop.f32.mrf.mxu1 }
 0x2c2   :  { %v2791_v60 = vadd.f32 %v2790_v58, %v2778_v53  ;;  %v3028_v61 = vpop.f32.mrf.mxu0  ;;  %v7379_v53 = vor.u32 %v8764_v38, %v7378_v45  ;;  %v8900_v58 = vld [vmem:[#allocation9 + $0x51c] sm:$0xf0] }
 0x2c3   :  { %v3029_v13 = vadd.f32 %v3028_v61, %v2830_v22  ;;  %v8211_v61 = vor.u32 %v8972_v51, %v8210_v52  ;;  %v7668_v52 = vld [vmem:[#allocation9 + $0x320] sm:$0xf0] }
 0x2c4   :  { %2794 = vst [vmem:[%s9699_s13] sm:$0xff] %v2791_v60  ;;  %v7666_v60 = vld [vmem:[#allocation9 + $0x300] sm:$0xf]  ;;  %v7671_v51 = vor.u32 %v8832_v37, %v7668_v52  ;;  %v8148_v37 = vld [vmem:[#allocation9 + $0x6e0] sm:$0xf0] }
 0x2c7   :  { %v3015_v2 = vpop.f32.mrf.mxu3 }
 0x2c8   :  { %v3016_v4 = vadd.f32 %v3015_v2, %v3003_v1  ;;  %v8964_v1 = vld [vmem:[#allocation9 + $0x71c] sm:$0xf0]  ;;  %v7347_v2 = vor.u32 %v8756_v56, %v7346_v54  ;;  %v8776_v56 = vld [vmem:[#allocation9 + $0x144] sm:$0xf] }
 0x2c9   :  { %v2792_v3 = vpop.f32.mrf.mxu1  ;;  %v8179_v22 = vor.u32 %v8964_v1, %v8178_v0  ;;  %v8884_v54 = vld [vmem:[#allocation9 + $0x49c] sm:$0xf0]  ;;  %v7636_v0 = vld [vmem:[#allocation9 + $0x2e0] sm:$0xf0] }
 0x2ca   :  { %v3045_v8 = vmax.f32 %v3016_v4, 0.0  ;;  %v3030_v9 = vpop.f32.mrf.mxu0  ;;  %v7314_v4 = vld [vmem:[#allocation9 + $0x40] sm:$0xf]  ;;  %v7923_v3 = vor.u32 %v8900_v58, %v7922_v57  ;;  %v7444_v57 = vld [vmem:[#allocation9 + $0x160] sm:$0xf0] }
 0x2cb   :  { %v7667_v9 = vor.u32 %v8836_v62, %v7666_v60  ;;  %v7447_v58 = vor.u32 %v8776_v56, %v7444_v57  ;;  %v8932_v60 = vld [vmem:[#allocation9 + $0x61c] sm:$0xf0]  ;;  %v8984_v1 = vld [vmem:[#allocation9 + $0x7c4] sm:$0xf] }
 0x2cc   :  { %v9576_v6 = vpack.c.bf16 %v3045_v8, %v3045_v8  ;;  %v8892_v8 = vld [vmem:[#allocation9 + $0x4dc] sm:$0xf0]  ;;  %v7924_v56 = vld [vmem:[#allocation9 + $0x520] sm:$0xf0] }
 0x2ce   :  { %3451 = vmatmul.bf16.vlgmr.msrb.gmra.mxu2 %v9576_v6  ;;  %3477 = vmatmul.bf16.vlgmr.msra.gmra.mxu0 %v9576_v6 }
 0x2cf   :  { %v3017_v12 = vpop.f32.mrf.mxu3  ;;  %5109 = vmatpush.bf16.msrb.mxu2 %v7507_v20  ;;  %5135 = vmatpush.bf16.msra.mxu0 %v8019_v26  ;;  %v7634_v20 = vld [vmem:[#allocation9 + $0x2c0] sm:$0xf]  ;;  %v7511_v26 = vor.u32 %v8792_v17, %v7508_v18  ;;  %v7380_v17 = vld [vmem:[#allocation9 + $0xe0] sm:$0xf0] }
 0x2d0   :  { %v8956_v12 = vld [vmem:[#allocation9 + $0x6dc] sm:$0xf0]  ;;  %v7635_v44 = vor.u32 %v8828_v21, %v7634_v20  ;;  %v7412_v20 = vld [vmem:[#allocation9 + $0x120] sm:$0xf0] }
 0x2d1   :  { %v3041_v25 = vpop.f32.mrf.mxu1  ;;  %v8147_v14 = vor.u32 %v8956_v12, %v8146_v11  ;;  %v8816_v21 = vld [vmem:[#allocation9 + $0x284] sm:$0xf] }
 0x2d2   :  { %v3042_v47 = vadd.f32 %v3041_v25, %v3029_v13  ;;  %v7282_v13 = vld [vmem:[#allocation9] sm:$0xf]  ;;  %v7604_v11 = vld [vmem:[#allocation9 + $0x2a0] sm:$0xf0] }
 0x2d3   :  { %5110 = vmatpush.bf16.msrb.mxu2 %v7475_v32  ;;  %5136 = vmatpush.bf16.msra.mxu0 %v7987_v15  ;;  %v7891_v32 = vor.u32 %v8892_v8, %v7890_v7  ;;  %v7602_v25 = vld [vmem:[#allocation9 + $0x280] sm:$0xf]  ;;  %v7283_v24 = vor.u32 %v8740_v48, %v7282_v13  ;;  %v8856_v15 = vld [vmem:[#allocation9 + $0x3c4] sm:$0xf] }
 0x2d4   :  { %v3046_v29 = vmax.f32 %v3042_v47, 0.0  ;;  %v8820_v47 = vld [vmem:[#allocation9 + $0x29c] sm:$0xf0]  ;;  %v8976_v12 = vld [vmem:[#allocation9 + $0x784] sm:$0xf] }
 0x2d5   :  { %v8876_v7 = vld [vmem:[#allocation9 + $0x45c] sm:$0xf0]  ;;  %v8920_v18 = vld [vmem:[#allocation9 + $0x5c4] sm:$0xf] }
 0x2d6   :  { %v9580_v35 = vpack.c.bf16 %v3046_v29, %v3046_v29  ;;  %v8784_v29 = vld [vmem:[#allocation9 + $0x184] sm:$0xf]  ;;  %v7794_v13 = vld [vmem:[#allocation9 + $0x400] sm:$0xf]  ;;  %v8023_v23 = vor.u32 %v8920_v18, %v8020_v19 }
 0x2d7   :  { %5111 = vmatpush.bf16.msrb.mxu2 %v7443_v27  ;;  %5137 = vmatpush.bf16.msra.mxu0 %v7955_v55  ;;  %v7603_v27 = vor.u32 %v8820_v47, %v7602_v25  ;;  %v8868_v48 = vld [vmem:[#allocation9 + $0x41c] sm:$0xf0] }
 0x2d8   :  { %3464 = vmatmul.bf16.vlgmr.msrb.gmra.mxu3 %v9580_v35  ;;  %3490 = vmatmul.bf16.vlgmr.msra.gmra.mxu1 %v9580_v35  ;;  %v7795_v25 = vor.u32 %v8868_v48, %v7794_v13  ;;  %v7796_v13 = vld [vmem:[#allocation9 + $0x420] sm:$0xf0] }
 0x2d9   :  { %v3043_v36 = vpop.f32.mrf.mxu1  ;;  %5122 = vmatpush.bf16.msrb.mxu3 %v7763_v16  ;;  %5148 = vmatpush.bf16.msra.mxu1 %v8275_v34  ;;  %v8082_v16 = vld [vmem:[#allocation9 + $0x640] sm:$0xf]  ;;  %v7479_v34 = vor.u32 %v8784_v29, %v7476_v30  ;;  %v8752_v30 = vld [vmem:[#allocation9 + $0x84] sm:$0xf] }
 0x2da   :  { %v8083_v39 = vor.u32 %v8940_v33, %v8082_v16  ;;  %v7735_v36 = vor.u32 %v8848_v46, %v7732_v42  ;;  %v8912_v16 = vld [vmem:[#allocation9 + $0x584] sm:$0xf]  ;;  %v7351_v33 = vor.u32 %v8752_v30, %v7348_v31  ;;  %v7738_v30 = vld [vmem:[#allocation9 + $0x388] sm:$0xf] }
 0x2db   :  { %5112 = vmatpush.bf16.msrb.mxu2 %v7411_v43  ;;  %5138 = vmatpush.bf16.msra.mxu0 %v7923_v3  ;;  %v7764_v43 = vld [vmem:[#allocation9 + $0x3e0] sm:$0xf0]  ;;  %v8853_v31 = vld [vmem:[#allocation9 + $0x3a4] sm:$0xf0] }
 0x2dc   :  { %v7767_v38 = vor.u32 %v8856_v15, %v7764_v43  ;;  %v8180_v43 = vld [vmem:[#allocation9 + $0x720] sm:$0xf0] }
 0x2dd   :  { %5123 = vmatpush.bf16.msrb.mxu3 %v7731_v63  ;;  %5149 = vmatpush.bf16.msra.mxu1 %v8243_v50  ;;  %v8840_v63 = vld [vmem:[#allocation9 + $0x344] sm:$0xf] }
 0x2de   :  { %3503 = vmatmul.bf16.vlgmr.msra.gmra.mxu2 %v9576_v6  ;;  %3529 = vmatmul.bf16.vlgmr.msrb.gmra.mxu0 %v9576_v6  ;;  %v7315_v6 = vor.u32 %v8748_v5, %v7314_v4  ;;  %v7703_v50 = vor.u32 %v8840_v63, %v7700_v49  ;;  %v7826_v5 = vld [vmem:[#allocation9 + $0x440] sm:$0xf]  ;;  %v7316_v46 = vld [vmem:[#allocation9 + $0x60] sm:$0xf0] }
 0x2df   :  { %5113 = vmatpush.bf16.msrb.mxu2 %v7379_v53  ;;  %5139 = vmatpush.bf16.msra.mxu0 %v7891_v32  ;;  %v7858_v53 = vld [vmem:[#allocation9 + $0x480] sm:$0xf]  ;;  %v7827_v8 = vor.u32 %v8876_v7, %v7826_v5  ;;  %v8244_v32 = vld [vmem:[#allocation9 + $0x7a0] sm:$0xf0] }
 0x2e0   :  { %v7859_v55 = vor.u32 %v8884_v54, %v7858_v53  ;;  %v7956_v63 = vld [vmem:[#allocation9 + $0x560] sm:$0xf0] }
 0x2e1   :  { %5124 = vmatpush.bf16.msrb.mxu3 %v7699_v59  ;;  %5150 = vmatpush.bf16.msra.mxu1 %v8211_v61  ;;  %v8050_v59 = vld [vmem:[#allocation9 + $0x600] sm:$0xf]  ;;  %v8824_v61 = vld [vmem:[#allocation9 + $0x2c4] sm:$0xf] }
 0x2e2   :  { %v8051_v62 = vor.u32 %v8932_v60, %v8050_v59  ;;  %v7639_v4 = vor.u32 %v8824_v61, %v7636_v0  ;;  %v7284_v53 = vld [vmem:[#allocation9 + $0x20] sm:$0xf0] }
 0x2e3   :  { %5114 = vmatpush.bf16.msrb.mxu2 %v7347_v2  ;;  %5140 = vmatpush.bf16.msra.mxu0 %v7859_v55  ;;  %v8276_v2 = vld [vmem:[#allocation9 + $0x7e0] sm:$0xf0] }
 0x2e4   :  { %v8279_v3 = vor.u32 %v8984_v1, %v8276_v2  ;;  %v8896_v54 = vld [vmem:[#allocation9 + $0x504] sm:$0xf] }
 0x2e5   :  { %5125 = vmatpush.bf16.msrb.mxu3 %v7667_v9  ;;  %5151 = vmatpush.bf16.msra.mxu1 %v8179_v22  ;;  %v8768_v9 = vld [vmem:[#allocation9 + $0x104] sm:$0xf]  ;;  %v7927_v57 = vor.u32 %v8896_v54, %v7924_v56  ;;  %v7450_v56 = vld [vmem:[#allocation9 + $0x148] sm:$0xf] }
 0x2e6   :  { %v7415_v22 = vor.u32 %v8768_v9, %v7412_v20  ;;  %v8116_v59 = vld [vmem:[#allocation9 + $0x6a0] sm:$0xf0] }
 0x2e7   :  { %5115 = vmatpush.bf16.msrb.mxu2 %v7315_v6  ;;  %5141 = vmatpush.bf16.msra.mxu0 %v7827_v8  ;;  %v7607_v6 = vor.u32 %v8816_v21, %v7604_v11  ;;  %v8888_v61 = vld [vmem:[#allocation9 + $0x4c4] sm:$0xf] }
 0x2e8   :  { %3516 = vmatmul.bf16.vlgmr.msra.gmra.mxu3 %v9580_v35  ;;  %3542 = vmatmul.bf16.vlgmr.msrb.gmra.mxu1 %v9580_v35  ;;  %v8804_v35 = vld [vmem:[#allocation9 + $0x21c] sm:$0xf0]  ;;  %v8936_v1 = vld [vmem:[#allocation9 + $0x644] sm:$0xf] }
 0x2e9   :  { %5126 = vmatpush.bf16.msrb.mxu3 %v7635_v44  ;;  %5152 = vmatpush.bf16.msra.mxu1 %v8147_v14  ;;  %v7539_v45 = vor.u32 %v8804_v35, %v7538_v40  ;;  %v8247_v44 = vor.u32 %v8976_v12, %v8244_v32  ;;  %v8760_v14 = vld [vmem:[#allocation9 + $0xc4] sm:$0xf] }
 0x2ea   :  { %v7383_v47 = vor.u32 %v8760_v14, %v7380_v17  ;;  %v7540_v40 = vld [vmem:[#allocation9 + $0x220] sm:$0xf0] }
 0x2eb   :  { %5116 = vmatpush.bf16.msrb.mxu2 %v7283_v24  ;;  %5142 = vmatpush.bf16.msra.mxu0 %v7795_v25  ;;  %v8808_v24 = vld [vmem:[#allocation9 + $0x244] sm:$0xf] }
 0x2ec   :  { %v8960_v35 = vld [vmem:[#allocation9 + $0x704] sm:$0xf] }
 0x2ed   :  { %5127 = vmatpush.bf16.msrb.mxu3 %v7603_v27  ;;  %5153 = vmatpush.bf16.msra.mxu1 %v8115_v28  ;;  %v8968_v27 = vld [vmem:[#allocation9 + $0x744] sm:$0xf] }
 0x2ee   :  { %v8212_v28 = vld [vmem:[#allocation9 + $0x760] sm:$0xf0] }
 0x2ef   :  { %5161 = vmatpush.bf16.msra.mxu2 %v7511_v26  ;;  %v7572_v26 = vld [vmem:[#allocation9 + $0x260] sm:$0xf0]  ;;  %5187 = vmatpush.bf16.msrb.mxu0 %v8023_v23  ;;  %v8215_v29 = vor.u32 %v8968_v27, %v8212_v28  ;;  %v7770_v23 = vld [vmem:[#allocation9 + $0x3c8] sm:$0xf] }
 0x2f0   :  { %v7575_v10 = vor.u32 %v8808_v24, %v7572_v26  ;;  %v8084_v2 = vld [vmem:[#allocation9 + $0x660] sm:$0xf0]  ;;  %v8861_v24 = vld [vmem:[#allocation9 + $0x3e4] sm:$0xf0] }
 0x2f1   :  { %5128 = vmatpush.bf16.msrb.mxu3 %v7571_v41  ;;  %5154 = vmatpush.bf16.msra.mxu1 %v8083_v39  ;;  %v8800_v39 = vld [vmem:[#allocation9 + $0x204] sm:$0xf] }
 0x2f2   :  { %v7543_v15 = vor.u32 %v8800_v39, %v7540_v40  ;;  %v7860_v5 = vld [vmem:[#allocation9 + $0x4a0] sm:$0xf0]  ;;  %v8797_v39 = vld [vmem:[#allocation9 + $0x1e4] sm:$0xf0] }
 0x2f3   :  { %5162 = vmatpush.bf16.msra.mxu2 %v7479_v34  ;;  %v7988_v34 = vld [vmem:[#allocation9 + $0x5a0] sm:$0xf0] }
 0x2f4   :  { %v7991_v41 = vor.u32 %v8912_v16, %v7988_v34  ;;  %v8928_v8 = vld [vmem:[#allocation9 + $0x604] sm:$0xf] }
 0x2f5   :  { %5129 = vmatpush.bf16.msrb.mxu3 %v7539_v45  ;;  %5155 = vmatpush.bf16.msra.mxu1 %v8051_v62  ;;  %v8183_v45 = vor.u32 %v8960_v35, %v8180_v43  ;;  %v7892_v62 = vld [vmem:[#allocation9 + $0x4e0] sm:$0xf0]  ;;  %v7739_v35 = vor.u32 %v8853_v31, %v7738_v30  ;;  %v7706_v43 = vld [vmem:[#allocation9 + $0x348] sm:$0xf] }
 0x2f6   :  { %5188 = vmatpush.bf16.msrb.mxu0 %v7991_v41  ;;  %v7895_v0 = vor.u32 %v8888_v61, %v7892_v62  ;;  %v8052_v9 = vld [vmem:[#allocation9 + $0x620] sm:$0xf0]  ;;  %v7514_v41 = vld [vmem:[#allocation9 + $0x1c8] sm:$0xf] }
 0x2f7   :  { %5163 = vmatpush.bf16.msra.mxu2 %v7447_v58  ;;  %v8944_v58 = vld [vmem:[#allocation9 + $0x684] sm:$0xf]  ;;  %v8055_v20 = vor.u32 %v8928_v8, %v8052_v9  ;;  %v7642_v61 = vld [vmem:[#allocation9 + $0x2c8] sm:$0xf] }
 0x2f8   :  { %v8119_v60 = vor.u32 %v8944_v58, %v8116_v59  ;;  %v8872_v21 = vld [vmem:[#allocation9 + $0x444] sm:$0xf] }
 0x2f9   :  { %5174 = vmatpush.bf16.msra.mxu3 %v7767_v38  ;;  %5200 = vmatpush.bf16.msrb.mxu1 %v8279_v3  ;;  %v8744_v38 = vld [vmem:[#allocation9 + $0x44] sm:$0xf] }
 0x2fa   :  { %v7319_v42 = vor.u32 %v8744_v38, %v7316_v46  ;;  %v8880_v3 = vld [vmem:[#allocation9 + $0x484] sm:$0xf]  ;;  %v7515_v38 = vor.u32 %v8797_v39, %v7514_v41  ;;  %v7994_v41 = vld [vmem:[#allocation9 + $0x588] sm:$0xf] }
 0x2fb   :  { %5164 = vmatpush.bf16.msra.mxu2 %v7415_v22  ;;  %v7863_v7 = vor.u32 %v8880_v3, %v7860_v5  ;;  %v7828_v11 = vld [vmem:[#allocation9 + $0x460] sm:$0xf0]  ;;  %v7418_v5 = vld [vmem:[#allocation9 + $0x108] sm:$0xf] }
 0x2fc   :  { %v7831_v12 = vor.u32 %v8872_v21, %v7828_v11  ;;  %v8864_v32 = vld [vmem:[#allocation9 + $0x404] sm:$0xf]  ;;  %v8917_v39 = vld [vmem:[#allocation9 + $0x5a4] sm:$0xf0] }
 0x2fd   :  { %5175 = vmatpush.bf16.msra.mxu3 %v7735_v36  ;;  %5201 = vmatpush.bf16.msrb.mxu1 %v8247_v44  ;;  %v8904_v36 = vld [vmem:[#allocation9 + $0x544] sm:$0xf]  ;;  %v7799_v44 = vor.u32 %v8864_v32, %v7796_v13  ;;  %v8981_v32 = vld [vmem:[#allocation9 + $0x7a4] sm:$0xf0] }
 0x2fe   :  { %v7959_v49 = vor.u32 %v8904_v36, %v7956_v63  ;;  %v7482_v36 = vld [vmem:[#allocation9 + $0x188] sm:$0xf] }
 0x2ff   :  { %5165 = vmatpush.bf16.msra.mxu2 %v7383_v47  ;;  %v8789_v63 = vld [vmem:[#allocation9 + $0x1a4] sm:$0xf0] }
 0x300   :  { %5189 = vmatpush.bf16.msrb.mxu0 %v7959_v49  ;;  %v7483_v54 = vor.u32 %v8789_v63, %v7482_v36  ;;  %v7995_v63 = vor.u32 %v8917_v39, %v7994_v41  ;;  %v8933_v41 = vld [vmem:[#allocation9 + $0x624] sm:$0xf0]  ;;  %v8825_v39 = vld [vmem:[#allocation9 + $0x2cc] sm:$0xf] }
 0x301   :  { %5176 = vmatpush.bf16.msra.mxu3 %v7703_v50  ;;  %5202 = vmatpush.bf16.msrb.mxu1 %v8215_v29  ;;  %v8952_v50 = vld [vmem:[#allocation9 + $0x6c4] sm:$0xf] }
 0x302   :  { %v8151_v52 = vor.u32 %v8952_v50, %v8148_v37  ;;  %v7674_v37 = vld [vmem:[#allocation9 + $0x308] sm:$0xf] }
 0x303   :  { %5166 = vmatpush.bf16.msra.mxu2 %v7351_v33 }
 0x304   :  { %5190 = vmatpush.bf16.msrb.mxu0 %v7927_v57  ;;  %v8781_v57 = vld [vmem:[#allocation9 + $0x164] sm:$0xf0] }
 0x305   :  { %5177 = vmatpush.bf16.msra.mxu3 %v7671_v51  ;;  %5203 = vmatpush.bf16.msrb.mxu1 %v8183_v45  ;;  %v8736_v51 = vld [vmem:[#allocation9 + $0x4] sm:$0xf]  ;;  %v8845_v45 = vld [vmem:[#allocation9 + $0x364] sm:$0xf0] }
 0x306   :  { %v7287_v55 = vor.u32 %v8736_v51, %v7284_v53  ;;  %v7707_v50 = vor.u32 %v8845_v45, %v7706_v43  ;;  %v8805_v43 = vld [vmem:[#allocation9 + $0x224] sm:$0xf0] }
 0x307   :  { %5167 = vmatpush.bf16.msra.mxu2 %v7319_v42  ;;  %v8186_v45 = vld [vmem:[#allocation9 + $0x708] sm:$0xf] }
 0x308   :  { %5191 = vmatpush.bf16.msrb.mxu0 %v7895_v0  ;;  %v8829_v0 = vld [vmem:[#allocation9 + $0x2e4] sm:$0xf0] }
 0x309   :  { %5178 = vmatpush.bf16.msra.mxu3 %v7639_v4  ;;  %5204 = vmatpush.bf16.msrb.mxu1 %v8151_v52  ;;  %v8087_v4 = vor.u32 %v8936_v1, %v8084_v2  ;;  %v8837_v52 = vld [vmem:[#allocation9 + $0x324] sm:$0xf0]  ;;  %v7643_v9 = vor.u32 %v8829_v0, %v7642_v61  ;;  %v8849_v61 = vld [vmem:[#allocation9 + $0x38c] sm:$0xf] }
 0x30a   :  { %v8282_v1 = vld [vmem:[#allocation9 + $0x7c8] sm:$0xf] }
 0x30b   :  { %5168 = vmatpush.bf16.msra.mxu2 %v7287_v55  ;;  %v8989_v2 = vld [vmem:[#allocation9 + $0x7e4] sm:$0xf0] }
 0x30c   :  { %5192 = vmatpush.bf16.msrb.mxu0 %v7863_v7  ;;  %v8773_v7 = vld [vmem:[#allocation9 + $0x124] sm:$0xf0] }
 0x30d   :  { %5179 = vmatpush.bf16.msra.mxu3 %v7607_v6  ;;  %5205 = vmatpush.bf16.msrb.mxu1 %v8119_v60  ;;  %v9591_v6 = vld [vmem:[%s9696_s10] sm:$0xf]  ;;  %v7675_v60 = vor.u32 %v8837_v52, %v7674_v37  ;;  %v7322_v37 = vld [vmem:[#allocation9 + $0x48] sm:$0xf] }
 0x30e   :  { %v3116_v48 = vperm.slane %v9591_v6, 1  ;;  %v3115_v47 = vperm.slane %v9591_v6, 0  ;;  %v3118_v42 = vperm.slane %v9591_v6, 3  ;;  %v3117_v58 = vperm.slane %v9591_v6, 2  ;;  %v8250_v6 = vld [vmem:[#allocation9 + $0x788] sm:$0xf] }
 0x30f   :  { %v8749_v52 = vld [vmem:[#allocation9 + $0x64] sm:$0xf0] }
 0x310   :  { %5193 = vmatpush.bf16.msrb.mxu0 %v7831_v12  ;;  %v8821_v12 = vld [vmem:[#allocation9 + $0x2a4] sm:$0xf0] }
 0x311   :  { %5180 = vmatpush.bf16.msra.mxu3 %v7575_v10  ;;  %5206 = vmatpush.bf16.msrb.mxu1 %v8087_v4  ;;  %v7771_v10 = vor.u32 %v8861_v24, %v7770_v23  ;;  %v7451_v4 = vor.u32 %v8781_v57, %v7450_v56  ;;  %v8251_v23 = vor.u32 %v8981_v32, %v8250_v6  ;;  %v7578_v24 = vld [vmem:[#allocation9 + $0x248] sm:$0xf]  ;;  %v7708_v6 = vld [vmem:[#allocation9 + $0x368] sm:$0xf0] }
 0x312   :  { %v8154_v57 = vld [vmem:[#allocation9 + $0x6c8] sm:$0xf] }
 0x313   :  { %v7290_v0 = vld [vmem:[#allocation9 + $0x8] sm:$0xf] }
 0x314   :  { %5194 = vmatpush.bf16.msrb.mxu0 %v7799_v44  ;;  %v7386_v44 = vld [vmem:[#allocation9 + $0xc8] sm:$0xf] }
 0x315   :  { %5181 = vmatpush.bf16.msra.mxu3 %v7543_v15  ;;  %5207 = vmatpush.bf16.msrb.mxu1 %v8055_v20  ;;  %v8283_v20 = vor.u32 %v8989_v2, %v8282_v1  ;;  %v8741_v1 = vld [vmem:[#allocation9 + $0x24] sm:$0xf0] }
 0x316   :  { %v7930_v2 = vld [vmem:[#allocation9 + $0x508] sm:$0xf] }
 0x34b   :  { %v3478_v22 = vpop.f32.mrf.mxu0 }
 0x34c   :  { %v3479_v17 = vadd.f32 %v3478_v22, %v3116_v48  ;;  %v7610_v22 = vld [vmem:[#allocation9 + $0x288] sm:$0xf]  ;;  %v7419_v48 = vor.u32 %v8773_v7, %v7418_v5  ;;  %v8793_v5 = vld [vmem:[#allocation9 + $0x1cc] sm:$0xf] }
 0x34d   :  { %v7516_v7 = vld [vmem:[#allocation9 + $0x1e8] sm:$0xf0] }
 0x34e   :  { %v7519_v32 = vor.u32 %v8793_v5, %v7516_v7  ;;  %v8969_v5 = vld [vmem:[#allocation9 + $0x74c] sm:$0xf] }
 0x34f   :  { %v8220_v7 = vld [vmem:[#allocation9 + $0x768] sm:$0xf0] }
 0x351   :  { %v3452_v25 = vpop.f32.mrf.mxu2 }
 0x352   :  { %v3453_v28 = vadd.f32 %v3452_v25, %v3115_v47 }
 0x353   :  { %v3480_v14 = vpop.f32.mrf.mxu0 }
 0x354   :  { %v8765_v14 = vld [vmem:[#allocation9 + $0xe4] sm:$0xf0] }
 0x355   :  { %v3491_v18 = vpop.f32.mrf.mxu1  ;;  %v7387_v30 = vor.u32 %v8765_v14, %v7386_v44  ;;  %v7484_v14 = vld [vmem:[#allocation9 + $0x1a8] sm:$0xf0] }
 0x356   :  { %v3492_v19 = vadd.f32 %v3491_v18, %v3479_v17  ;;  %v8026_v17 = vld [vmem:[#allocation9 + $0x5c8] sm:$0xf] }
 0x357   :  { %v8925_v18 = vld [vmem:[#allocation9 + $0x5e4] sm:$0xf0] }
 0x358   :  { %v3548_v26 = vmax.f32 %v3492_v19, 0.0  ;;  %v7611_v19 = vor.u32 %v8821_v12, %v7610_v22  ;;  %v8027_v31 = vor.u32 %v8925_v18, %v8026_v17  ;;  %v7291_v22 = vor.u32 %v8741_v1, %v7290_v0  ;;  %v8841_v12 = vld [vmem:[#allocation9 + $0x34c] sm:$0xf]  ;;  %v8090_v18 = vld [vmem:[#allocation9 + $0x648] sm:$0xf] }
 0x359   :  { %v3454_v27 = vpop.f32.mrf.mxu2  ;;  %v7711_v17 = vor.u32 %v8841_v12, %v7708_v6  ;;  %v7996_v12 = vld [vmem:[#allocation9 + $0x5a8] sm:$0xf0] }
 0x35a   :  { %v9595_v29 = vpack.c.bf16 %v3548_v26, %v3548_v26  ;;  %v8813_v26 = vld [vmem:[#allocation9 + $0x264] sm:$0xf0] }
 0x35b   :  { %v3465_v16 = vpop.f32.mrf.mxu3  ;;  %v3530_v33 = vpop.f32.mrf.mxu0 }
 0x35c   :  { %v3466_v34 = vadd.f32 %v3465_v16, %v3453_v28  ;;  %5130 = vmatmul.bf16.vlgmr.msrb.gmra.mxu3 %v9595_v29  ;;  %v3531_v55 = vadd.f32 %v3530_v33, %v3118_v42  ;;  %v8973_v28 = vld [vmem:[#allocation9 + $0x764] sm:$0xf0] }
 0x35d   :  { %5226 = vmatpush.bf16.msrb.mxu3 %v7771_v10  ;;  %v3493_v40 = vpop.f32.mrf.mxu1  ;;  %v8218_v10 = vld [vmem:[#allocation9 + $0x748] sm:$0xf] }
 0x35e   :  { %v3547_v15 = vmax.f32 %v3466_v34, 0.0  ;;  %v7354_v16 = vld [vmem:[#allocation9 + $0x88] sm:$0xf]  ;;  %v7579_v40 = vor.u32 %v8813_v26, %v7578_v24  ;;  %v7676_v24 = vld [vmem:[#allocation9 + $0x328] sm:$0xf0] }
 0x35f   :  { %v8757_v34 = vld [vmem:[#allocation9 + $0xa4] sm:$0xf0] }
 0x360   :  { %v9598_v46 = vpack.c.bf16 %v3547_v15, %v3547_v15  ;;  %v7546_v15 = vld [vmem:[#allocation9 + $0x208] sm:$0xf]  ;;  %v7355_v36 = vor.u32 %v8757_v34, %v7354_v16 }
 0x361   :  { %5227 = vmatpush.bf16.msrb.mxu3 %v7739_v35  ;;  %v3504_v49 = vpop.f32.mrf.mxu2  ;;  %v8219_v35 = vor.u32 %v8973_v28, %v8218_v10  ;;  %v8885_v10 = vld [vmem:[#allocation9 + $0x4a4] sm:$0xf0] }
 0x362   :  { %5117 = vmatmul.bf16.vlgmr.msrb.gmra.mxu2 %v9598_v46  ;;  %v3505_v21 = vadd.f32 %v3504_v49, %v3117_v58  ;;  %v8857_v49 = vld [vmem:[#allocation9 + $0x3cc] sm:$0xf]  ;;  %v8957_v58 = vld [vmem:[#allocation9 + $0x6e4] sm:$0xf0] }
 0x363   :  { %5213 = vmatpush.bf16.msrb.mxu2 %v7515_v38  ;;  %v3467_v51 = vpop.f32.mrf.mxu3  ;;  %v3532_v53 = vpop.f32.mrf.mxu0  ;;  %v8965_v38 = vld [vmem:[#allocation9 + $0x724] sm:$0xf0] }
 0x364   :  { %v7962_v51 = vld [vmem:[#allocation9 + $0x548] sm:$0xf] }
 0x365   :  { %5228 = vmatpush.bf16.msrb.mxu3 %v7707_v50  ;;  %v3543_v59 = vpop.f32.mrf.mxu1  ;;  %v7772_v50 = vld [vmem:[#allocation9 + $0x3e8] sm:$0xf0]  ;;  %v8909_v53 = vld [vmem:[#allocation9 + $0x564] sm:$0xf0] }
 0x366   :  { %v3544_v62 = vadd.f32 %v3543_v59, %v3531_v55  ;;  %v8187_v55 = vor.u32 %v8965_v38, %v8186_v45  ;;  %v7775_v56 = vor.u32 %v8857_v49, %v7772_v50  ;;  %v7323_v59 = vor.u32 %v8749_v52, %v7322_v37  ;;  %v8058_v34 = vld [vmem:[#allocation9 + $0x608] sm:$0xf]  ;;  %v7420_v49 = vld [vmem:[#allocation9 + $0x128] sm:$0xf0] }
 0x367   :  { %5214 = vmatpush.bf16.msrb.mxu2 %v7483_v54  ;;  %v7547_v54 = vor.u32 %v8805_v43, %v7546_v15  ;;  %v8985_v15 = vld [vmem:[#allocation9 + $0x7cc] sm:$0xf]  ;;  %v7834_v38 = vld [vmem:[#allocation9 + $0x448] sm:$0xf] }
 0x368   :  { %v3550_v3 = vmax.f32 %v3544_v62, 0.0  ;;  %v7740_v62 = vld [vmem:[#allocation9 + $0x3a8] sm:$0xf0] }
 0x369   :  { %5229 = vmatpush.bf16.msrb.mxu3 %v7675_v60  ;;  %v3506_v8 = vpop.f32.mrf.mxu2  ;;  %v7963_v60 = vor.u32 %v8909_v53, %v7962_v51  ;;  %v8284_v43 = vld [vmem:[#allocation9 + $0x7e8] sm:$0xf0] }
 0x36a   :  { %v9603_v11 = vpack.c.bf16 %v3550_v3, %v3550_v3  ;;  %v8155_v3 = vor.u32 %v8957_v58, %v8154_v57  ;;  %v7743_v8 = vor.u32 %v8849_v61, %v7740_v62  ;;  %v8287_v37 = vor.u32 %v8985_v15, %v8284_v43  ;;  %v8817_v52 = vld [vmem:[#allocation9 + $0x28c] sm:$0xf]  ;;  %v7802_v57 = vld [vmem:[#allocation9 + $0x408] sm:$0xf] }
 0x36b   :  { %5215 = vmatpush.bf16.msrb.mxu2 %v7451_v4  ;;  %v3517_v13 = vpop.f32.mrf.mxu3  ;;  %v8901_v4 = vld [vmem:[#allocation9 + $0x524] sm:$0xf0]  ;;  %v7612_v53 = vld [vmem:[#allocation9 + $0x2a8] sm:$0xf0] }
 0x36c   :  { %v3518_v25 = vadd.f32 %v3517_v13, %v3505_v21  ;;  %5156 = vmatmul.bf16.vlgmr.msra.gmra.mxu1 %v9603_v11  ;;  %5182 = vmatmul.bf16.vlgmr.msra.gmra.mxu3 %v9595_v29  ;;  %v7931_v21 = vor.u32 %v8901_v4, %v7930_v2  ;;  %v7898_v13 = vld [vmem:[#allocation9 + $0x4c8] sm:$0xf]  ;;  %v8921_v61 = vld [vmem:[#allocation9 + $0x5cc] sm:$0xf]  ;;  %v7615_v0 = vor.u32 %v8817_v52, %v7612_v53  ;;  %v7714_v52 = vld [vmem:[#allocation9 + $0x350] sm:$0xf] }
 0x36d   :  { %5230 = vmatpush.bf16.msrb.mxu3 %v7643_v9  ;;  %5252 = vmatpush.bf16.msra.mxu1 %v8283_v20  ;;  %v3545_v47 = vpop.f32.mrf.mxu1  ;;  %v8122_v9 = vld [vmem:[#allocation9 + $0x688] sm:$0xf]  ;;  %v8028_v62 = vld [vmem:[#allocation9 + $0x5e8] sm:$0xf0] }
 0x36e   :  { %v3549_v27 = vmax.f32 %v3518_v25, 0.0  ;;  %v8949_v20 = vld [vmem:[#allocation9 + $0x6a4] sm:$0xf0]  ;;  %v8785_v25 = vld [vmem:[#allocation9 + $0x18c] sm:$0xf] }
 0x36f   :  { %5216 = vmatpush.bf16.msrb.mxu2 %v7419_v48  ;;  %v8893_v48 = vld [vmem:[#allocation9 + $0x4e4] sm:$0xf0]  ;;  %v8123_v44 = vor.u32 %v8949_v20, %v8122_v9  ;;  %v7487_v26 = vor.u32 %v8785_v25, %v7484_v14  ;;  %v8809_v2 = vld [vmem:[#allocation9 + $0x24c] sm:$0xf]  ;;  %v8031_v9 = vor.u32 %v8921_v61, %v8028_v62 }
 0x370   :  { %v9607_v33 = vpack.c.bf16 %v3549_v27, %v3549_v27  ;;  %v8941_v47 = vld [vmem:[#allocation9 + $0x664] sm:$0xf0]  ;;  %v8753_v20 = vld [vmem:[#allocation9 + $0x8c] sm:$0xf] }
 0x371   :  { %5231 = vmatpush.bf16.msrb.mxu3 %v7611_v19  ;;  %5253 = vmatpush.bf16.msra.mxu1 %v8251_v23  ;;  %v7899_v19 = vor.u32 %v8893_v48, %v7898_v13  ;;  %v8833_v23 = vld [vmem:[#allocation9 + $0x30c] sm:$0xf]  ;;  %v7866_v27 = vld [vmem:[#allocation9 + $0x488] sm:$0xf]  ;;  %v8091_v28 = vor.u32 %v8941_v47, %v8090_v18  ;;  %v7778_v18 = vld [vmem:[#allocation9 + $0x3d0] sm:$0xf] }
 0x372   :  { %5143 = vmatmul.bf16.vlgmr.msra.gmra.mxu0 %v9607_v33  ;;  %5169 = vmatmul.bf16.vlgmr.msra.gmra.mxu2 %v9598_v46  ;;  %v7679_v16 = vor.u32 %v8833_v23, %v7676_v24  ;;  %v8869_v58 = vld [vmem:[#allocation9 + $0x424] sm:$0xf0]  ;;  %v8801_v13 = vld [vmem:[#allocation9 + $0x20c] sm:$0xf]  ;;  %v8862_v47 = vld [vmem:[#allocation9 + $0x3ec] sm:$0xf0] }
 0x373   :  { %5217 = vmatpush.bf16.msrb.mxu2 %v7387_v30  ;;  %5239 = vmatpush.bf16.msra.mxu0 %v8027_v31  ;;  %v3519_v42 = vpop.f32.mrf.mxu3  ;;  %v8777_v30 = vld [vmem:[#allocation9 + $0x14c] sm:$0xf]  ;;  %v7803_v4 = vor.u32 %v8869_v58, %v7802_v57  ;;  %v7490_v57 = vld [vmem:[#allocation9 + $0x190] sm:$0xf] }
 0x374   :  { %v7452_v31 = vld [vmem:[#allocation9 + $0x168] sm:$0xf0]  ;;  %v8877_v42 = vld [vmem:[#allocation9 + $0x464] sm:$0xf0]  ;;  %v8790_v58 = vld [vmem:[#allocation9 + $0x1ac] sm:$0xf0] }
 0x375   :  { %5232 = vmatpush.bf16.msrb.mxu3 %v7579_v40  ;;  %5254 = vmatpush.bf16.msra.mxu1 %v8219_v35  ;;  %v7867_v40 = vor.u32 %v8885_v10, %v7866_v27  ;;  %v7644_v35 = vld [vmem:[#allocation9 + $0x2e8] sm:$0xf0]  ;;  %v7455_v45 = vor.u32 %v8777_v30, %v7452_v31  ;;  %v7835_v51 = vor.u32 %v8877_v42, %v7834_v38  ;;  %v7522_v38 = vld [vmem:[#allocation9 + $0x1d0] sm:$0xf] }
 0x376   :  { %v7647_v50 = vor.u32 %v8825_v39, %v7644_v35  ;;  %v7548_v48 = vld [vmem:[#allocation9 + $0x228] sm:$0xf0]  ;;  %v8854_v39 = vld [vmem:[#allocation9 + $0x3ac] sm:$0xf0] }
 0x377   :  { %5218 = vmatpush.bf16.msrb.mxu2 %v7355_v36  ;;  %5240 = vmatpush.bf16.msra.mxu0 %v7995_v63  ;;  %v8059_v36 = vor.u32 %v8933_v41, %v8058_v34  ;;  %v8769_v63 = vld [vmem:[#allocation9 + $0x10c] sm:$0xf]  ;;  %v7551_v27 = vor.u32 %v8801_v13, %v7548_v48  ;;  %v7746_v41 = vld [vmem:[#allocation9 + $0x390] sm:$0xf] }
 0x378   :  { %v8188_v25 = vld [vmem:[#allocation9 + $0x728] sm:$0xf0]  ;;  %v8798_v42 = vld [vmem:[#allocation9 + $0x1ec] sm:$0xf0] }
 0x379   :  { %5233 = vmatpush.bf16.msrb.mxu3 %v7547_v54  ;;  %5255 = vmatpush.bf16.msra.mxu1 %v8187_v55  ;;  %v8977_v54 = vld [vmem:[#allocation9 + $0x78c] sm:$0xf]  ;;  %v7523_v53 = vor.u32 %v8798_v42, %v7522_v38  ;;  %v8990_v13 = vld [vmem:[#allocation9 + $0x7ec] sm:$0xf0] }
 0x37a   :  { %v8252_v55 = vld [vmem:[#allocation9 + $0x7a8] sm:$0xf0] }
 0x37b   :  { %5219 = vmatpush.bf16.msrb.mxu2 %v7323_v59  ;;  %5241 = vmatpush.bf16.msra.mxu0 %v7963_v60  ;;  %v8761_v59 = vld [vmem:[#allocation9 + $0xcc] sm:$0xf]  ;;  %v8255_v1 = vor.u32 %v8977_v54, %v8252_v55 }
 0x37c   :  { %5208 = vmatmul.bf16.vlgmr.msrb.gmra.mxu1 %v9603_v11  ;;  %5234 = vmatmul.bf16.vlgmr.msrb.gmra.mxu3 %v9595_v29  ;;  %v7388_v60 = vld [vmem:[#allocation9 + $0xe8] sm:$0xf0] }
 0x37d   :  { %5278 = vmatpush.bf16.msra.mxu3 %v7775_v56  ;;  %5256 = vmatpush.bf16.msra.mxu1 %v8155_v3  ;;  %v7423_v56 = vor.u32 %v8769_v63, %v7420_v49  ;;  %v7580_v3 = vld [vmem:[#allocation9 + $0x268] sm:$0xf0] }
 0x37e   :  { %v7583_v6 = vor.u32 %v8809_v2, %v7580_v3  ;;  %v7324_v23 = vld [vmem:[#allocation9 + $0x68] sm:$0xf0]  ;;  %v7491_v2 = vor.u32 %v8790_v58, %v7490_v57  ;;  %v8966_v57 = vld [vmem:[#allocation9 + $0x72c] sm:$0xf0] }
 0x37f   :  { %5220 = vmatpush.bf16.msrb.mxu2 %v7291_v22  ;;  %5242 = vmatpush.bf16.msra.mxu0 %v7931_v21  ;;  %v7356_v22 = vld [vmem:[#allocation9 + $0xa8] sm:$0xf0] }
 0x380   :  { %v8913_v21 = vld [vmem:[#allocation9 + $0x58c] sm:$0xf]  ;;  %v7359_v14 = vor.u32 %v8753_v20, %v7356_v22 }
 0x381   :  { %5279 = vmatpush.bf16.msra.mxu3 %v7743_v8  ;;  %5257 = vmatpush.bf16.msra.mxu1 %v8123_v44  ;;  %v7391_v8 = vor.u32 %v8761_v59, %v7388_v60  ;;  %v8961_v44 = vld [vmem:[#allocation9 + $0x70c] sm:$0xf] }
 0x382   :  { %5195 = vmatmul.bf16.vlgmr.msrb.gmra.mxu0 %v9607_v33  ;;  %5221 = vmatmul.bf16.vlgmr.msrb.gmra.mxu2 %v9598_v46  ;;  %v8905_v24 = vld [vmem:[#allocation9 + $0x54c] sm:$0xf]  ;;  %v8191_v10 = vor.u32 %v8961_v44, %v8188_v25 }
 0x383   :  { %5265 = vmatpush.bf16.msra.mxu2 %v7519_v32  ;;  %5243 = vmatpush.bf16.msra.mxu0 %v7899_v19  ;;  %v8223_v32 = vor.u32 %v8969_v5, %v8220_v7  ;;  %v8745_v19 = vld [vmem:[#allocation9 + $0x4c] sm:$0xf]  ;;  %v7458_v7 = vld [vmem:[#allocation9 + $0x150] sm:$0xf] }
 0x384   :  { %v8953_v30 = vld [vmem:[#allocation9 + $0x6cc] sm:$0xf] }
 0x385   :  { %5280 = vmatpush.bf16.msra.mxu3 %v7711_v17  ;;  %5258 = vmatpush.bf16.msra.mxu1 %v8091_v28  ;;  %v7999_v17 = vor.u32 %v8913_v21, %v7996_v12  ;;  %v7779_v28 = vor.u32 %v8862_v47, %v7778_v18  ;;  %v8156_v31 = vld [vmem:[#allocation9 + $0x6e8] sm:$0xf0]  ;;  %v7650_v21 = vld [vmem:[#allocation9 + $0x2d0] sm:$0xf] }
 0x386   :  { %v7292_v35 = vld [vmem:[#allocation9 + $0x28] sm:$0xf0]  ;;  %v8774_v18 = vld [vmem:[#allocation9 + $0x12c] sm:$0xf0] }
 0x387   :  { %5266 = vmatpush.bf16.msra.mxu2 %v7487_v26  ;;  %5244 = vmatpush.bf16.msra.mxu0 %v7867_v40  ;;  %v7964_v26 = vld [vmem:[#allocation9 + $0x568] sm:$0xf0] }
 0x388   :  { %v7967_v34 = vor.u32 %v8905_v24, %v7964_v26  ;;  %v8737_v40 = vld [vmem:[#allocation9 + $0xc] sm:$0xf]  ;;  %v8822_v26 = vld [vmem:[#allocation9 + $0x2ac] sm:$0xf0] }
 0x389   :  { %5281 = vmatpush.bf16.msra.mxu3 %v7679_v16  ;;  %5259 = vmatpush.bf16.msra.mxu1 %v8059_v36  ;;  %v7327_v16 = vor.u32 %v8745_v19, %v7324_v23  ;;  %v8897_v15 = vld [vmem:[#allocation9 + $0x50c] sm:$0xf]  ;;  %v7747_v36 = vor.u32 %v8854_v39, %v7746_v41  ;;  %v7618_v23 = vld [vmem:[#allocation9 + $0x290] sm:$0xf] }
 0x38a   :  { %v7932_v43 = vld [vmem:[#allocation9 + $0x528] sm:$0xf0]  ;;  %v8034_v41 = vld [vmem:[#allocation9 + $0x5d0] sm:$0xf] }
 0x38b   :  { %5267 = vmatpush.bf16.msra.mxu2 %v7455_v45  ;;  %5245 = vmatpush.bf16.msra.mxu0 %v7835_v51  ;;  %v8159_v45 = vor.u32 %v8953_v30, %v8156_v31  ;;  %v8945_v63 = vld [vmem:[#allocation9 + $0x68c] sm:$0xf]  ;;  %v8846_v51 = vld [vmem:[#allocation9 + $0x36c] sm:$0xf0] }
 0x38c   :  { %5260 = vmatmul.bf16.vlgmr.msra.gmra.mxu1 %v9603_v11  ;;  %v8124_v49 = vld [vmem:[#allocation9 + $0x6a8] sm:$0xf0]  ;;  %v7715_v59 = vor.u32 %v8846_v51, %v7714_v52  ;;  %v8926_v39 = vld [vmem:[#allocation9 + $0x5ec] sm:$0xf0] }
 0x38d   :  { %5282 = vmatpush.bf16.msra.mxu3 %v7647_v50  ;;  %5304 = vmatpush.bf16.msrb.mxu1 %v8287_v37  ;;  %v7295_v50 = vor.u32 %v8737_v40, %v7292_v35  ;;  %v7935_v37 = vor.u32 %v8897_v15, %v7932_v43  ;;  %v8889_v54 = vld [vmem:[#allocation9 + $0x4cc] sm:$0xf]  ;;  %v7619_v40 = vor.u32 %v8822_v26, %v7618_v23  ;;  %v7586_v43 = vld [vmem:[#allocation9 + $0x250] sm:$0xf]  ;;  %v8842_v23 = vld [vmem:[#allocation9 + $0x354] sm:$0xf] }
 0x38e   :  { %v7900_v55 = vld [vmem:[#allocation9 + $0x4e8] sm:$0xf0]  ;;  %v8035_v42 = vor.u32 %v8926_v39, %v8034_v41  ;;  %v8918_v52 = vld [vmem:[#allocation9 + $0x5ac] sm:$0xf0]  ;;  %v7716_v26 = vld [vmem:[#allocation9 + $0x370] sm:$0xf0] }
 0x38f   :  { %5268 = vmatpush.bf16.msra.mxu2 %v7423_v56  ;;  %5246 = vmatpush.bf16.msra.mxu0 %v7803_v4  ;;  %v8127_v56 = vor.u32 %v8945_v63, %v8124_v49  ;;  %v8937_v60 = vld [vmem:[#allocation9 + $0x64c] sm:$0xf]  ;;  %v7903_v62 = vor.u32 %v8889_v54, %v7900_v55  ;;  %v8974_v63 = vld [vmem:[#allocation9 + $0x76c] sm:$0xf0] }
 0x390   :  { %v8092_v61 = vld [vmem:[#allocation9 + $0x668] sm:$0xf0]  ;;  %v7362_v49 = vld [vmem:[#allocation9 + $0x90] sm:$0xf] }
 0x391   :  { %5283 = vmatpush.bf16.msra.mxu3 %v7615_v0  ;;  %5305 = vmatpush.bf16.msrb.mxu1 %v8255_v1  ;;  %v7682_v0 = vld [vmem:[#allocation9 + $0x310] sm:$0xf]  ;;  %v8881_v4 = vld [vmem:[#allocation9 + $0x48c] sm:$0xf]  ;;  %v8095_v5 = vor.u32 %v8937_v60, %v8092_v61  ;;  %v8858_v60 = vld [vmem:[#allocation9 + $0x3d4] sm:$0xf] }
 0x392   :  { %5247 = vmatmul.bf16.vlgmr.msra.gmra.mxu0 %v9607_v33  ;;  %v8838_v1 = vld [vmem:[#allocation9 + $0x32c] sm:$0xf0]  ;;  %v7868_v3 = vld [vmem:[#allocation9 + $0x4a8] sm:$0xf0]  ;;  %v7780_v61 = vld [vmem:[#allocation9 + $0x3f0] sm:$0xf0] }
 0x393   :  { %5269 = vmatpush.bf16.msra.mxu2 %v7391_v8  ;;  %5291 = vmatpush.bf16.msrb.mxu0 %v8031_v9  ;;  %v8782_v8 = vld [vmem:[#allocation9 + $0x16c] sm:$0xf0]  ;;  %v7683_v9 = vor.u32 %v8838_v1, %v7682_v0  ;;  %v8929_v20 = vld [vmem:[#allocation9 + $0x60c] sm:$0xf]  ;;  %v7871_v12 = vor.u32 %v8881_v4, %v7868_v3 }
 0x394   :  { %v8060_v22 = vld [vmem:[#allocation9 + $0x628] sm:$0xf0]  ;;  %v7459_v48 = vor.u32 %v8782_v8, %v7458_v7  ;;  %v8806_v55 = vld [vmem:[#allocation9 + $0x22c] sm:$0xf0] }
 0x395   :  { %5284 = vmatpush.bf16.msra.mxu3 %v7583_v6  ;;  %5306 = vmatpush.bf16.msrb.mxu1 %v8223_v32  ;;  %v8830_v6 = vld [vmem:[#allocation9 + $0x2ec] sm:$0xf0]  ;;  %v8873_v44 = vld [vmem:[#allocation9 + $0x44c] sm:$0xf] }
 0x396   :  { %v8290_v32 = vld [vmem:[#allocation9 + $0x7d0] sm:$0xf]  ;;  %v7836_v25 = vld [vmem:[#allocation9 + $0x468] sm:$0xf0]  ;;  %v7651_v47 = vor.u32 %v8830_v6, %v7650_v21  ;;  %v7748_v21 = vld [vmem:[#allocation9 + $0x3b0] sm:$0xf0] }
 0x397   :  { %5270 = vmatpush.bf16.msra.mxu2 %v7359_v14  ;;  %5292 = vmatpush.bf16.msrb.mxu0 %v7999_v17  ;;  %v8063_v14 = vor.u32 %v8929_v20, %v8060_v22  ;;  %v7426_v17 = vld [vmem:[#allocation9 + $0x110] sm:$0xf]  ;;  %v8291_v19 = vor.u32 %v8990_v13, %v8290_v32  ;;  %v7839_v24 = vor.u32 %v8873_v44, %v7836_v25  ;;  %v8865_v30 = vld [vmem:[#allocation9 + $0x40c] sm:$0xf]  ;;  %v8850_v22 = vld [vmem:[#allocation9 + $0x394] sm:$0xf] }
 0x398   :  { %v7804_v31 = vld [vmem:[#allocation9 + $0x428] sm:$0xf0]  ;;  %v8750_v0 = vld [vmem:[#allocation9 + $0x6c] sm:$0xf0]  ;;  %v7524_v44 = vld [vmem:[#allocation9 + $0x1f0] sm:$0xf0] }
 0x399   :  { %5285 = vmatpush.bf16.msra.mxu3 %v7551_v27  ;;  %5307 = vmatpush.bf16.msrb.mxu1 %v8191_v10  ;;  %v8258_v27 = vld [vmem:[#allocation9 + $0x790] sm:$0xf]  ;;  %v7807_v15 = vor.u32 %v8865_v30, %v7804_v31  ;;  %v7492_v30 = vld [vmem:[#allocation9 + $0x1b0] sm:$0xf0] }
 0x39a   :  { %v8982_v10 = vld [vmem:[#allocation9 + $0x7ac] sm:$0xf0] }
 0x39b   :  { %5271 = vmatpush.bf16.msra.mxu2 %v7327_v16  ;;  %5293 = vmatpush.bf16.msrb.mxu0 %v7967_v34  ;;  %v7394_v16 = vld [vmem:[#allocation9 + $0xd0] sm:$0xf]  ;;  %v8259_v35 = vor.u32 %v8982_v10, %v8258_v27 }
 0x39c   :  { %5286 = vmatmul.bf16.vlgmr.msra.gmra.mxu3 %v9595_v29  ;;  %v8766_v34 = vld [vmem:[#allocation9 + $0xec] sm:$0xf0] }
 0x39d   :  { %5330 = vmatpush.bf16.msrb.mxu3 %v7779_v28  ;;  %5308 = vmatpush.bf16.msrb.mxu1 %v8159_v45  ;;  %v7427_v28 = vor.u32 %v8774_v18, %v7426_v17  ;;  %v8814_v45 = vld [vmem:[#allocation9 + $0x26c] sm:$0xf0]  ;;  %v7395_v38 = vor.u32 %v8766_v34, %v7394_v16  ;;  %v7719_v16 = vor.u32 %v8842_v23, %v7716_v26  ;;  %v8004_v23 = vld [vmem:[#allocation9 + $0x5b0] sm:$0xf0] }
 0x39e   :  { %v7587_v51 = vor.u32 %v8814_v45, %v7586_v43  ;;  %v7970_v1 = vld [vmem:[#allocation9 + $0x550] sm:$0xf]  ;;  %v8802_v26 = vld [vmem:[#allocation9 + $0x214] sm:$0xf] }
 0x39f   :  { %5272 = vmatpush.bf16.msra.mxu2 %v7295_v50  ;;  %5294 = vmatpush.bf16.msrb.mxu0 %v7935_v37  ;;  %v8758_v50 = vld [vmem:[#allocation9 + $0xac] sm:$0xf0] }
 0x3a0   :  { %v8002_v37 = vld [vmem:[#allocation9 + $0x590] sm:$0xf]  ;;  %v7363_v58 = vor.u32 %v8758_v50, %v7362_v49 }
 0x3a1   :  { %5331 = vmatpush.bf16.msrb.mxu3 %v7747_v36  ;;  %5309 = vmatpush.bf16.msrb.mxu1 %v8127_v56  ;;  %v8226_v36 = vld [vmem:[#allocation9 + $0x750] sm:$0xf] }
 0x3a2   :  { %5273 = vmatmul.bf16.vlgmr.msra.gmra.mxu2 %v9598_v46  ;;  %v8227_v54 = vor.u32 %v8974_v63, %v8226_v36  ;;  %v8194_v56 = vld [vmem:[#allocation9 + $0x710] sm:$0xf] }
 0x3a3   :  { %5317 = vmatpush.bf16.msrb.mxu2 %v7523_v53  ;;  %5295 = vmatpush.bf16.msrb.mxu0 %v7903_v62  ;;  %v7554_v53 = vld [vmem:[#allocation9 + $0x210] sm:$0xf]  ;;  %v8195_v3 = vor.u32 %v8966_v57, %v8194_v56 }
 0x3a4   :  { %v7330_v62 = vld [vmem:[#allocation9 + $0x50] sm:$0xf]  ;;  %v7555_v4 = vor.u32 %v8806_v55, %v7554_v53  ;;  %v8292_v55 = vld [vmem:[#allocation9 + $0x7f0] sm:$0xf0] }
 0x3a5   :  { %5332 = vmatpush.bf16.msrb.mxu3 %v7715_v59  ;;  %5310 = vmatpush.bf16.msrb.mxu1 %v8095_v5  ;;  %v8003_v59 = vor.u32 %v8918_v52, %v8002_v37  ;;  %v7783_v5 = vor.u32 %v8858_v60, %v7780_v61  ;;  %v8162_v7 = vld [vmem:[#allocation9 + $0x6d0] sm:$0xf]  ;;  %v8826_v52 = vld [vmem:[#allocation9 + $0x2d4] sm:$0xf] }
 0x3a6   :  { %v8958_v8 = vld [vmem:[#allocation9 + $0x6ec] sm:$0xf0] }
 0x3a7   :  { %5318 = vmatpush.bf16.msrb.mxu2 %v7491_v2  ;;  %5296 = vmatpush.bf16.msrb.mxu0 %v7871_v12  ;;  %v8910_v2 = vld [vmem:[#allocation9 + $0x56c] sm:$0xf0]  ;;  %v8163_v25 = vor.u32 %v8958_v8, %v8162_v7 }
 0x3a8   :  { %v7971_v20 = vor.u32 %v8910_v2, %v7970_v1  ;;  %v7298_v12 = vld [vmem:[#allocation9 + $0x10] sm:$0xf]  ;;  %v7620_v1 = vld [vmem:[#allocation9 + $0x2b0] sm:$0xf0] }
 0x3a9   :  { %5333 = vmatpush.bf16.msrb.mxu3 %v7683_v9  ;;  %5311 = vmatpush.bf16.msrb.mxu1 %v8063_v14  ;;  %v7331_v9 = vor.u32 %v8750_v0, %v7330_v62  ;;  %v8742_v6 = vld [vmem:[#allocation9 + $0x2c] sm:$0xf0]  ;;  %v7751_v14 = vor.u32 %v8850_v22, %v7748_v21  ;;  %v8818_v0 = vld [vmem:[#allocation9 + $0x294] sm:$0xf] }
 0x3aa   :  { %v7938_v32 = vld [vmem:[#allocation9 + $0x510] sm:$0xf]  ;;  %v7299_v17 = vor.u32 %v8742_v6, %v7298_v12  ;;  %v8922_v22 = vld [vmem:[#allocation9 + $0x5d4] sm:$0xf]  ;;  %v7623_v12 = vor.u32 %v8818_v0, %v7620_v1  ;;  %v7722_v0 = vld [vmem:[#allocation9 + $0x358] sm:$0xf] }
 0x3ab   :  { %5319 = vmatpush.bf16.msrb.mxu2 %v7459_v48  ;;  %5297 = vmatpush.bf16.msrb.mxu0 %v7839_v24  ;;  %v8902_v13 = vld [vmem:[#allocation9 + $0x52c] sm:$0xf0]  ;;  %v8794_v48 = vld [vmem:[#allocation9 + $0x1d4] sm:$0xf] }
 0x3ac   :  { %5312 = vmatmul.bf16.vlgmr.msrb.gmra.mxu1 %v9603_v11  ;;  %v7939_v18 = vor.u32 %v8902_v13, %v7938_v32  ;;  %v7527_v24 = vor.u32 %v8794_v48, %v7524_v44  ;;  %v7906_v27 = vld [vmem:[#allocation9 + $0x4d0] sm:$0xf]  ;;  %v8036_v21 = vld [vmem:[#allocation9 + $0x5f0] sm:$0xf0] }
 0x3ad   :  { %5334 = vmatpush.bf16.msrb.mxu3 %v7651_v47  ;;  %5356 = vmatpush.bf16.msra.mxu1 %v8291_v19  ;;  %v8130_v47 = vld [vmem:[#allocation9 + $0x690] sm:$0xf]  ;;  %v8810_v48 = vld [vmem:[#allocation9 + $0x254] sm:$0xf] }
 0x3ae   :  { %v8950_v19 = vld [vmem:[#allocation9 + $0x6ac] sm:$0xf0]  ;;  %v7588_v44 = vld [vmem:[#allocation9 + $0x270] sm:$0xf0] }
 0x3af   :  { %5320 = vmatpush.bf16.msrb.mxu2 %v7427_v28  ;;  %5298 = vmatpush.bf16.msrb.mxu0 %v7807_v15  ;;  %v8894_v10 = vld [vmem:[#allocation9 + $0x4ec] sm:$0xf0]  ;;  %v8786_v28 = vld [vmem:[#allocation9 + $0x194] sm:$0xf]  ;;  %v8131_v31 = vor.u32 %v8950_v19, %v8130_v47 }
 0x3b0   :  { %v7907_v34 = vor.u32 %v8894_v10, %v7906_v27  ;;  %v8098_v41 = vld [vmem:[#allocation9 + $0x650] sm:$0xf]  ;;  %v7684_v15 = vld [vmem:[#allocation9 + $0x330] sm:$0xf0] }
 0x3b1   :  { %5335 = vmatpush.bf16.msrb.mxu3 %v7619_v40  ;;  %5357 = vmatpush.bf16.msra.mxu1 %v8259_v35  ;;  %v8942_v39 = vld [vmem:[#allocation9 + $0x66c] sm:$0xf0]  ;;  %v8834_v40 = vld [vmem:[#allocation9 + $0x314] sm:$0xf]  ;;  %v7495_v35 = vor.u32 %v8786_v28, %v7492_v30 }
 0x3b2   :  { %5299 = vmatmul.bf16.vlgmr.msrb.gmra.mxu0 %v9607_v33  ;;  %v7874_v43 = vld [vmem:[#allocation9 + $0x490] sm:$0xf]  ;;  %v8099_v36 = vor.u32 %v8942_v39, %v8098_v41  ;;  %v7687_v49 = vor.u32 %v8834_v40, %v7684_v15  ;;  %v7364_v47 = vld [vmem:[#allocation9 + $0xb0] sm:$0xf0]  ;;  %v8863_v41 = vld [vmem:[#allocation9 + $0x3f4] sm:$0xf0] }
 0x3b3   :  { %5321 = vmatpush.bf16.msrb.mxu2 %v7395_v38  ;;  %5343 = vmatpush.bf16.msra.mxu0 %v8035_v42  ;;  %v8886_v45 = vld [vmem:[#allocation9 + $0x4ac] sm:$0xf0]  ;;  %v8778_v38 = vld [vmem:[#allocation9 + $0x154] sm:$0xf] }
 0x3b4   :  { %v7460_v42 = vld [vmem:[#allocation9 + $0x170] sm:$0xf0]  ;;  %v8066_v63 = vld [vmem:[#allocation9 + $0x610] sm:$0xf]  ;;  %v7875_v50 = vor.u32 %v8886_v45, %v7874_v43 }
 0x3b5   :  { %5336 = vmatpush.bf16.msrb.mxu3 %v7587_v51  ;;  %5358 = vmatpush.bf16.msra.mxu1 %v8227_v54  ;;  %v8934_v37 = vld [vmem:[#allocation9 + $0x62c] sm:$0xf0]  ;;  %v7652_v51 = vld [vmem:[#allocation9 + $0x2f0] sm:$0xf0]  ;;  %v7463_v53 = vor.u32 %v8778_v38, %v7460_v42 }
 0x3b6   :  { %v8986_v54 = vld [vmem:[#allocation9 + $0x7d4] sm:$0xf]  ;;  %v7842_v56 = vld [vmem:[#allocation9 + $0x450] sm:$0xf]  ;;  %v8067_v60 = vor.u32 %v8934_v37, %v8066_v63  ;;  %v7655_v61 = vor.u32 %v8826_v52, %v7652_v51  ;;  %v8855_v37 = vld [vmem:[#allocation9 + $0x3b4] sm:$0xf0] }
 0x3b7   :  { %5322 = vmatpush.bf16.msrb.mxu2 %v7363_v58  ;;  %5344 = vmatpush.bf16.msra.mxu0 %v8003_v59  ;;  %v8878_v57 = vld [vmem:[#allocation9 + $0x46c] sm:$0xf0]  ;;  %v8770_v58 = vld [vmem:[#allocation9 + $0x114] sm:$0xf]  ;;  %v8295_v62 = vor.u32 %v8986_v54, %v8292_v55  ;;  %v7530_v55 = vld [vmem:[#allocation9 + $0x1d8] sm:$0xf] }
 0x3b8   :  { %v7428_v59 = vld [vmem:[#allocation9 + $0x130] sm:$0xf0]  ;;  %v7843_v2 = vor.u32 %v8878_v57, %v7842_v56  ;;  %v7810_v7 = vld [vmem:[#allocation9 + $0x410] sm:$0xf]  ;;  %v8799_v56 = vld [vmem:[#allocation9 + $0x1f4] sm:$0xf0] }
 0x3b9   :  { %5337 = vmatpush.bf16.msrb.mxu3 %v7555_v4  ;;  %5359 = vmatpush.bf16.msra.mxu1 %v8195_v3  ;;  %v7431_v4 = vor.u32 %v8770_v58, %v7428_v59  ;;  %v8978_v3 = vld [vmem:[#allocation9 + $0x794] sm:$0xf]  ;;  %v8870_v8 = vld [vmem:[#allocation9 + $0x42c] sm:$0xf0]  ;;  %v7531_v1 = vor.u32 %v8799_v56, %v7530_v55  ;;  %v7594_v56 = vld [vmem:[#allocation9 + $0x258] sm:$0xf] }
 0x3ba   :  { %v7811_v32 = vor.u32 %v8870_v8, %v7810_v7  ;;  %v8914_v19 = vld [vmem:[#allocation9 + $0x594] sm:$0xf]  ;;  %v8791_v7 = vld [vmem:[#allocation9 + $0x1b4] sm:$0xf0] }
 0x3bb   :  { %5323 = vmatpush.bf16.msrb.mxu2 %v7331_v9  ;;  %5345 = vmatpush.bf16.msra.mxu0 %v7971_v20  ;;  %v8762_v9 = vld [vmem:[#allocation9 + $0xd4] sm:$0xf] }
 0x3bc   :  { %5338 = vmatmul.bf16.vlgmr.msrb.gmra.mxu3 %v9595_v29  ;;  %v7396_v20 = vld [vmem:[#allocation9 + $0xf0] sm:$0xf0] }
 0x3bd   :  { %5382 = vmatpush.bf16.msra.mxu3 %v7783_v5  ;;  %5360 = vmatpush.bf16.msra.mxu1 %v8163_v25  ;;  %v8260_v5 = vld [vmem:[#allocation9 + $0x7b0] sm:$0xf0]  ;;  %v7399_v13 = vor.u32 %v8762_v9, %v7396_v20 }
 0x3be   :  { %v8263_v6 = vor.u32 %v8978_v3, %v8260_v5  ;;  %v8970_v25 = vld [vmem:[#allocation9 + $0x754] sm:$0xf]  ;;  %v7498_v5 = vld [vmem:[#allocation9 + $0x198] sm:$0xf] }
 0x3bf   :  { %5324 = vmatpush.bf16.msrb.mxu2 %v7299_v17  ;;  %5346 = vmatpush.bf16.msra.mxu0 %v7939_v18  ;;  %v8228_v17 = vld [vmem:[#allocation9 + $0x770] sm:$0xf0] }
 0x3c0   :  { %v8754_v18 = vld [vmem:[#allocation9 + $0x94] sm:$0xf]  ;;  %v8231_v27 = vor.u32 %v8970_v25, %v8228_v17  ;;  %v8783_v25 = vld [vmem:[#allocation9 + $0x174] sm:$0xf0] }
 0x3c1   :  { %5383 = vmatpush.bf16.msra.mxu3 %v7751_v14  ;;  %5361 = vmatpush.bf16.msra.mxu1 %v8131_v31  ;;  %v8039_v14 = vor.u32 %v8922_v22, %v8036_v21  ;;  %v7367_v10 = vor.u32 %v8754_v18, %v7364_v47  ;;  %v7556_v28 = vld [vmem:[#allocation9 + $0x230] sm:$0xf0] }
 0x3c2   :  { %5325 = vmatmul.bf16.vlgmr.msrb.gmra.mxu2 %v9598_v46  ;;  %v8962_v30 = vld [vmem:[#allocation9 + $0x714] sm:$0xf]  ;;  %v7559_v43 = vor.u32 %v8802_v26, %v7556_v28 }
 0x3c3   :  { %5369 = vmatpush.bf16.msra.mxu2 %v7527_v24  ;;  %5347 = vmatpush.bf16.msra.mxu0 %v7907_v34  ;;  %v7591_v24 = vor.u32 %v8810_v48, %v7588_v44  ;;  %v8196_v31 = vld [vmem:[#allocation9 + $0x730] sm:$0xf0]  ;;  %v7786_v34 = vld [vmem:[#allocation9 + $0x3d8] sm:$0xf] }
 0x3c4   :  { %v8746_v39 = vld [vmem:[#allocation9 + $0x54] sm:$0xf]  ;;  %v8199_v45 = vor.u32 %v8962_v30, %v8196_v31  ;;  %v7787_v38 = vor.u32 %v8863_v41, %v7786_v34  ;;  %v7466_v44 = vld [vmem:[#allocation9 + $0x158] sm:$0xf] }
 0x3c5   :  { %5384 = vmatpush.bf16.msra.mxu3 %v7719_v16  ;;  %5362 = vmatpush.bf16.msra.mxu1 %v8099_v36  ;;  %v8007_v16 = vor.u32 %v8914_v19, %v8004_v23  ;;  %v7332_v40 = vld [vmem:[#allocation9 + $0x70] sm:$0xf0]  ;;  %v7658_v23 = vld [vmem:[#allocation9 + $0x2d8] sm:$0xf]  ;;  %v7467_v26 = vor.u32 %v8783_v25, %v7466_v44 }
 0x3c6   :  { %v7972_v15 = vld [vmem:[#allocation9 + $0x570] sm:$0xf0]  ;;  %v7335_v63 = vor.u32 %v8746_v39, %v7332_v40  ;;  %v7434_v31 = vld [vmem:[#allocation9 + $0x118] sm:$0xf] }
 0x3c7   :  { %5370 = vmatpush.bf16.msra.mxu2 %v7495_v35  ;;  %5348 = vmatpush.bf16.msra.mxu0 %v7875_v50  ;;  %v8906_v35 = vld [vmem:[#allocation9 + $0x554] sm:$0xf]  ;;  %v7754_v50 = vld [vmem:[#allocation9 + $0x398] sm:$0xf] }
 0x3c8   :  { %v8954_v42 = vld [vmem:[#allocation9 + $0x6d4] sm:$0xf]  ;;  %v7755_v58 = vor.u32 %v8855_v37, %v7754_v50  ;;  %v8767_v50 = vld [vmem:[#allocation9 + $0xf4] sm:$0xf0] }
 0x3c9   :  { %5385 = vmatpush.bf16.msra.mxu3 %v7687_v49  ;;  %5363 = vmatpush.bf16.msra.mxu1 %v8067_v60  ;;  %v8164_v36 = vld [vmem:[#allocation9 + $0x6f0] sm:$0xf0]  ;;  %v7975_v49 = vor.u32 %v8906_v35, %v7972_v15  ;;  %v7626_v35 = vld [vmem:[#allocation9 + $0x298] sm:$0xf] }
 0x3ca   :  { %v8738_v52 = vld [vmem:[#allocation9 + $0x14] sm:$0xf]  ;;  %v8167_v57 = vor.u32 %v8954_v42, %v8164_v36  ;;  %v8823_v15 = vld [vmem:[#allocation9 + $0x2b4] sm:$0xf0] }
 0x3cb   :  { %5371 = vmatpush.bf16.msra.mxu2 %v7463_v53  ;;  %5349 = vmatpush.bf16.msra.mxu0 %v7843_v2  ;;  %v7300_v51 = vld [vmem:[#allocation9 + $0x30] sm:$0xf0]  ;;  %v8847_v2 = vld [vmem:[#allocation9 + $0x374] sm:$0xf0] }
 0x3cc   :  { %5364 = vmatmul.bf16.vlgmr.msra.gmra.mxu1 %v9603_v11  ;;  %v8898_v53 = vld [vmem:[#allocation9 + $0x514] sm:$0xf]  ;;  %v7303_v59 = vor.u32 %v8738_v52, %v7300_v51  ;;  %v7723_v9 = vor.u32 %v8847_v2, %v7722_v0  ;;  %v8983_v42 = vld [vmem:[#allocation9 + $0x7b4] sm:$0xf0]  ;;  %v7627_v51 = vor.u32 %v8823_v15, %v7626_v35  ;;  %v8795_v35 = vld [vmem:[#allocation9 + $0x1dc] sm:$0xf] }
 0x3cd   :  { %5386 = vmatpush.bf16.msra.mxu3 %v7655_v61  ;;  %5408 = vmatpush.bf16.msrb.mxu1 %v8295_v62  ;;  %v7940_v54 = vld [vmem:[#allocation9 + $0x530] sm:$0xf0]  ;;  %v8042_v37 = vld [vmem:[#allocation9 + $0x5d8] sm:$0xf]  ;;  %v7532_v15 = vld [vmem:[#allocation9 + $0x1f8] sm:$0xf0] }
 0x3ce   :  { %v7943_v60 = vor.u32 %v8898_v53, %v7940_v54  ;;  %v8946_v61 = vld [vmem:[#allocation9 + $0x694] sm:$0xf]  ;;  %v8927_v52 = vld [vmem:[#allocation9 + $0x5f4] sm:$0xf0] }
 0x3cf   :  { %5372 = vmatpush.bf16.msra.mxu2 %v7431_v4  ;;  %5350 = vmatpush.bf16.msra.mxu0 %v7811_v32  ;;  %v8132_v62 = vld [vmem:[#allocation9 + $0x6b0] sm:$0xf0]  ;;  %v8839_v32 = vld [vmem:[#allocation9 + $0x334] sm:$0xf0] }
 0x3d0   :  { %v8890_v4 = vld [vmem:[#allocation9 + $0x4d4] sm:$0xf]  ;;  %v8135_v8 = vor.u32 %v8946_v61, %v8132_v62  ;;  %v8975_v61 = vld [vmem:[#allocation9 + $0x774] sm:$0xf0] }
 0x3d1   :  { %5387 = vmatpush.bf16.msra.mxu3 %v7623_v12  ;;  %5409 = vmatpush.bf16.msrb.mxu1 %v8263_v6  ;;  %v7908_v3 = vld [vmem:[#allocation9 + $0x4f0] sm:$0xf0]  ;;  %v7690_v12 = vld [vmem:[#allocation9 + $0x318] sm:$0xf]  ;;  %v7499_v6 = vor.u32 %v8791_v7, %v7498_v5 }
 0x3d2   :  { %5351 = vmatmul.bf16.vlgmr.msra.gmra.mxu0 %v9607_v33  ;;  %v7911_v20 = vor.u32 %v8890_v4, %v7908_v3  ;;  %v8938_v22 = vld [vmem:[#allocation9 + $0x654] sm:$0xf]  ;;  %v7691_v18 = vor.u32 %v8839_v32, %v7690_v12  ;;  %v7370_v62 = vld [vmem:[#allocation9 + $0x98] sm:$0xf]  ;;  %v7788_v32 = vld [vmem:[#allocation9 + $0x3f8] sm:$0xf0] }
 0x3d3   :  { %5373 = vmatpush.bf16.msra.mxu2 %v7399_v13  ;;  %5395 = vmatpush.bf16.msrb.mxu0 %v8039_v14  ;;  %v8100_v21 = vld [vmem:[#allocation9 + $0x670] sm:$0xf0]  ;;  %v8759_v0 = vld [vmem:[#allocation9 + $0xb4] sm:$0xf0] }
 0x3d4   :  { %v8882_v13 = vld [vmem:[#allocation9 + $0x494] sm:$0xf]  ;;  %v8103_v14 = vor.u32 %v8938_v22, %v8100_v21  ;;  %v8919_v2 = vld [vmem:[#allocation9 + $0x5b4] sm:$0xf0] }
 0x3d5   :  { %5388 = vmatpush.bf16.msra.mxu3 %v7591_v24  ;;  %5410 = vmatpush.bf16.msrb.mxu1 %v8231_v27  ;;  %v7876_v48 = vld [vmem:[#allocation9 + $0x4b0] sm:$0xf0]  ;;  %v8831_v24 = vld [vmem:[#allocation9 + $0x2f4] sm:$0xf0] }
 0x3d6   :  { %v8930_v17 = vld [vmem:[#allocation9 + $0x614] sm:$0xf]  ;;  %v7879_v47 = vor.u32 %v8882_v13, %v7876_v48  ;;  %v8298_v27 = vld [vmem:[#allocation9 + $0x7d8] sm:$0xf]  ;;  %v7659_v39 = vor.u32 %v8831_v24, %v7658_v23 }
 0x3d7   :  { %5374 = vmatpush.bf16.msra.mxu2 %v7367_v10  ;;  %5396 = vmatpush.bf16.msrb.mxu0 %v8007_v16  ;;  %v8068_v19 = vld [vmem:[#allocation9 + $0x630] sm:$0xf0]  ;;  %v8991_v10 = vld [vmem:[#allocation9 + $0x7f4] sm:$0xf0] }
 0x3d8   :  { %v8874_v28 = vld [vmem:[#allocation9 + $0x454] sm:$0xf]  ;;  %v8775_v16 = vld [vmem:[#allocation9 + $0x134] sm:$0xf0]  ;;  %v8071_v34 = vor.u32 %v8930_v17, %v8068_v19  ;;  %v8299_v40 = vor.u32 %v8991_v10, %v8298_v27  ;;  %v9638_v17 = vld [vmem:[%s9698_s12] sm:$0xff] }
 0x3d9   :  { %5389 = vmatpush.bf16.msra.mxu3 %v7559_v43  ;;  %5411 = vmatpush.bf16.msrb.mxu1 %v8199_v45  ;;  %v7844_v30 = vld [vmem:[#allocation9 + $0x470] sm:$0xf0]  ;;  %v7435_v45 = vor.u32 %v8775_v16, %v7434_v31  ;;  %v7562_v5 = vld [vmem:[#allocation9 + $0x218] sm:$0xf]  ;;  %v8851_v10 = vld [vmem:[#allocation9 + $0x39c] sm:$0xf] }
 0x3da   :  { %v7847_v43 = vor.u32 %v8874_v28, %v7844_v30  ;;  %v8866_v36 = vld [vmem:[#allocation9 + $0x414] sm:$0xf]  ;;  %v8967_v22 = vld [vmem:[#allocation9 + $0x734] sm:$0xf0]  ;;  %v7756_v28 = vld [vmem:[#allocation9 + $0x3b8] sm:$0xf0] }
 0x3db   :  { %5375 = vmatpush.bf16.msra.mxu2 %v7335_v63  ;;  %5397 = vmatpush.bf16.msrb.mxu0 %v7975_v49  ;;  %v7812_v63 = vld [vmem:[#allocation9 + $0x430] sm:$0xf0]  ;;  %v7402_v49 = vld [vmem:[#allocation9 + $0xd8] sm:$0xf] }
 0x3dc   :  { %5390 = vmatmul.bf16.vlgmr.msra.gmra.mxu3 %v9595_v29  ;;  %v7815_v54 = vor.u32 %v8866_v36, %v7812_v63  ;;  %v7403_v55 = vor.u32 %v8767_v50, %v7402_v49  ;;  %v7338_v13 = vld [vmem:[#allocation9 + $0x58] sm:$0xf] }
 0x3dd   :  { %5434 = vmatpush.bf16.msrb.mxu3 %v7787_v38  ;;  %5412 = vmatpush.bf16.msrb.mxu1 %v8167_v57  ;;  %v8266_v38 = vld [vmem:[#allocation9 + $0x798] sm:$0xf] }
 0x3de   :  { %v8267_v53 = vor.u32 %v8983_v42, %v8266_v38  ;;  %v8815_v57 = vld [vmem:[#allocation9 + $0x274] sm:$0xf0]  ;;  %v7759_v38 = vor.u32 %v8851_v10, %v7756_v28  ;;  %v8771_v28 = vld [vmem:[#allocation9 + $0x11c] sm:$0xf] }
 0x3df   :  { %5376 = vmatpush.bf16.msra.mxu2 %v7303_v59  ;;  %5398 = vmatpush.bf16.msrb.mxu0 %v7943_v60  ;;  %v9627_v41 = vpop.f32.mrf.mxu3  ;;  %v8043_v60 = vor.u32 %v8927_v52, %v8042_v37  ;;  %v7595_v3 = vor.u32 %v8815_v57, %v7594_v56  ;;  %v8751_v48 = vld [vmem:[#allocation9 + $0x74] sm:$0xf0]  ;;  %v8843_v37 = vld [vmem:[#allocation9 + $0x35c] sm:$0xf]  ;;  %v7535_v52 = vor.u32 %v8795_v35, %v7532_v15 }
 0x3e0   :  { %v7978_v44 = vld [vmem:[#allocation9 + $0x558] sm:$0xf]  ;;  %v7500_v56 = vld [vmem:[#allocation9 + $0x1b8] sm:$0xf0] }
 0x3e1   :  { %5435 = vmatpush.bf16.msrb.mxu3 %v7755_v58  ;;  %5413 = vmatpush.bf16.msrb.mxu1 %v8135_v8  ;;  %v8234_v58 = vld [vmem:[#allocation9 + $0x758] sm:$0xf]  ;;  %v7371_v8 = vor.u32 %v8759_v0, %v7370_v62  ;;  %v8819_v35 = vld [vmem:[#allocation9 + $0x29c] sm:$0xf] }
 0x3e2   :  { %5377 = vmatmul.bf16.vlgmr.msra.gmra.mxu2 %v9598_v46  ;;  %v8235_v7 = vor.u32 %v8975_v61, %v8234_v58  ;;  %v8911_v25 = vld [vmem:[#allocation9 + $0x574] sm:$0xf0]  ;;  %v3814_v58 = vperm.slane %v9638_v17, 1  ;;  %v7628_v15 = vld [vmem:[#allocation9 + $0x2b8] sm:$0xf0] }
 0x3e3   :  { %5421 = vmatpush.bf16.msrb.mxu2 %v7531_v1  ;;  %5399 = vmatpush.bf16.msrb.mxu0 %v7911_v20  ;;  %v8010_v1 = vld [vmem:[#allocation9 + $0x598] sm:$0xf]  ;;  %v7979_v27 = vor.u32 %v8911_v25, %v7978_v44 }
 0x3e4   :  { %v8202_v20 = vld [vmem:[#allocation9 + $0x718] sm:$0xf]  ;;  %v8011_v12 = vor.u32 %v8919_v2, %v8010_v1 }
 0x3e5   :  { %5436 = vmatpush.bf16.msrb.mxu3 %v7723_v9  ;;  %5414 = vmatpush.bf16.msrb.mxu1 %v8103_v14  ;;  %v9630_v59 = vpop.f32.mrf.mxu2  ;;  %v8807_v9 = vld [vmem:[#allocation9 + $0x234] sm:$0xf0] }
 0x3e6   :  { %v7563_v14 = vor.u32 %v8807_v9, %v7562_v5  ;;  %v8170_v19 = vld [vmem:[#allocation9 + $0x6d8] sm:$0xf]  ;;  %v7692_v5 = vld [vmem:[#allocation9 + $0x338] sm:$0xf0] }
 0x3e7   :  { %5422 = vmatpush.bf16.msrb.mxu2 %v7499_v6  ;;  %5400 = vmatpush.bf16.msrb.mxu0 %v7879_v47  ;;  %v5133_v4 = vpop.f32.mrf.mxu3  ;;  %v8859_v6 = vld [vmem:[#allocation9 + $0x3dc] sm:$0xf]  ;;  %v8959_v23 = vld [vmem:[#allocation9 + $0x6f4] sm:$0xf0] }
 0x3e8   :  { %v7791_v47 = vor.u32 %v8859_v6, %v7788_v32  ;;  %v7306_v30 = vld [vmem:[#allocation9 + $0x18] sm:$0xf]  ;;  %v8835_v4 = vld [vmem:[#allocation9 + $0x31c] sm:$0xf] }
 0x3e9   :  { %5437 = vmatpush.bf16.msrb.mxu3 %v7691_v18  ;;  %5415 = vmatpush.bf16.msrb.mxu1 %v8071_v34  ;;  %v9632_v21 = vpop.f32.mrf.mxu1  ;;  %v8203_v18 = vor.u32 %v8967_v22, %v8202_v20  ;;  %v8743_v31 = vld [vmem:[#allocation9 + $0x34] sm:$0xf0]  ;;  %v8779_v22 = vld [vmem:[#allocation9 + $0x15c] sm:$0xf] }
 0x3ea   :  { %v7946_v16 = vld [vmem:[#allocation9 + $0x518] sm:$0xf]  ;;  %v7307_v36 = vor.u32 %v8743_v31, %v7306_v30  ;;  %v7436_v30 = vld [vmem:[#allocation9 + $0x138] sm:$0xf0] }
 0x3eb   :  { %5423 = vmatpush.bf16.msrb.mxu2 %v7467_v26  ;;  %5401 = vmatpush.bf16.msrb.mxu0 %v7847_v43  ;;  %v7339_v26 = vor.u32 %v8751_v48, %v7338_v13  ;;  %v8903_v34 = vld [vmem:[#allocation9 + $0x534] sm:$0xf0]  ;;  %v3813_v43 = vperm.slane %v9638_v17, 0  ;;  %v7695_v48 = vor.u32 %v8835_v4, %v7692_v5  ;;  %v8755_v4 = vld [vmem:[#allocation9 + $0x9c] sm:$0xf] }
 0x3ec   :  { %5416 = vmatmul.bf16.vlgmr.msrb.gmra.mxu1 %v9603_v11  ;;  %v7947_v63 = vor.u32 %v8903_v34, %v7946_v16  ;;  %v8138_v49 = vld [vmem:[#allocation9 + $0x698] sm:$0xf]  ;;  %v8915_v5 = vld [vmem:[#allocation9 + $0x59c] sm:$0xf] }
 0x3ed   :  { %5438 = vmatpush.bf16.msrb.mxu3 %v7659_v39  ;;  %5460 = vmatpush.bf16.msra.mxu1 %v8299_v40  ;;  %v5120_v24 = vpop.f32.mrf.mxu2  ;;  %v8951_v50 = vld [vmem:[#allocation9 + $0x6b4] sm:$0xf0] }
 0x3ee   :  { %v8139_v57 = vor.u32 %v8951_v50, %v8138_v49  ;;  %v8106_v1 = vld [vmem:[#allocation9 + $0x658] sm:$0xf]  ;;  %v8300_v24 = vld [vmem:[#allocation9 + $0x7f8] sm:$0xf0] }
 0x3ef   :  { %5424 = vmatpush.bf16.msrb.mxu2 %v7435_v45  ;;  %5402 = vmatpush.bf16.msrb.mxu0 %v7815_v54  ;;  %v9640_v39 = vpop.f32.mrf.mxu0  ;;  %v9642_v40 = vpop.f32.mrf.mxu3  ;;  %v8171_v45 = vor.u32 %v8959_v23, %v8170_v19  ;;  %v8895_v54 = vld [vmem:[#allocation9 + $0x4f4] sm:$0xf0]  ;;  %v8987_v23 = vld [vmem:[#allocation9 + $0x7dc] sm:$0xf] }
 0x3f0   :  { %v8943_v2 = vld [vmem:[#allocation9 + $0x674] sm:$0xf0]  ;;  %v8303_v34 = vor.u32 %v8987_v23, %v8300_v24 }
 0x3f1   :  { %5439 = vmatpush.bf16.msrb.mxu3 %v7627_v51  ;;  %5461 = vmatpush.bf16.msra.mxu1 %v8267_v53  ;;  %v5159_v42 = vpop.f32.mrf.mxu1  ;;  %v7724_v51 = vld [vmem:[#allocation9 + $0x378] sm:$0xf0]  ;;  %v7914_v53 = vld [vmem:[#allocation9 + $0x4d8] sm:$0xf] }
 0x3f2   :  { %5403 = vmatmul.bf16.vlgmr.msrb.gmra.mxu0 %v9607_v33  ;;  %v7727_v62 = vor.u32 %v8843_v37, %v7724_v51  ;;  %v7915_v0 = vor.u32 %v8895_v54, %v7914_v53  ;;  %v8074_v6 = vld [vmem:[#allocation9 + $0x618] sm:$0xf]  ;;  %v8979_v42 = vld [vmem:[#allocation9 + $0x79c] sm:$0xf] }
 0x3f3   :  { %5425 = vmatpush.bf16.msrb.mxu2 %v7403_v55  ;;  %5447 = vmatpush.bf16.msra.mxu0 %v8043_v60  ;;  %v8787_v55 = vld [vmem:[#allocation9 + $0x19c] sm:$0xf]  ;;  %v5119_v60 = vadd.f32 %v9630_v59, %v3813_v43  ;;  %v8107_v59 = vor.u32 %v8943_v2, %v8106_v1  ;;  %v8935_v25 = vld [vmem:[#allocation9 + $0x634] sm:$0xf0] }
 0x3f4   :  { %v8879_v10 = vld [vmem:[#allocation9 + $0x474] sm:$0xf0]  ;;  %v7404_v51 = vld [vmem:[#allocation9 + $0xf8] sm:$0xf0] }
 0x3f5   :  { %5440 = vmatpush.bf16.msrb.mxu3 %v7595_v3  ;;  %5462 = vmatpush.bf16.msra.mxu1 %v8235_v7  ;;  %v5170_v61 = vpop.f32.mrf.mxu2  ;;  %v7503_v3 = vor.u32 %v8787_v55, %v7500_v56  ;;  %v7882_v7 = vld [vmem:[#allocation9 + $0x498] sm:$0xf]  ;;  %v5132_v32 = vadd.f32 %v9627_v41, %v5119_v60  ;;  %v8075_v41 = vor.u32 %v8935_v25, %v8074_v6  ;;  %v8923_v54 = vld [vmem:[#allocation9 + $0x5dc] sm:$0xf] }
 0x3f6   :  { %v8871_v37 = vld [vmem:[#allocation9 + $0x434] sm:$0xf0]  ;;  %v8044_v55 = vld [vmem:[#allocation9 + $0x5f8] sm:$0xf0] }
 0x3f7   :  { %5426 = vmatpush.bf16.msrb.mxu2 %v7371_v8  ;;  %5448 = vmatpush.bf16.msra.mxu0 %v8011_v12  ;;  %v8887_v8 = vld [vmem:[#allocation9 + $0x4b4] sm:$0xf0]  ;;  %v5146_v9 = vpop.f32.mrf.mxu0  ;;  %v5185_v20 = vpop.f32.mrf.mxu3  ;;  %v7468_v12 = vld [vmem:[#allocation9 + $0x178] sm:$0xf0]  ;;  %v8047_v1 = vor.u32 %v8923_v54, %v8044_v55 }
 0x3f8   :  { %v7883_v44 = vor.u32 %v8887_v8, %v7882_v7  ;;  %v7471_v19 = vor.u32 %v8779_v22, %v7468_v12  ;;  %v8236_v2 = vld [vmem:[#allocation9 + $0x778] sm:$0xf0] }
 0x3f9   :  { %5441 = vmatpush.bf16.msrb.mxu3 %v7563_v14  ;;  %5463 = vmatpush.bf16.msra.mxu1 %v8203_v18  ;;  %v5209_v13 = vpop.f32.mrf.mxu1  ;;  %v8827_v14 = vld [vmem:[#allocation9 + $0x2dc] sm:$0xf] }
 0x3fa   :  { %v7660_v18 = vld [vmem:[#allocation9 + $0x2f8] sm:$0xf0] }
 0x3fb   :  { %5427 = vmatpush.bf16.msrb.mxu2 %v7339_v26  ;;  %5449 = vmatpush.bf16.msra.mxu0 %v7979_v27  ;;  %v7850_v26 = vld [vmem:[#allocation9 + $0x458] sm:$0xf]  ;;  %v5145_v27 = vadd.f32 %v9640_v39, %v5132_v32  ;;  %v7663_v16 = vor.u32 %v8827_v14, %v7660_v18  ;;  %v8012_v7 = vld [vmem:[#allocation9 + $0x5b8] sm:$0xf0] }
 0x3fc   :  { %5442 = vmatmul.bf16.vlgmr.msrb.gmra.mxu3 %v9595_v29  ;;  %v7851_v43 = vor.u32 %v8879_v10, %v7850_v26  ;;  %v7818_v39 = vld [vmem:[#allocation9 + $0x418] sm:$0xf]  ;;  %v8803_v12 = vld [vmem:[#allocation9 + $0x21c] sm:$0xf] }
 0x3fd   :  { %5486 = vmatpush.bf16.msra.mxu3 %v7791_v47  ;;  %5464 = vmatpush.bf16.msra.mxu1 %v8171_v45  ;;  %v5171_v47 = vadd.f32 %v5170_v61, %v3814_v58  ;;  %v5172_v31 = vpop.f32.mrf.mxu2  ;;  %v7819_v60 = vor.u32 %v8871_v37, %v7818_v39  ;;  %v8811_v61 = vld [vmem:[#allocation9 + $0x25c] sm:$0xf] }
 0x3fe   :  { %v8963_v6 = vld [vmem:[#allocation9 + $0x71c] sm:$0xf] }
 0x3ff   :  { %5428 = vmatpush.bf16.msrb.mxu2 %v7307_v36  ;;  %5450 = vmatpush.bf16.msra.mxu0 %v7947_v63  ;;  %v5184_v45 = vadd.f32 %v9642_v40, %v5171_v47  ;;  %v8268_v36 = vld [vmem:[#allocation9 + $0x7b8] sm:$0xf0]  ;;  %v5158_v63 = vadd.f32 %v9632_v21, %v5145_v27  ;;  %v5196_v49 = vpop.f32.mrf.mxu0  ;;  %v9653_v50 = vpop.f32.mrf.mxu3  ;;  %v7631_v40 = vor.u32 %v8819_v35, %v7628_v15 }
 0x400   :  { %v8747_v25 = vld [vmem:[#allocation9 + $0x5c] sm:$0xf] }
 0x401   :  { %5487 = vmatpush.bf16.msra.mxu3 %v7759_v38  ;;  %5465 = vmatpush.bf16.msra.mxu1 %v8139_v57  ;;  %v7439_v38 = vor.u32 %v8771_v28, %v7436_v30  ;;  %v5197_v53 = vadd.f32 %v5196_v49, %v5184_v45  ;;  %v5211_v56 = vpop.f32.mrf.mxu1  ;;  %v8271_v57 = vor.u32 %v8979_v42, %v8268_v36  ;;  %9006 = vtanh.f32 %v5158_v63  ;;  %v7340_v14 = vld [vmem:[#allocation9 + $0x78] sm:$0xf0] }
 0x402   :  { %5429 = vmatmul.bf16.vlgmr.msrb.gmra.mxu2 %v9598_v46  ;;  %v8907_v18 = vld [vmem:[#allocation9 + $0x55c] sm:$0xf]  ;;  %v7343_v10 = vor.u32 %v8747_v25, %v7340_v14 }
 0x403   :  { %5473 = vmatpush.bf16.msra.mxu2 %v7535_v52  ;;  %5451 = vmatpush.bf16.msra.mxu0 %v7915_v0  ;;  %v8763_v52 = vld [vmem:[#allocation9 + $0xdc] sm:$0xf]  ;;  %v5210_v58 = vadd.f32 %v5209_v13, %v5197_v53 }
 0x404   :  { %v7407_v21 = vor.u32 %v8763_v52, %v7404_v51  ;;  %v8971_v0 = vld [vmem:[#allocation9 + $0x75c] sm:$0xf] }
 0x405   :  { %5488 = vmatpush.bf16.msra.mxu3 %v7727_v62  ;;  %5466 = vmatpush.bf16.msra.mxu1 %v8107_v59  ;;  %v7596_v62 = vld [vmem:[#allocation9 + $0x278] sm:$0xf0]  ;;  %9008 = vtanh.f32 %v5210_v58  ;;  %v9656_v9 = vpop.f32.mrf.mxu2  ;;  %v8239_v20 = vor.u32 %v8971_v0, %v8236_v2 }
 0x406   :  { %v7599_v8 = vor.u32 %v8811_v61, %v7596_v62  ;;  %v7564_v59 = vld [vmem:[#allocation9 + $0x238] sm:$0xf0] }
 0x407   :  { %5474 = vmatpush.bf16.msra.mxu2 %v7503_v3  ;;  %5452 = vmatpush.bf16.msra.mxu0 %v7883_v44  ;;  %v7372_v3 = vld [vmem:[#allocation9 + $0xb8] sm:$0xf0]  ;;  %v5198_v32 = vpop.f32.mrf.mxu0  ;;  %v5237_v13 = vpop.f32.mrf.mxu3  ;;  %v7567_v24 = vor.u32 %v8803_v12, %v7564_v59 }
 0x408   :  { %v7375_v22 = vor.u32 %v8755_v4, %v7372_v3  ;;  %v8204_v44 = vld [vmem:[#allocation9 + $0x738] sm:$0xf0] }
 0x409   :  { %5489 = vmatpush.bf16.msra.mxu3 %v7695_v48  ;;  %5467 = vmatpush.bf16.msra.mxu1 %v8075_v41  ;;  %v8015_v48 = vor.u32 %v8915_v5, %v8012_v7  ;;  %v7980_v47 = vld [vmem:[#allocation9 + $0x578] sm:$0xf0]  ;;  %v9659_v23 = vpop.f32.mrf.mxu1  ;;  %v8207_v27 = vor.u32 %v8963_v6, %v8204_v44  ;;  %v3815_v5 = vperm.slane %v9638_v17, 2 }
 0x40a   :  { %v8955_v28 = vld [vmem:[#allocation9 + $0x6dc] sm:$0xf]  ;;  %v7983_v41 = vor.u32 %v8907_v18, %v7980_v47 }
 0x40b   :  { %5475 = vmatpush.bf16.msra.mxu2 %v7471_v19  ;;  %5453 = vmatpush.bf16.msra.mxu0 %v7851_v43  ;;  %v9007_v19 = vpop.eup %9006  ;;  %v8172_v31 = vld [vmem:[#allocation9 + $0x6f8] sm:$0xf0]  ;;  %v5223_v7 = vadd.f32 %v9656_v9, %v3815_v5 }
 0x40c   :  { %5468 = vmatmul.bf16.vlgmr.msra.gmra.mxu1 %v9603_v11  ;;  %v9009_v26 = vpop.eup %9008  ;;  %v8899_v35 = vld [vmem:[#allocation9 + $0x51c] sm:$0xf]  ;;  %v8175_v45 = vor.u32 %v8955_v28, %v8172_v31  ;;  %v3817_v31 = vperm.slane %v9638_v17, 4 }
 0x40d   :  { %5490 = vmatpush.bf16.msra.mxu3 %v7663_v16  ;;  %5512 = vmatpush.bf16.msrb.mxu1 %v8303_v34  ;;  %v5533_v30 = vpack.c.bf16 %v9009_v26, %v9007_v19  ;;  %v8739_v16 = vld [vmem:[#allocation9 + $0x1c] sm:$0xf]  ;;  %v5224_v43 = vpop.f32.mrf.mxu2  ;;  %v5236_v12 = vadd.f32 %v9653_v50, %v5223_v7 }
 0x40e   :  { %v7308_v34 = vld [vmem:[#allocation9 + $0x38] sm:$0xf0] }
 0x40f   :  { %5476 = vmatpush.bf16.msra.mxu2 %v7439_v38  ;;  %5454 = vmatpush.bf16.msra.mxu0 %v7819_v60  ;;  %v7948_v15 = vld [vmem:[#allocation9 + $0x538] sm:$0xf0]  ;;  %5537 = vst [vmem:[%s9700_s14] sm:$0xff] %v5533_v30  ;;  %v7311_v38 = vor.u32 %v8739_v16, %v7308_v34  ;;  %v5248_v63 = vpop.f32.mrf.mxu0 }
 0x410   :  { %v7951_v42 = vor.u32 %v8899_v35, %v7948_v15  ;;  %v8947_v36 = vld [vmem:[#allocation9 + $0x69c] sm:$0xf]  ;;  %v5249_v32 = vadd.f32 %v5248_v63, %v5236_v12  ;;  %v3818_v35 = vperm.slane %v9638_v17, 5 }
 0x411   :  { %5491 = vmatpush.bf16.msra.mxu3 %v7631_v40  ;;  %5513 = vmatpush.bf16.msrb.mxu1 %v8271_v57  ;;  %v8140_v39 = vld [vmem:[#allocation9 + $0x6b8] sm:$0xf0]  ;;  %v5263_v52 = vpop.f32.mrf.mxu1 }
 0x412   :  { %5455 = vmatmul.bf16.vlgmr.msra.gmra.mxu0 %v9607_v33  ;;  %v8891_v49 = vld [vmem:[#allocation9 + $0x4dc] sm:$0xf]  ;;  %v8143_v51 = vor.u32 %v8947_v36, %v8140_v39  ;;  %v5262_v44 = vadd.f32 %v9659_v23, %v5249_v32 }
 0x413   :  { %5477 = vmatpush.bf16.msra.mxu2 %v7407_v21  ;;  %5499 = vmatpush.bf16.msrb.mxu0 %v8047_v1  ;;  %v7916_v37 = vld [vmem:[#allocation9 + $0x4f8] sm:$0xf0] }
 0x414   :  { %v7919_v53 = vor.u32 %v8891_v49, %v7916_v37  ;;  %v8939_v54 = vld [vmem:[#allocation9 + $0x65c] sm:$0xf]  ;;  %9010 = vtanh.f32 %v5262_v44 }
 0x415   :  { %5492 = vmatpush.bf16.msra.mxu3 %v7599_v8  ;;  %5514 = vmatpush.bf16.msrb.mxu1 %v8239_v20  ;;  %v8108_v55 = vld [vmem:[#allocation9 + $0x678] sm:$0xf0]  ;;  %v3816_v20 = vperm.slane %v9638_v17, 3 }
 0x416   :  { %v8883_v56 = vld [vmem:[#allocation9 + $0x49c] sm:$0xf]  ;;  %v8111_v57 = vor.u32 %v8939_v54, %v8108_v55 }
 0x417   :  { %5478 = vmatpush.bf16.msra.mxu2 %v7375_v22  ;;  %5500 = vmatpush.bf16.msrb.mxu0 %v8015_v48  ;;  %v7884_v40 = vld [vmem:[#allocation9 + $0x4b8] sm:$0xf0]  ;;  %v5250_v21 = vpop.f32.mrf.mxu0 }
 0x418   :  { %v7887_v58 = vor.u32 %v8883_v56, %v7884_v40  ;;  %v8076_v60 = vld [vmem:[#allocation9 + $0x638] sm:$0xf0] }
 0x419   :  { %5493 = vmatpush.bf16.msra.mxu3 %v7567_v24  ;;  %5515 = vmatpush.bf16.msrb.mxu1 %v8207_v27  ;;  %v8875_v61 = vld [vmem:[#allocation9 + $0x45c] sm:$0xf] }
 0x41a   :  { %v7852_v62 = vld [vmem:[#allocation9 + $0x478] sm:$0xf0]  ;;  %v9011_v47 = vpop.eup %9010 }
 0x41b   :  { %5479 = vmatpush.bf16.msra.mxu2 %v7343_v10  ;;  %5501 = vmatpush.bf16.msrb.mxu0 %v7983_v41  ;;  %v7855_v1 = vor.u32 %v8875_v61, %v7852_v62  ;;  %v8867_v4 = vld [vmem:[#allocation9 + $0x41c] sm:$0xf] }
 0x41c   :  { %5494 = vmatmul.bf16.vlgmr.msra.gmra.mxu3 %v9595_v29  ;;  %v8931_v29 = vld [vmem:[#allocation9 + $0x61c] sm:$0xf] }
 0x41d   :  { %5516 = vmatpush.bf16.msrb.mxu1 %v8175_v45  ;;  %v8079_v0 = vor.u32 %v8931_v29, %v8076_v60  ;;  %v7820_v3 = vld [vmem:[#allocation9 + $0x438] sm:$0xf0] }
 0x41f   :  { %5480 = vmatpush.bf16.msra.mxu2 %v7311_v38  ;;  %5502 = vmatpush.bf16.msrb.mxu0 %v7951_v42  ;;  %v5287_v2 = vpop.f32.mrf.mxu3 }
 0x421   :  { %5517 = vmatpush.bf16.msrb.mxu1 %v8143_v51 }
 0x422   :  { %5481 = vmatmul.bf16.vlgmr.msra.gmra.mxu2 %v9598_v46  ;;  %v7823_v46 = vor.u32 %v8867_v4, %v7820_v3  ;;  %v3820_v3 = vperm.slane %v9638_v17, 7 }
 0x423   :  { %5503 = vmatpush.bf16.msrb.mxu0 %v7919_v53 }
 0x425   :  { %5518 = vmatpush.bf16.msrb.mxu1 %v8111_v57  ;;  %v5274_v8 = vpop.f32.mrf.mxu2 }
 0x426   :  { %v5275_v6 = vadd.f32 %v5274_v8, %v3816_v20 }
 0x427   :  { %5504 = vmatpush.bf16.msrb.mxu0 %v7887_v58  ;;  %v5289_v22 = vpop.f32.mrf.mxu3 }
 0x428   :  { %v5288_v48 = vadd.f32 %v5287_v2, %v5275_v6 }
 0x429   :  { %5519 = vmatpush.bf16.msrb.mxu1 %v8079_v0  ;;  %v5313_v59 = vpop.f32.mrf.mxu1 }
 0x42b   :  { %5505 = vmatpush.bf16.msrb.mxu0 %v7855_v1  ;;  %v3819_v1 = vperm.slane %v9638_v17, 6 }
 0x42c   :  { %5520 = vmatmul.bf16.vlgmr.msrb.gmra.mxu1 %v9603_v11 }
 0x42d   :  { %v5276_v13 = vpop.f32.mrf.mxu2 }
 0x42f   :  { %5506 = vmatpush.bf16.msrb.mxu0 %v7823_v46  ;;  %v5300_v25 = vpop.f32.mrf.mxu0 }
 0x430   :  { %v5301_v11 = vadd.f32 %v5300_v25, %v5288_v48 }
 0x431   :  { %v5315_v14 = vpop.f32.mrf.mxu1 }
 0x432   :  { %5507 = vmatmul.bf16.vlgmr.msrb.gmra.mxu0 %v9607_v33  ;;  %v5314_v9 = vadd.f32 %v5313_v59, %v5301_v11 }
 0x434   :  { %9012 = vtanh.f32 %v5314_v9 }
 0x437   :  { %v5302_v18 = vpop.f32.mrf.mxu0 }
 0x43a   :  { %v9013_v19 = vpop.eup %9012 }
 0x43b   :  { %v5534_v24 = vpack.c.bf16 %v9013_v19, %v9011_v47 }
 0x43d   :  { %5538 = vst [vmem:[%s9700_s14 + $0x8] sm:$0xff] %v5534_v24 }
 0x43f   :  { %v5339_v50 = vpop.f32.mrf.mxu3 }
 0x445   :  { %v5326_v33 = vpop.f32.mrf.mxu2 }
 0x446   :  { %v5327_v34 = vadd.f32 %v5326_v33, %v3817_v31 }
 0x447   :  { %v5341_v26 = vpop.f32.mrf.mxu3 }
 0x448   :  { %v5340_v43 = vadd.f32 %v5339_v50, %v5327_v34 }
 0x449   :  { %v5365_v27 = vpop.f32.mrf.mxu1 }
 0x44d   :  { %v5328_v10 = vpop.f32.mrf.mxu2 }
 0x44f   :  { %v5352_v23 = vpop.f32.mrf.mxu0 }
 0x450   :  { %v5353_v42 = vadd.f32 %v5352_v23, %v5340_v43 }
 0x451   :  { %v5367_v28 = vpop.f32.mrf.mxu1 }
 0x452   :  { %v5366_v63 = vadd.f32 %v5365_v27, %v5353_v42 }
 0x454   :  { %9014 = vtanh.f32 %v5366_v63 }
 0x457   :  { %v5354_v30 = vpop.f32.mrf.mxu0 }
 0x45a   :  { %v9015_v54 = vpop.eup %9014 }
 0x45f   :  { %v5391_v41 = vpop.f32.mrf.mxu3 }
 0x465   :  { %v5378_v16 = vpop.f32.mrf.mxu2 }
 0x466   :  { %v5379_v38 = vadd.f32 %v5378_v16, %v3818_v35 }
 0x467   :  { %v5393_v15 = vpop.f32.mrf.mxu3 }
 0x468   :  { %v5392_v39 = vadd.f32 %v5391_v41, %v5379_v38 }
 0x469   :  { %v5417_v45 = vpop.f32.mrf.mxu1 }
 0x46d   :  { %v5380_v36 = vpop.f32.mrf.mxu2 }
 0x46f   :  { %v5404_v49 = vpop.f32.mrf.mxu0 }
 0x470   :  { %v5405_v37 = vadd.f32 %v5404_v49, %v5392_v39 }
 0x471   :  { %v5419_v52 = vpop.f32.mrf.mxu1 }
 0x472   :  { %v5418_v51 = vadd.f32 %v5417_v45, %v5405_v37 }
 0x474   :  { %9016 = vtanh.f32 %v5418_v51 }
 0x477   :  { %v5406_v53 = vpop.f32.mrf.mxu0 }
 0x47a   :  { %v9017_v55 = vpop.eup %9016 }
 0x47b   :  { %v5535_v56 = vpack.c.bf16 %v9017_v55, %v9015_v54 }
 0x47d   :  { %5539 = vst [vmem:[%s9700_s14 + $0x10] sm:$0xff] %v5535_v56 }
 0x47f   :  { %v5443_v40 = vpop.f32.mrf.mxu3 }
 0x485   :  { %v5430_v57 = vpop.f32.mrf.mxu2 }
 0x486   :  { %v5431_v4 = vadd.f32 %v5430_v57, %v3819_v1 }
 0x487   :  { %v5445_v58 = vpop.f32.mrf.mxu3 }
 0x488   :  { %v5444_v46 = vadd.f32 %v5443_v40, %v5431_v4 }
 0x489   :  { %v5469_v29 = vpop.f32.mrf.mxu1 }
 0x48d   :  { %v5432_v60 = vpop.f32.mrf.mxu2 }
 0x48f   :  { %v5456_v21 = vpop.f32.mrf.mxu0 }
 0x490   :  { %v5457_v20 = vadd.f32 %v5456_v21, %v5444_v46 }
 0x491   :  { %v5471_v61 = vpop.f32.mrf.mxu1 }
 0x492   :  { %v5470_v59 = vadd.f32 %v5469_v29, %v5457_v20 }
 0x494   :  { %9018 = vtanh.f32 %v5470_v59 }
 0x497   :  { %v5458_v62 = vpop.f32.mrf.mxu0 }
 0x49a   :  { %v9019_v25 = vpop.eup %9018 }
 0x49f   :  { %v5495_v0 = vpop.f32.mrf.mxu3 }
 0x4a5   :  { %v5482_v2 = vpop.f32.mrf.mxu2 }
 0x4a6   :  { %v5483_v7 = vadd.f32 %v5482_v2, %v3820_v3 }
 0x4a7   :  { %v5497_v5 = vpop.f32.mrf.mxu3 }
 0x4a8   :  { %v5496_v12 = vadd.f32 %v5495_v0, %v5483_v7 }
 0x4a9   :  { %v5521_v8 = vpop.f32.mrf.mxu1 }
 0x4ad   :  { %v5484_v22 = vpop.f32.mrf.mxu2 }
 0x4af   :  { %v5508_v6 = vpop.f32.mrf.mxu0 }
 0x4b0   :  { %v5509_v32 = vadd.f32 %v5508_v6, %v5496_v12 }
 0x4b1   :  { %v5523_v48 = vpop.f32.mrf.mxu1 }
 0x4b2   :  { %v5522_v13 = vadd.f32 %v5521_v8, %v5509_v32 }
 0x4b4   :  { %9020 = vtanh.f32 %v5522_v13 }
 0x4b7   :  { %v5510_v44 = vpop.f32.mrf.mxu0 }
 0x4ba   :  { %v9021_v11 = vpop.eup %9020 }
 0x4bb   :  { %v5536_v14 = vpack.c.bf16 %v9021_v11, %v9019_v25 }
 0x4bd   :  { %5540 = vst [vmem:[%s9700_s14 + $0x18] sm:$0xff] %v5536_v14 }
 0x4be   :  { %5549 = vsyncpa [#allocation3], 1 }
 0x4bf   :  { %5550 = vsyncpa [#allocation5], 1 }
 0x4c0   :  { %5551 = vsyncpa [#allocation8], 1 }

</bundles_post_ra>
